<compile_context>
chip_gen: v5e
topology: v5e:2x2
jax: 0.10.0
libtpu: 0.0.40
codegen_flags: <defaults>
</compile_context>

<pallas_src>
import jax
import jax.numpy as jnp
from jax.experimental import pallas as pl
from jax.experimental.pallas import tpu as pltpu


def _round_up(v, m):
    return ((v + m - 1) // m) * m


def afm_kernel(emb_ref, lin_ref, w_aug_ref, b1_ref, w2t_ref, bias_ref,
               out_ref, s_scr, q_scr):
    """One batch tile of the AFM forward.

    emb_ref  : (F, D, TB)   gathered field embeddings, batch on lanes
    lin_ref  : (F, TB)      gathered per-field linear weights
    w_aug_ref: (A_aug, D)   rows [0:A] = W1^T, row A = proj^T, rest zero
    b1_ref   : (A, 1)       attention layer-1 bias
    w2t_ref  : (8, A)       row 0 = attention layer-2 weight, rest zero
    bias_ref : (1,)         global FM linear bias (SMEM)
    out_ref  : (8, TB)      sigmoid(first + second); row 0 is the result
    s_scr    : (P, TB) f32  per-pair attention logits (deferred softmax)
    q_scr    : (P, TB) f32  per-pair projected interactions
    """
    num_fields = emb_ref.shape[0]
    tb = emb_ref.shape[2]
    att_dim = b1_ref.shape[0]

    w_aug = w_aug_ref[...]                                    # (A_aug, D)
    w2t = w2t_ref[...]                                        # (8, A)
    # Hoisted lane-broadcast of the layer-1 bias (not CSE'd if left in-loop).
    b1b = jnp.broadcast_to(b1_ref[...], (att_dim, tb))        # (A, TB)

    # TODO(synk): for very large num_fields (hundreds of pairs) replace this
    # static unroll with a fori_loop over SMEM-resident pair-index tables.
    k = 0
    for i in range(num_fields):
        e_i = emb_ref[i]                                      # (D, TB)
        for j in range(i + 1, num_fields):
            prod = e_i * emb_ref[j]                           # (D, TB)    VPU
            # One MXU dot yields both the attention hidden layer (rows 0:A)
            # and the projected interaction q_k (row A) for this pair.
            h_aug = jnp.dot(w_aug, prod,
                            preferred_element_type=jnp.float32)  # (A_aug, TB)
            h = jnp.maximum(h_aug[:att_dim] + b1b, 0.0)       # (A, TB)     VPU
            s8 = jnp.dot(w2t, h,
                         preferred_element_type=jnp.float32)  # (8, TB)     MXU
            s_scr[pl.ds(k, 1), :] = s8[0:1]                   # attention logit
            q_scr[pl.ds(k, 1), :] = h_aug[att_dim:att_dim + 1]  # pre-ReLU, no bias
            k += 1

    # Deferred softmax over the pair axis, fused with the (linear) projection:
    #   second[b] = sum_k softmax_k(s)[b] * q[k, b]
    s = s_scr[...]                                            # (P, TB)
    q = q_scr[...]
    m = jnp.max(s, axis=0, keepdims=True)                     # (1, TB)   XLU
    e = jnp.exp(s - m)                                        # (P, TB)   EUP
    denom = jnp.sum(e, axis=0, keepdims=True)                 # (1, TB)
    numer = jnp.sum(e * q, axis=0, keepdims=True)             # (1, TB)
    second = numer / denom

    # TODO(synk): nn.Dropout on attention weights is identity in eval mode; not applied.
    first = jnp.sum(lin_ref[...], axis=0, keepdims=True) + bias_ref[0]  # (1, TB)

    res = jax.nn.sigmoid(first + second)                      # (1, TB)
    out_ref[...] = jnp.broadcast_to(res, out_ref.shape)       # lane-dense store


def _pick_tb(batch, tb):
    """Batch tile: multiple of 128, no larger than the padded batch, and capped
    so the grid keeps >= 2 steps whenever the batch allows it (v7x: 2 TCs)."""
    tb = max(128, (int(tb) // 128) * 128)
    tb = min(tb, _round_up(batch, 128))
    if batch > 128:
        tb = min(tb, _round_up((batch + 1) // 2, 128))
    return tb


def afm_forward(x, params, *, tb=1024):
    """x: (B, F) int32 categorical indices. Returns (B,) float32 scores.

    tb: requested batch tile (multiple of 128). VMEM is not the limiter on any
    generation; 1024-2048 amortizes the ~0.35us per-grid-step overhead. The
    wrapper caps it to keep >= 2 grid steps for megacore sharding on v7x.
    """
    emb_table = params["emb_table"]          # (sum(field_dims), D)
    lin_table = params["lin_table"]          # (sum(field_dims), 1)
    offsets = params["offsets"]              # (F,) int32

    B, F = x.shape
    D = emb_table.shape[1]
    A = params["att_w1"].shape[1]
    P = F * (F - 1) // 2
    A_aug = _round_up(A + 1, 8)

    tb = _pick_tb(B, tb)
    b_pad = _round_up(B, tb)

    # --- glue: pad the tiny int32 index array, then gather -------------------
    idx = x + offsets[None, :]                                # (B, F)
    if b_pad != B:
        idx = jnp.pad(idx, ((0, b_pad - B), (0, 0)))          # padded rows -> row 0
    idx_t = jnp.transpose(idx)                                # (F, B_pad) int32

    emb = jnp.take(emb_table, idx_t, axis=0)                  # (F, B_pad, D)
    # TODO(synk): this (F,B,D)->(F,D,B) transpose is the one remaining big XLA
    # pass; it could move in-kernel as one per-field XLU transpose per tile.
    emb_t = jnp.transpose(emb, (0, 2, 1))                     # (F, D, B_pad)
    lin_t = jnp.take(lin_table, idx_t, axis=0)[..., 0]        # (F, B_pad)

    # --- weight prep: fold proj into W1^T, pad rows to a sublane multiple ----
    w1t = jnp.transpose(params["att_w1"])                     # (A, D)
    projt = jnp.transpose(params["proj_w"])                   # (1, D)
    w_aug = jnp.zeros((A_aug, D), jnp.float32)
    w_aug = w_aug.at[:A].set(w1t).at[A].set(projt[0])
    b1_col = params["att_b1"].reshape(A, 1)
    w2t = jnp.zeros((8, A), jnp.float32).at[0].set(params["att_w2"].reshape(A))
    bias = params["lin_bias"].reshape(1).astype(jnp.float32)

    grid = (b_pad // tb,)
    out = pl.pallas_call(
        afm_kernel,
        out_shape=jax.ShapeDtypeStruct((8, b_pad), jnp.float32),
        grid=grid,
        in_specs=[
            pl.BlockSpec((F, D, tb), lambda i: (0, 0, i)),    # embeddings
            pl.BlockSpec((F, tb), lambda i: (0, i)),          # linear values
            pl.BlockSpec((A_aug, D), lambda i: (0, 0)),       # W_aug (W1^T + proj^T)
            pl.BlockSpec((A, 1), lambda i: (0, 0)),           # att b1
            pl.BlockSpec((8, A), lambda i: (0, 0)),           # att w2 (row 0)
            pl.BlockSpec(memory_space=pltpu.MemorySpace.SMEM),  # FM bias scalar
        ],
        out_specs=pl.BlockSpec((8, tb), lambda i: (0, i)),
        scratch_shapes=[
            pltpu.VMEM((P, tb), jnp.float32),                 # attention logits
            pltpu.VMEM((P, tb), jnp.float32),                 # projected interactions
        ],
        compiler_params=pltpu.CompilerParams(
            dimension_semantics=("parallel",)),
    )(emb_t, lin_t, w_aug, b1_col, w2t, bias)
    return out[0, :B]


def afm_reference(x, params):
    """Pure-JAX reference of the same forward pass (eval mode)."""
    idx = x + params["offsets"][None, :]
    emb = jnp.take(params["emb_table"], idx, axis=0)          # (B, F, D)
    lin_vals = jnp.take(params["lin_table"], idx, axis=0)[..., 0]
    B, F, D = emb.shape
    row = [i for i in range(F) for j in range(i + 1, F)]
    col = [j for i in range(F) for j in range(i + 1, F)]
    p = emb[:, row, :] * emb[:, col, :]                       # (B, P, D)
    h = jnp.maximum(jnp.dot(p, params["att_w1"]) + params["att_b1"], 0.0)
    scores = jnp.dot(h, params["att_w2"])[..., 0]             # (B, P)
    attn = jax.nn.softmax(scores, axis=1)
    p_sum = jnp.sum(p * attn[:, :, None], axis=1)             # (B, D)
    second = jnp.dot(p_sum, params["proj_w"])                 # (B, 1)
    first = jnp.sum(lin_vals, axis=1, keepdims=True) + params["lin_bias"][0]
    return jax.nn.sigmoid(first + second)[:, 0]


def make_params(key, field_dims, embedding_dim, attention_dim):
    total = sum(field_dims)
    ks = jax.random.split(key, 5)
    off = [0]
    for fd in field_dims[:-1]:
        off.append(off[-1] + fd)
    return {
        "offsets": jnp.asarray(off, jnp.int32),
        "emb_table": jax.random.normal(ks[0], (total, embedding_dim), jnp.float32) * 0.1,
        "lin_table": jax.random.normal(ks[1], (total, 1), jnp.float32) * 0.1,
        "lin_bias": jnp.zeros((1,), jnp.float32),
        "att_w1": jax.random.normal(ks[2], (embedding_dim, attention_dim), jnp.float32)
                  * (1.0 / jnp.sqrt(embedding_dim)),
        "att_b1": jax.random.normal(ks[3], (attention_dim,), jnp.float32) * 0.1,
        "att_w2": jax.random.normal(ks[4], (attention_dim, 1), jnp.float32)
                  * (1.0 / jnp.sqrt(attention_dim)),
        "proj_w": jax.random.normal(jax.random.fold_in(key, 7),
                                    (embedding_dim, 1), jnp.float32)
                  * (1.0 / jnp.sqrt(embedding_dim)),
    }


if __name__ == "__main__":
    key = jax.random.PRNGKey(0)
    field_dims = [10, 20, 30, 15, 25, 12, 18, 22]   # 8 fields -> 28 pairs
    embedding_dim = 32
    attention_dim = 32
    batch = 384                                      # exercises grid=2 + batch padding

    pkey, xkey = jax.random.split(key)
    params = make_params(pkey, field_dims, embedding_dim, attention_dim)

    # categorical inputs: one index per field, in [0, field_dim)
    xkeys = jax.random.split(xkey, len(field_dims))
    cols = [jax.random.randint(k, (batch,), 0, fd, jnp.int32)
            for k, fd in zip(xkeys, field_dims)]
    x = jnp.stack(cols, axis=1)                      # (B, F) int32

    y = jax.block_until_ready(afm_forward(x, params))
    y_ref = afm_reference(x, params)

    assert y.shape == (batch,)
    assert jnp.allclose(y, y_ref, atol=1e-5, rtol=1e-5), \
        float(jnp.max(jnp.abs(y - y_ref)))

    print("KERNEL_OK")
</pallas_src>

<mosaic_0001>
module attributes {stable_mosaic.version = 11 : i64} {
  func.func @afm_kernel(%arg0: i32, %arg1: memref<8x32x256xf32, #tpu.memory_space<vmem>>, %arg2: memref<8x256xf32, #tpu.memory_space<vmem>>, %arg3: memref<40x32xf32, #tpu.memory_space<vmem>>, %arg4: memref<32x1xf32, #tpu.memory_space<vmem>>, %arg5: memref<8x32xf32, #tpu.memory_space<vmem>>, %arg6: memref<1xf32, #tpu.memory_space<smem>>, %arg7: memref<8x256xf32, #tpu.memory_space<vmem>>, %arg8: memref<28x256xf32, #tpu.memory_space<vmem>>, %arg9: memref<28x256xf32, #tpu.memory_space<vmem>>) attributes {dimension_semantics = [#tpu.dimension_semantics<parallel>], iteration_bounds = array<i64: 2>, scalar_prefetch = 0 : i64, scratch_operands = 2 : i64, tpu.core_type = #tpu.core_type<tc>, window_params = [{transform_indices = @transform_0, window_bounds = array<i64: 8, 32, 256>}, {transform_indices = @transform_1, window_bounds = array<i64: 8, 256>}, {pipeline_mode = #tpu.pipeline_mode<synchronous>, transform_indices = @transform_2, window_bounds = array<i64: 40, 32>}, {pipeline_mode = #tpu.pipeline_mode<synchronous>, transform_indices = @transform_3, window_bounds = array<i64: 32, 1>}, {pipeline_mode = #tpu.pipeline_mode<synchronous>, transform_indices = @transform_4, window_bounds = array<i64: 8, 32>}, {transform_indices = @transform_5, window_bounds = array<i64: 1>}, {transform_indices = @transform_6, window_bounds = array<i64: 8, 256>}]} {
    %c0 = arith.constant 0 : index
    %c0_0 = arith.constant 0 : index
    %0 = vector.load %arg3[%c0, %c0_0] : memref<40x32xf32, #tpu.memory_space<vmem>>, vector<40x32xf32>
    %c0_1 = arith.constant 0 : index
    %c0_2 = arith.constant 0 : index
    %1 = vector.load %arg5[%c0_1, %c0_2] : memref<8x32xf32, #tpu.memory_space<vmem>>, vector<8x32xf32>
    %c0_3 = arith.constant 0 : index
    %c0_4 = arith.constant 0 : index
    %2 = vector.load %arg4[%c0_3, %c0_4] : memref<32x1xf32, #tpu.memory_space<vmem>>, vector<32x1xf32>
    %3 = vector.shape_cast %2 : vector<32x1xf32> to vector<32x1xf32>
    %4 = vector.broadcast %3 : vector<32x1xf32> to vector<32x256xf32>
    %c0_5 = arith.constant 0 : index
    %c0_6 = arith.constant 0 : index
    %c0_7 = arith.constant 0 : index
    %5 = vector.load %arg1[%c0_5, %c0_6, %c0_7] : memref<8x32x256xf32, #tpu.memory_space<vmem>>, vector<1x32x256xf32>
    %6 = vector.shape_cast %5 : vector<1x32x256xf32> to vector<32x256xf32>
    %c1 = arith.constant 1 : index
    %c0_8 = arith.constant 0 : index
    %c0_9 = arith.constant 0 : index
    %7 = vector.load %arg1[%c1, %c0_8, %c0_9] : memref<8x32x256xf32, #tpu.memory_space<vmem>>, vector<1x32x256xf32>
    %8 = vector.shape_cast %7 : vector<1x32x256xf32> to vector<32x256xf32>
    %9 = arith.mulf %6, %8 : vector<32x256xf32>
    %cst = arith.constant dense<0.000000e+00> : vector<40x256xf32>
    %10 = tpu.matmul %0, %9, %cst {dimension_numbers = #tpu.dot_dimension_numbers<[1], [0], [0], [1], [0, 0, 1, 1], [], []>} : vector<40x32xf32>, vector<32x256xf32>, vector<40x256xf32> -> vector<40x256xf32>
    %11 = vector.extract_strided_slice %10 {offsets = [0, 0], sizes = [32, 256], strides = [1, 1]} : vector<40x256xf32> to vector<32x256xf32>
    %12 = arith.addf %11, %4 : vector<32x256xf32>
    %cst_10 = arith.constant 0.000000e+00 : f32
    %13 = vector.broadcast %cst_10 : f32 to vector<32x256xf32>
    %14 = arith.maximumf %12, %13 : vector<32x256xf32>
    %cst_11 = arith.constant dense<0.000000e+00> : vector<8x256xf32>
    %15 = tpu.matmul %1, %14, %cst_11 {dimension_numbers = #tpu.dot_dimension_numbers<[1], [0], [0], [1], [0, 0, 1, 1], [], []>} : vector<8x32xf32>, vector<32x256xf32>, vector<8x256xf32> -> vector<8x256xf32>
    %16 = vector.extract_strided_slice %15 {offsets = [0, 0], sizes = [1, 256], strides = [1, 1]} : vector<8x256xf32> to vector<1x256xf32>
    %c0_12 = arith.constant 0 : index
    %c0_13 = arith.constant 0 : index
    %17 = vector.load %arg8[%c0_12, %c0_13] : memref<28x256xf32, #tpu.memory_space<vmem>>, vector<1x256xf32>
    tpu.vector_store %arg8[%c0_12, %c0_13], %16 {strides = array<i32>} : memref<28x256xf32, #tpu.memory_space<vmem>>, vector<1x256xf32>,
    %18 = vector.extract_strided_slice %10 {offsets = [32, 0], sizes = [1, 256], strides = [1, 1]} : vector<40x256xf32> to vector<1x256xf32>
    %c0_14 = arith.constant 0 : index
    %c0_15 = arith.constant 0 : index
    %19 = vector.load %arg9[%c0_14, %c0_15] : memref<28x256xf32, #tpu.memory_space<vmem>>, vector<1x256xf32>
    tpu.vector_store %arg9[%c0_14, %c0_15], %18 {strides = array<i32>} : memref<28x256xf32, #tpu.memory_space<vmem>>, vector<1x256xf32>,
    %c2 = arith.constant 2 : index
    %c0_16 = arith.constant 0 : index
    %c0_17 = arith.constant 0 : index
    %20 = vector.load %arg1[%c2, %c0_16, %c0_17] : memref<8x32x256xf32, #tpu.memory_space<vmem>>, vector<1x32x256xf32>
    %21 = vector.shape_cast %20 : vector<1x32x256xf32> to vector<32x256xf32>
    %22 = arith.mulf %6, %21 : vector<32x256xf32>
    %cst_18 = arith.constant dense<0.000000e+00> : vector<40x256xf32>
    %23 = tpu.matmul %0, %22, %cst_18 {dimension_numbers = #tpu.dot_dimension_numbers<[1], [0], [0], [1], [0, 0, 1, 1], [], []>} : vector<40x32xf32>, vector<32x256xf32>, vector<40x256xf32> -> vector<40x256xf32>
    %24 = vector.extract_strided_slice %23 {offsets = [0, 0], sizes = [32, 256], strides = [1, 1]} : vector<40x256xf32> to vector<32x256xf32>
    %25 = arith.addf %24, %4 : vector<32x256xf32>
    %cst_19 = arith.constant 0.000000e+00 : f32
    %26 = vector.broadcast %cst_19 : f32 to vector<32x256xf32>
    %27 = arith.maximumf %25, %26 : vector<32x256xf32>
    %cst_20 = arith.constant dense<0.000000e+00> : vector<8x256xf32>
    %28 = tpu.matmul %1, %27, %cst_20 {dimension_numbers = #tpu.dot_dimension_numbers<[1], [0], [0], [1], [0, 0, 1, 1], [], []>} : vector<8x32xf32>, vector<32x256xf32>, vector<8x256xf32> -> vector<8x256xf32>
    %29 = vector.extract_strided_slice %28 {offsets = [0, 0], sizes = [1, 256], strides = [1, 1]} : vector<8x256xf32> to vector<1x256xf32>
    %c1_21 = arith.constant 1 : index
    %c0_22 = arith.constant 0 : index
    %30 = vector.load %arg8[%c1_21, %c0_22] : memref<28x256xf32, #tpu.memory_space<vmem>>, vector<1x256xf32>
    tpu.vector_store %arg8[%c1_21, %c0_22], %29 {strides = array<i32>} : memref<28x256xf32, #tpu.memory_space<vmem>>, vector<1x256xf32>,
    %31 = vector.extract_strided_slice %23 {offsets = [32, 0], sizes = [1, 256], strides = [1, 1]} : vector<40x256xf32> to vector<1x256xf32>
    %c1_23 = arith.constant 1 : index
    %c0_24 = arith.constant 0 : index
    %32 = vector.load %arg9[%c1_23, %c0_24] : memref<28x256xf32, #tpu.memory_space<vmem>>, vector<1x256xf32>
    tpu.vector_store %arg9[%c1_23, %c0_24], %31 {strides = array<i32>} : memref<28x256xf32, #tpu.memory_space<vmem>>, vector<1x256xf32>,
    %c3 = arith.constant 3 : index
    %c0_25 = arith.constant 0 : index
    %c0_26 = arith.constant 0 : index
    %33 = vector.load %arg1[%c3, %c0_25, %c0_26] : memref<8x32x256xf32, #tpu.memory_space<vmem>>, vector<1x32x256xf32>
    %34 = vector.shape_cast %33 : vector<1x32x256xf32> to vector<32x256xf32>
    %35 = arith.mulf %6, %34 : vector<32x256xf32>
    %cst_27 = arith.constant dense<0.000000e+00> : vector<40x256xf32>
    %36 = tpu.matmul %0, %35, %cst_27 {dimension_numbers = #tpu.dot_dimension_numbers<[1], [0], [0], [1], [0, 0, 1, 1], [], []>} : vector<40x32xf32>, vector<32x256xf32>, vector<40x256xf32> -> vector<40x256xf32>
    %37 = vector.extract_strided_slice %36 {offsets = [0, 0], sizes = [32, 256], strides = [1, 1]} : vector<40x256xf32> to vector<32x256xf32>
    %38 = arith.addf %37, %4 : vector<32x256xf32>
    %cst_28 = arith.constant 0.000000e+00 : f32
    %39 = vector.broadcast %cst_28 : f32 to vector<32x256xf32>
    %40 = arith.maximumf %38, %39 : vector<32x256xf32>
    %cst_29 = arith.constant dense<0.000000e+00> : vector<8x256xf32>
    %41 = tpu.matmul %1, %40, %cst_29 {dimension_numbers = #tpu.dot_dimension_numbers<[1], [0], [0], [1], [0, 0, 1, 1], [], []>} : vector<8x32xf32>, vector<32x256xf32>, vector<8x256xf32> -> vector<8x256xf32>
    %42 = vector.extract_strided_slice %41 {offsets = [0, 0], sizes = [1, 256], strides = [1, 1]} : vector<8x256xf32> to vector<1x256xf32>
    %c2_30 = arith.constant 2 : index
    %c0_31 = arith.constant 0 : index
    %43 = vector.load %arg8[%c2_30, %c0_31] : memref<28x256xf32, #tpu.memory_space<vmem>>, vector<1x256xf32>
    tpu.vector_store %arg8[%c2_30, %c0_31], %42 {strides = array<i32>} : memref<28x256xf32, #tpu.memory_space<vmem>>, vector<1x256xf32>,
    %44 = vector.extract_strided_slice %36 {offsets = [32, 0], sizes = [1, 256], strides = [1, 1]} : vector<40x256xf32> to vector<1x256xf32>
    %c2_32 = arith.constant 2 : index
    %c0_33 = arith.constant 0 : index
    %45 = vector.load %arg9[%c2_32, %c0_33] : memref<28x256xf32, #tpu.memory_space<vmem>>, vector<1x256xf32>
    tpu.vector_store %arg9[%c2_32, %c0_33], %44 {strides = array<i32>} : memref<28x256xf32, #tpu.memory_space<vmem>>, vector<1x256xf32>,
    %c4 = arith.constant 4 : index
    %c0_34 = arith.constant 0 : index
    %c0_35 = arith.constant 0 : index
    %46 = vector.load %arg1[%c4, %c0_34, %c0_35] : memref<8x32x256xf32, #tpu.memory_space<vmem>>, vector<1x32x256xf32>
    %47 = vector.shape_cast %46 : vector<1x32x256xf32> to vector<32x256xf32>
    %48 = arith.mulf %6, %47 : vector<32x256xf32>
    %cst_36 = arith.constant dense<0.000000e+00> : vector<40x256xf32>
    %49 = tpu.matmul %0, %48, %cst_36 {dimension_numbers = #tpu.dot_dimension_numbers<[1], [0], [0], [1], [0, 0, 1, 1], [], []>} : vector<40x32xf32>, vector<32x256xf32>, vector<40x256xf32> -> vector<40x256xf32>
    %50 = vector.extract_strided_slice %49 {offsets = [0, 0], sizes = [32, 256], strides = [1, 1]} : vector<40x256xf32> to vector<32x256xf32>
    %51 = arith.addf %50, %4 : vector<32x256xf32>
    %cst_37 = arith.constant 0.000000e+00 : f32
    %52 = vector.broadcast %cst_37 : f32 to vector<32x256xf32>
    %53 = arith.maximumf %51, %52 : vector<32x256xf32>
    %cst_38 = arith.constant dense<0.000000e+00> : vector<8x256xf32>
    %54 = tpu.matmul %1, %53, %cst_38 {dimension_numbers = #tpu.dot_dimension_numbers<[1], [0], [0], [1], [0, 0, 1, 1], [], []>} : vector<8x32xf32>, vector<32x256xf32>, vector<8x256xf32> -> vector<8x256xf32>
    %55 = vector.extract_strided_slice %54 {offsets = [0, 0], sizes = [1, 256], strides = [1, 1]} : vector<8x256xf32> to vector<1x256xf32>
    %c3_39 = arith.constant 3 : index
    %c0_40 = arith.constant 0 : index
    %56 = vector.load %arg8[%c3_39, %c0_40] : memref<28x256xf32, #tpu.memory_space<vmem>>, vector<1x256xf32>
    tpu.vector_store %arg8[%c3_39, %c0_40], %55 {strides = array<i32>} : memref<28x256xf32, #tpu.memory_space<vmem>>, vector<1x256xf32>,
    %57 = vector.extract_strided_slice %49 {offsets = [32, 0], sizes = [1, 256], strides = [1, 1]} : vector<40x256xf32> to vector<1x256xf32>
    %c3_41 = arith.constant 3 : index
    %c0_42 = arith.constant 0 : index
    %58 = vector.load %arg9[%c3_41, %c0_42] : memref<28x256xf32, #tpu.memory_space<vmem>>, vector<1x256xf32>
    tpu.vector_store %arg9[%c3_41, %c0_42], %57 {strides = array<i32>} : memref<28x256xf32, #tpu.memory_space<vmem>>, vector<1x256xf32>,
    %c5 = arith.constant 5 : index
    %c0_43 = arith.constant 0 : index
    %c0_44 = arith.constant 0 : index
    %59 = vector.load %arg1[%c5, %c0_43, %c0_44] : memref<8x32x256xf32, #tpu.memory_space<vmem>>, vector<1x32x256xf32>
    %60 = vector.shape_cast %59 : vector<1x32x256xf32> to vector<32x256xf32>
    %61 = arith.mulf %6, %60 : vector<32x256xf32>
    %cst_45 = arith.constant dense<0.000000e+00> : vector<40x256xf32>
    %62 = tpu.matmul %0, %61, %cst_45 {dimension_numbers = #tpu.dot_dimension_numbers<[1], [0], [0], [1], [0, 0, 1, 1], [], []>} : vector<40x32xf32>, vector<32x256xf32>, vector<40x256xf32> -> vector<40x256xf32>
    %63 = vector.extract_strided_slice %62 {offsets = [0, 0], sizes = [32, 256], strides = [1, 1]} : vector<40x256xf32> to vector<32x256xf32>
    %64 = arith.addf %63, %4 : vector<32x256xf32>
    %cst_46 = arith.constant 0.000000e+00 : f32
    %65 = vector.broadcast %cst_46 : f32 to vector<32x256xf32>
    %66 = arith.maximumf %64, %65 : vector<32x256xf32>
    %cst_47 = arith.constant dense<0.000000e+00> : vector<8x256xf32>
    %67 = tpu.matmul %1, %66, %cst_47 {dimension_numbers = #tpu.dot_dimension_numbers<[1], [0], [0], [1], [0, 0, 1, 1], [], []>} : vector<8x32xf32>, vector<32x256xf32>, vector<8x256xf32> -> vector<8x256xf32>
    %68 = vector.extract_strided_slice %67 {offsets = [0, 0], sizes = [1, 256], strides = [1, 1]} : vector<8x256xf32> to vector<1x256xf32>
    %c4_48 = arith.constant 4 : index
    %c0_49 = arith.constant 0 : index
    %69 = vector.load %arg8[%c4_48, %c0_49] : memref<28x256xf32, #tpu.memory_space<vmem>>, vector<1x256xf32>
    tpu.vector_store %arg8[%c4_48, %c0_49], %68 {strides = array<i32>} : memref<28x256xf32, #tpu.memory_space<vmem>>, vector<1x256xf32>,
    %70 = vector.extract_strided_slice %62 {offsets = [32, 0], sizes = [1, 256], strides = [1, 1]} : vector<40x256xf32> to vector<1x256xf32>
    %c4_50 = arith.constant 4 : index
    %c0_51 = arith.constant 0 : index
    %71 = vector.load %arg9[%c4_50, %c0_51] : memref<28x256xf32, #tpu.memory_space<vmem>>, vector<1x256xf32>
    tpu.vector_store %arg9[%c4_50, %c0_51], %70 {strides = array<i32>} : memref<28x256xf32, #tpu.memory_space<vmem>>, vector<1x256xf32>,
    %c6 = arith.constant 6 : index
    %c0_52 = arith.constant 0 : index
    %c0_53 = arith.constant 0 : index
    %72 = vector.load %arg1[%c6, %c0_52, %c0_53] : memref<8x32x256xf32, #tpu.memory_space<vmem>>, vector<1x32x256xf32>
    %73 = vector.shape_cast %72 : vector<1x32x256xf32> to vector<32x256xf32>
    %74 = arith.mulf %6, %73 : vector<32x256xf32>
    %cst_54 = arith.constant dense<0.000000e+00> : vector<40x256xf32>
    %75 = tpu.matmul %0, %74, %cst_54 {dimension_numbers = #tpu.dot_dimension_numbers<[1], [0], [0], [1], [0, 0, 1, 1], [], []>} : vector<40x32xf32>, vector<32x256xf32>, vector<40x256xf32> -> vector<40x256xf32>
    %76 = vector.extract_strided_slice %75 {offsets = [0, 0], sizes = [32, 256], strides = [1, 1]} : vector<40x256xf32> to vector<32x256xf32>
    %77 = arith.addf %76, %4 : vector<32x256xf32>
    %cst_55 = arith.constant 0.000000e+00 : f32
    %78 = vector.broadcast %cst_55 : f32 to vector<32x256xf32>
    %79 = arith.maximumf %77, %78 : vector<32x256xf32>
    %cst_56 = arith.constant dense<0.000000e+00> : vector<8x256xf32>
    %80 = tpu.matmul %1, %79, %cst_56 {dimension_numbers = #tpu.dot_dimension_numbers<[1], [0], [0], [1], [0, 0, 1, 1], [], []>} : vector<8x32xf32>, vector<32x256xf32>, vector<8x256xf32> -> vector<8x256xf32>
    %81 = vector.extract_strided_slice %80 {offsets = [0, 0], sizes = [1, 256], strides = [1, 1]} : vector<8x256xf32> to vector<1x256xf32>
    %c5_57 = arith.constant 5 : index
    %c0_58 = arith.constant 0 : index
    %82 = vector.load %arg8[%c5_57, %c0_58] : memref<28x256xf32, #tpu.memory_space<vmem>>, vector<1x256xf32>
    tpu.vector_store %arg8[%c5_57, %c0_58], %81 {strides = array<i32>} : memref<28x256xf32, #tpu.memory_space<vmem>>, vector<1x256xf32>,
    %83 = vector.extract_strided_slice %75 {offsets = [32, 0], sizes = [1, 256], strides = [1, 1]} : vector<40x256xf32> to vector<1x256xf32>
    %c5_59 = arith.constant 5 : index
    %c0_60 = arith.constant 0 : index
    %84 = vector.load %arg9[%c5_59, %c0_60] : memref<28x256xf32, #tpu.memory_space<vmem>>, vector<1x256xf32>
    tpu.vector_store %arg9[%c5_59, %c0_60], %83 {strides = array<i32>} : memref<28x256xf32, #tpu.memory_space<vmem>>, vector<1x256xf32>,
    %c7 = arith.constant 7 : index
    %c0_61 = arith.constant 0 : index
    %c0_62 = arith.constant 0 : index
    %85 = vector.load %arg1[%c7, %c0_61, %c0_62] : memref<8x32x256xf32, #tpu.memory_space<vmem>>, vector<1x32x256xf32>
    %86 = vector.shape_cast %85 : vector<1x32x256xf32> to vector<32x256xf32>
    %87 = arith.mulf %6, %86 : vector<32x256xf32>
    %cst_63 = arith.constant dense<0.000000e+00> : vector<40x256xf32>
    %88 = tpu.matmul %0, %87, %cst_63 {dimension_numbers = #tpu.dot_dimension_numbers<[1], [0], [0], [1], [0, 0, 1, 1], [], []>} : vector<40x32xf32>, vector<32x256xf32>, vector<40x256xf32> -> vector<40x256xf32>
    %89 = vector.extract_strided_slice %88 {offsets = [0, 0], sizes = [32, 256], strides = [1, 1]} : vector<40x256xf32> to vector<32x256xf32>
    %90 = arith.addf %89, %4 : vector<32x256xf32>
    %cst_64 = arith.constant 0.000000e+00 : f32
    %91 = vector.broadcast %cst_64 : f32 to vector<32x256xf32>
    %92 = arith.maximumf %90, %91 : vector<32x256xf32>
    %cst_65 = arith.constant dense<0.000000e+00> : vector<8x256xf32>
    %93 = tpu.matmul %1, %92, %cst_65 {dimension_numbers = #tpu.dot_dimension_numbers<[1], [0], [0], [1], [0, 0, 1, 1], [], []>} : vector<8x32xf32>, vector<32x256xf32>, vector<8x256xf32> -> vector<8x256xf32>
    %94 = vector.extract_strided_slice %93 {offsets = [0, 0], sizes = [1, 256], strides = [1, 1]} : vector<8x256xf32> to vector<1x256xf32>
    %c6_66 = arith.constant 6 : index
    %c0_67 = arith.constant 0 : index
    %95 = vector.load %arg8[%c6_66, %c0_67] : memref<28x256xf32, #tpu.memory_space<vmem>>, vector<1x256xf32>
    tpu.vector_store %arg8[%c6_66, %c0_67], %94 {strides = array<i32>} : memref<28x256xf32, #tpu.memory_space<vmem>>, vector<1x256xf32>,
    %96 = vector.extract_strided_slice %88 {offsets = [32, 0], sizes = [1, 256], strides = [1, 1]} : vector<40x256xf32> to vector<1x256xf32>
    %c6_68 = arith.constant 6 : index
    %c0_69 = arith.constant 0 : index
    %97 = vector.load %arg9[%c6_68, %c0_69] : memref<28x256xf32, #tpu.memory_space<vmem>>, vector<1x256xf32>
    tpu.vector_store %arg9[%c6_68, %c0_69], %96 {strides = array<i32>} : memref<28x256xf32, #tpu.memory_space<vmem>>, vector<1x256xf32>,
    %c1_70 = arith.constant 1 : index
    %c0_71 = arith.constant 0 : index
    %c0_72 = arith.constant 0 : index
    %98 = vector.load %arg1[%c1_70, %c0_71, %c0_72] : memref<8x32x256xf32, #tpu.memory_space<vmem>>, vector<1x32x256xf32>
    %99 = vector.shape_cast %98 : vector<1x32x256xf32> to vector<32x256xf32>
    %c2_73 = arith.constant 2 : index
    %c0_74 = arith.constant 0 : index
    %c0_75 = arith.constant 0 : index
    %100 = vector.load %arg1[%c2_73, %c0_74, %c0_75] : memref<8x32x256xf32, #tpu.memory_space<vmem>>, vector<1x32x256xf32>
    %101 = vector.shape_cast %100 : vector<1x32x256xf32> to vector<32x256xf32>
    %102 = arith.mulf %99, %101 : vector<32x256xf32>
    %cst_76 = arith.constant dense<0.000000e+00> : vector<40x256xf32>
    %103 = tpu.matmul %0, %102, %cst_76 {dimension_numbers = #tpu.dot_dimension_numbers<[1], [0], [0], [1], [0, 0, 1, 1], [], []>} : vector<40x32xf32>, vector<32x256xf32>, vector<40x256xf32> -> vector<40x256xf32>
    %104 = vector.extract_strided_slice %103 {offsets = [0, 0], sizes = [32, 256], strides = [1, 1]} : vector<40x256xf32> to vector<32x256xf32>
    %105 = arith.addf %104, %4 : vector<32x256xf32>
    %cst_77 = arith.constant 0.000000e+00 : f32
    %106 = vector.broadcast %cst_77 : f32 to vector<32x256xf32>
    %107 = arith.maximumf %105, %106 : vector<32x256xf32>
    %cst_78 = arith.constant dense<0.000000e+00> : vector<8x256xf32>
    %108 = tpu.matmul %1, %107, %cst_78 {dimension_numbers = #tpu.dot_dimension_numbers<[1], [0], [0], [1], [0, 0, 1, 1], [], []>} : vector<8x32xf32>, vector<32x256xf32>, vector<8x256xf32> -> vector<8x256xf32>
    %109 = vector.extract_strided_slice %108 {offsets = [0, 0], sizes = [1, 256], strides = [1, 1]} : vector<8x256xf32> to vector<1x256xf32>
    %c7_79 = arith.constant 7 : index
    %c0_80 = arith.constant 0 : index
    %110 = vector.load %arg8[%c7_79, %c0_80] : memref<28x256xf32, #tpu.memory_space<vmem>>, vector<1x256xf32>
    tpu.vector_store %arg8[%c7_79, %c0_80], %109 {strides = array<i32>} : memref<28x256xf32, #tpu.memory_space<vmem>>, vector<1x256xf32>,
    %111 = vector.extract_strided_slice %103 {offsets = [32, 0], sizes = [1, 256], strides = [1, 1]} : vector<40x256xf32> to vector<1x256xf32>
    %c7_81 = arith.constant 7 : index
    %c0_82 = arith.constant 0 : index
    %112 = vector.load %arg9[%c7_81, %c0_82] : memref<28x256xf32, #tpu.memory_space<vmem>>, vector<1x256xf32>
    tpu.vector_store %arg9[%c7_81, %c0_82], %111 {strides = array<i32>} : memref<28x256xf32, #tpu.memory_space<vmem>>, vector<1x256xf32>,
    %c3_83 = arith.constant 3 : index
    %c0_84 = arith.constant 0 : index
    %c0_85 = arith.constant 0 : index
    %113 = vector.load %arg1[%c3_83, %c0_84, %c0_85] : memref<8x32x256xf32, #tpu.memory_space<vmem>>, vector<1x32x256xf32>
    %114 = vector.shape_cast %113 : vector<1x32x256xf32> to vector<32x256xf32>
    %115 = arith.mulf %99, %114 : vector<32x256xf32>
    %cst_86 = arith.constant dense<0.000000e+00> : vector<40x256xf32>
    %116 = tpu.matmul %0, %115, %cst_86 {dimension_numbers = #tpu.dot_dimension_numbers<[1], [0], [0], [1], [0, 0, 1, 1], [], []>} : vector<40x32xf32>, vector<32x256xf32>, vector<40x256xf32> -> vector<40x256xf32>
    %117 = vector.extract_strided_slice %116 {offsets = [0, 0], sizes = [32, 256], strides = [1, 1]} : vector<40x256xf32> to vector<32x256xf32>
    %118 = arith.addf %117, %4 : vector<32x256xf32>
    %cst_87 = arith.constant 0.000000e+00 : f32
    %119 = vector.broadcast %cst_87 : f32 to vector<32x256xf32>
    %120 = arith.maximumf %118, %119 : vector<32x256xf32>
    %cst_88 = arith.constant dense<0.000000e+00> : vector<8x256xf32>
    %121 = tpu.matmul %1, %120, %cst_88 {dimension_numbers = #tpu.dot_dimension_numbers<[1], [0], [0], [1], [0, 0, 1, 1], [], []>} : vector<8x32xf32>, vector<32x256xf32>, vector<8x256xf32> -> vector<8x256xf32>
    %122 = vector.extract_strided_slice %121 {offsets = [0, 0], sizes = [1, 256], strides = [1, 1]} : vector<8x256xf32> to vector<1x256xf32>
    %c8 = arith.constant 8 : index
    %c0_89 = arith.constant 0 : index
    %123 = vector.load %arg8[%c8, %c0_89] : memref<28x256xf32, #tpu.memory_space<vmem>>, vector<1x256xf32>
    tpu.vector_store %arg8[%c8, %c0_89], %122 {strides = array<i32>} : memref<28x256xf32, #tpu.memory_space<vmem>>, vector<1x256xf32>,
    %124 = vector.extract_strided_slice %116 {offsets = [32, 0], sizes = [1, 256], strides = [1, 1]} : vector<40x256xf32> to vector<1x256xf32>
    %c8_90 = arith.constant 8 : index
    %c0_91 = arith.constant 0 : index
    %125 = vector.load %arg9[%c8_90, %c0_91] : memref<28x256xf32, #tpu.memory_space<vmem>>, vector<1x256xf32>
    tpu.vector_store %arg9[%c8_90, %c0_91], %124 {strides = array<i32>} : memref<28x256xf32, #tpu.memory_space<vmem>>, vector<1x256xf32>,
    %c4_92 = arith.constant 4 : index
    %c0_93 = arith.constant 0 : index
    %c0_94 = arith.constant 0 : index
    %126 = vector.load %arg1[%c4_92, %c0_93, %c0_94] : memref<8x32x256xf32, #tpu.memory_space<vmem>>, vector<1x32x256xf32>
    %127 = vector.shape_cast %126 : vector<1x32x256xf32> to vector<32x256xf32>
    %128 = arith.mulf %99, %127 : vector<32x256xf32>
    %cst_95 = arith.constant dense<0.000000e+00> : vector<40x256xf32>
    %129 = tpu.matmul %0, %128, %cst_95 {dimension_numbers = #tpu.dot_dimension_numbers<[1], [0], [0], [1], [0, 0, 1, 1], [], []>} : vector<40x32xf32>, vector<32x256xf32>, vector<40x256xf32> -> vector<40x256xf32>
    %130 = vector.extract_strided_slice %129 {offsets = [0, 0], sizes = [32, 256], strides = [1, 1]} : vector<40x256xf32> to vector<32x256xf32>
    %131 = arith.addf %130, %4 : vector<32x256xf32>
    %cst_96 = arith.constant 0.000000e+00 : f32
    %132 = vector.broadcast %cst_96 : f32 to vector<32x256xf32>
    %133 = arith.maximumf %131, %132 : vector<32x256xf32>
    %cst_97 = arith.constant dense<0.000000e+00> : vector<8x256xf32>
    %134 = tpu.matmul %1, %133, %cst_97 {dimension_numbers = #tpu.dot_dimension_numbers<[1], [0], [0], [1], [0, 0, 1, 1], [], []>} : vector<8x32xf32>, vector<32x256xf32>, vector<8x256xf32> -> vector<8x256xf32>
    %135 = vector.extract_strided_slice %134 {offsets = [0, 0], sizes = [1, 256], strides = [1, 1]} : vector<8x256xf32> to vector<1x256xf32>
    %c9 = arith.constant 9 : index
    %c0_98 = arith.constant 0 : index
    %136 = vector.load %arg8[%c9, %c0_98] : memref<28x256xf32, #tpu.memory_space<vmem>>, vector<1x256xf32>
    tpu.vector_store %arg8[%c9, %c0_98], %135 {strides = array<i32>} : memref<28x256xf32, #tpu.memory_space<vmem>>, vector<1x256xf32>,
    %137 = vector.extract_strided_slice %129 {offsets = [32, 0], sizes = [1, 256], strides = [1, 1]} : vector<40x256xf32> to vector<1x256xf32>
    %c9_99 = arith.constant 9 : index
    %c0_100 = arith.constant 0 : index
    %138 = vector.load %arg9[%c9_99, %c0_100] : memref<28x256xf32, #tpu.memory_space<vmem>>, vector<1x256xf32>
    tpu.vector_store %arg9[%c9_99, %c0_100], %137 {strides = array<i32>} : memref<28x256xf32, #tpu.memory_space<vmem>>, vector<1x256xf32>,
    %c5_101 = arith.constant 5 : index
    %c0_102 = arith.constant 0 : index
    %c0_103 = arith.constant 0 : index
    %139 = vector.load %arg1[%c5_101, %c0_102, %c0_103] : memref<8x32x256xf32, #tpu.memory_space<vmem>>, vector<1x32x256xf32>
    %140 = vector.shape_cast %139 : vector<1x32x256xf32> to vector<32x256xf32>
    %141 = arith.mulf %99, %140 : vector<32x256xf32>
    %cst_104 = arith.constant dense<0.000000e+00> : vector<40x256xf32>
    %142 = tpu.matmul %0, %141, %cst_104 {dimension_numbers = #tpu.dot_dimension_numbers<[1], [0], [0], [1], [0, 0, 1, 1], [], []>} : vector<40x32xf32>, vector<32x256xf32>, vector<40x256xf32> -> vector<40x256xf32>
    %143 = vector.extract_strided_slice %142 {offsets = [0, 0], sizes = [32, 256], strides = [1, 1]} : vector<40x256xf32> to vector<32x256xf32>
    %144 = arith.addf %143, %4 : vector<32x256xf32>
    %cst_105 = arith.constant 0.000000e+00 : f32
    %145 = vector.broadcast %cst_105 : f32 to vector<32x256xf32>
    %146 = arith.maximumf %144, %145 : vector<32x256xf32>
    %cst_106 = arith.constant dense<0.000000e+00> : vector<8x256xf32>
    %147 = tpu.matmul %1, %146, %cst_106 {dimension_numbers = #tpu.dot_dimension_numbers<[1], [0], [0], [1], [0, 0, 1, 1], [], []>} : vector<8x32xf32>, vector<32x256xf32>, vector<8x256xf32> -> vector<8x256xf32>
    %148 = vector.extract_strided_slice %147 {offsets = [0, 0], sizes = [1, 256], strides = [1, 1]} : vector<8x256xf32> to vector<1x256xf32>
    %c10 = arith.constant 10 : index
    %c0_107 = arith.constant 0 : index
    %149 = vector.load %arg8[%c10, %c0_107] : memref<28x256xf32, #tpu.memory_space<vmem>>, vector<1x256xf32>
    tpu.vector_store %arg8[%c10, %c0_107], %148 {strides = array<i32>} : memref<28x256xf32, #tpu.memory_space<vmem>>, vector<1x256xf32>,
    %150 = vector.extract_strided_slice %142 {offsets = [32, 0], sizes = [1, 256], strides = [1, 1]} : vector<40x256xf32> to vector<1x256xf32>
    %c10_108 = arith.constant 10 : index
    %c0_109 = arith.constant 0 : index
    %151 = vector.load %arg9[%c10_108, %c0_109] : memref<28x256xf32, #tpu.memory_space<vmem>>, vector<1x256xf32>
    tpu.vector_store %arg9[%c10_108, %c0_109], %150 {strides = array<i32>} : memref<28x256xf32, #tpu.memory_space<vmem>>, vector<1x256xf32>,
    %c6_110 = arith.constant 6 : index
    %c0_111 = arith.constant 0 : index
    %c0_112 = arith.constant 0 : index
    %152 = vector.load %arg1[%c6_110, %c0_111, %c0_112] : memref<8x32x256xf32, #tpu.memory_space<vmem>>, vector<1x32x256xf32>
    %153 = vector.shape_cast %152 : vector<1x32x256xf32> to vector<32x256xf32>
    %154 = arith.mulf %99, %153 : vector<32x256xf32>
    %cst_113 = arith.constant dense<0.000000e+00> : vector<40x256xf32>
    %155 = tpu.matmul %0, %154, %cst_113 {dimension_numbers = #tpu.dot_dimension_numbers<[1], [0], [0], [1], [0, 0, 1, 1], [], []>} : vector<40x32xf32>, vector<32x256xf32>, vector<40x256xf32> -> vector<40x256xf32>
    %156 = vector.extract_strided_slice %155 {offsets = [0, 0], sizes = [32, 256], strides = [1, 1]} : vector<40x256xf32> to vector<32x256xf32>
    %157 = arith.addf %156, %4 : vector<32x256xf32>
    %cst_114 = arith.constant 0.000000e+00 : f32
    %158 = vector.broadcast %cst_114 : f32 to vector<32x256xf32>
    %159 = arith.maximumf %157, %158 : vector<32x256xf32>
    %cst_115 = arith.constant dense<0.000000e+00> : vector<8x256xf32>
    %160 = tpu.matmul %1, %159, %cst_115 {dimension_numbers = #tpu.dot_dimension_numbers<[1], [0], [0], [1], [0, 0, 1, 1], [], []>} : vector<8x32xf32>, vector<32x256xf32>, vector<8x256xf32> -> vector<8x256xf32>
    %161 = vector.extract_strided_slice %160 {offsets = [0, 0], sizes = [1, 256], strides = [1, 1]} : vector<8x256xf32> to vector<1x256xf32>
    %c11 = arith.constant 11 : index
    %c0_116 = arith.constant 0 : index
    %162 = vector.load %arg8[%c11, %c0_116] : memref<28x256xf32, #tpu.memory_space<vmem>>, vector<1x256xf32>
    tpu.vector_store %arg8[%c11, %c0_116], %161 {strides = array<i32>} : memref<28x256xf32, #tpu.memory_space<vmem>>, vector<1x256xf32>,
    %163 = vector.extract_strided_slice %155 {offsets = [32, 0], sizes = [1, 256], strides = [1, 1]} : vector<40x256xf32> to vector<1x256xf32>
    %c11_117 = arith.constant 11 : index
    %c0_118 = arith.constant 0 : index
    %164 = vector.load %arg9[%c11_117, %c0_118] : memref<28x256xf32, #tpu.memory_space<vmem>>, vector<1x256xf32>
    tpu.vector_store %arg9[%c11_117, %c0_118], %163 {strides = array<i32>} : memref<28x256xf32, #tpu.memory_space<vmem>>, vector<1x256xf32>,
    %c7_119 = arith.constant 7 : index
    %c0_120 = arith.constant 0 : index
    %c0_121 = arith.constant 0 : index
    %165 = vector.load %arg1[%c7_119, %c0_120, %c0_121] : memref<8x32x256xf32, #tpu.memory_space<vmem>>, vector<1x32x256xf32>
    %166 = vector.shape_cast %165 : vector<1x32x256xf32> to vector<32x256xf32>
    %167 = arith.mulf %99, %166 : vector<32x256xf32>
    %cst_122 = arith.constant dense<0.000000e+00> : vector<40x256xf32>
    %168 = tpu.matmul %0, %167, %cst_122 {dimension_numbers = #tpu.dot_dimension_numbers<[1], [0], [0], [1], [0, 0, 1, 1], [], []>} : vector<40x32xf32>, vector<32x256xf32>, vector<40x256xf32> -> vector<40x256xf32>
    %169 = vector.extract_strided_slice %168 {offsets = [0, 0], sizes = [32, 256], strides = [1, 1]} : vector<40x256xf32> to vector<32x256xf32>
    %170 = arith.addf %169, %4 : vector<32x256xf32>
    %cst_123 = arith.constant 0.000000e+00 : f32
    %171 = vector.broadcast %cst_123 : f32 to vector<32x256xf32>
    %172 = arith.maximumf %170, %171 : vector<32x256xf32>
    %cst_124 = arith.constant dense<0.000000e+00> : vector<8x256xf32>
    %173 = tpu.matmul %1, %172, %cst_124 {dimension_numbers = #tpu.dot_dimension_numbers<[1], [0], [0], [1], [0, 0, 1, 1], [], []>} : vector<8x32xf32>, vector<32x256xf32>, vector<8x256xf32> -> vector<8x256xf32>
    %174 = vector.extract_strided_slice %173 {offsets = [0, 0], sizes = [1, 256], strides = [1, 1]} : vector<8x256xf32> to vector<1x256xf32>
    %c12 = arith.constant 12 : index
    %c0_125 = arith.constant 0 : index
    %175 = vector.load %arg8[%c12, %c0_125] : memref<28x256xf32, #tpu.memory_space<vmem>>, vector<1x256xf32>
    tpu.vector_store %arg8[%c12, %c0_125], %174 {strides = array<i32>} : memref<28x256xf32, #tpu.memory_space<vmem>>, vector<1x256xf32>,
    %176 = vector.extract_strided_slice %168 {offsets = [32, 0], sizes = [1, 256], strides = [1, 1]} : vector<40x256xf32> to vector<1x256xf32>
    %c12_126 = arith.constant 12 : index
    %c0_127 = arith.constant 0 : index
    %177 = vector.load %arg9[%c12_126, %c0_127] : memref<28x256xf32, #tpu.memory_space<vmem>>, vector<1x256xf32>
    tpu.vector_store %arg9[%c12_126, %c0_127], %176 {strides = array<i32>} : memref<28x256xf32, #tpu.memory_space<vmem>>, vector<1x256xf32>,
    %c2_128 = arith.constant 2 : index
    %c0_129 = arith.constant 0 : index
    %c0_130 = arith.constant 0 : index
    %178 = vector.load %arg1[%c2_128, %c0_129, %c0_130] : memref<8x32x256xf32, #tpu.memory_space<vmem>>, vector<1x32x256xf32>
    %179 = vector.shape_cast %178 : vector<1x32x256xf32> to vector<32x256xf32>
    %c3_131 = arith.constant 3 : index
    %c0_132 = arith.constant 0 : index
    %c0_133 = arith.constant 0 : index
    %180 = vector.load %arg1[%c3_131, %c0_132, %c0_133] : memref<8x32x256xf32, #tpu.memory_space<vmem>>, vector<1x32x256xf32>
    %181 = vector.shape_cast %180 : vector<1x32x256xf32> to vector<32x256xf32>
    %182 = arith.mulf %179, %181 : vector<32x256xf32>
    %cst_134 = arith.constant dense<0.000000e+00> : vector<40x256xf32>
    %183 = tpu.matmul %0, %182, %cst_134 {dimension_numbers = #tpu.dot_dimension_numbers<[1], [0], [0], [1], [0, 0, 1, 1], [], []>} : vector<40x32xf32>, vector<32x256xf32>, vector<40x256xf32> -> vector<40x256xf32>
    %184 = vector.extract_strided_slice %183 {offsets = [0, 0], sizes = [32, 256], strides = [1, 1]} : vector<40x256xf32> to vector<32x256xf32>
    %185 = arith.addf %184, %4 : vector<32x256xf32>
    %cst_135 = arith.constant 0.000000e+00 : f32
    %186 = vector.broadcast %cst_135 : f32 to vector<32x256xf32>
    %187 = arith.maximumf %185, %186 : vector<32x256xf32>
    %cst_136 = arith.constant dense<0.000000e+00> : vector<8x256xf32>
    %188 = tpu.matmul %1, %187, %cst_136 {dimension_numbers = #tpu.dot_dimension_numbers<[1], [0], [0], [1], [0, 0, 1, 1], [], []>} : vector<8x32xf32>, vector<32x256xf32>, vector<8x256xf32> -> vector<8x256xf32>
    %189 = vector.extract_strided_slice %188 {offsets = [0, 0], sizes = [1, 256], strides = [1, 1]} : vector<8x256xf32> to vector<1x256xf32>
    %c13 = arith.constant 13 : index
    %c0_137 = arith.constant 0 : index
    %190 = vector.load %arg8[%c13, %c0_137] : memref<28x256xf32, #tpu.memory_space<vmem>>, vector<1x256xf32>
    tpu.vector_store %arg8[%c13, %c0_137], %189 {strides = array<i32>} : memref<28x256xf32, #tpu.memory_space<vmem>>, vector<1x256xf32>,
    %191 = vector.extract_strided_slice %183 {offsets = [32, 0], sizes = [1, 256], strides = [1, 1]} : vector<40x256xf32> to vector<1x256xf32>
    %c13_138 = arith.constant 13 : index
    %c0_139 = arith.constant 0 : index
    %192 = vector.load %arg9[%c13_138, %c0_139] : memref<28x256xf32, #tpu.memory_space<vmem>>, vector<1x256xf32>
    tpu.vector_store %arg9[%c13_138, %c0_139], %191 {strides = array<i32>} : memref<28x256xf32, #tpu.memory_space<vmem>>, vector<1x256xf32>,
    %c4_140 = arith.constant 4 : index
    %c0_141 = arith.constant 0 : index
    %c0_142 = arith.constant 0 : index
    %193 = vector.load %arg1[%c4_140, %c0_141, %c0_142] : memref<8x32x256xf32, #tpu.memory_space<vmem>>, vector<1x32x256xf32>
    %194 = vector.shape_cast %193 : vector<1x32x256xf32> to vector<32x256xf32>
    %195 = arith.mulf %179, %194 : vector<32x256xf32>
    %cst_143 = arith.constant dense<0.000000e+00> : vector<40x256xf32>
    %196 = tpu.matmul %0, %195, %cst_143 {dimension_numbers = #tpu.dot_dimension_numbers<[1], [0], [0], [1], [0, 0, 1, 1], [], []>} : vector<40x32xf32>, vector<32x256xf32>, vector<40x256xf32> -> vector<40x256xf32>
    %197 = vector.extract_strided_slice %196 {offsets = [0, 0], sizes = [32, 256], strides = [1, 1]} : vector<40x256xf32> to vector<32x256xf32>
    %198 = arith.addf %197, %4 : vector<32x256xf32>
    %cst_144 = arith.constant 0.000000e+00 : f32
    %199 = vector.broadcast %cst_144 : f32 to vector<32x256xf32>
    %200 = arith.maximumf %198, %199 : vector<32x256xf32>
    %cst_145 = arith.constant dense<0.000000e+00> : vector<8x256xf32>
    %201 = tpu.matmul %1, %200, %cst_145 {dimension_numbers = #tpu.dot_dimension_numbers<[1], [0], [0], [1], [0, 0, 1, 1], [], []>} : vector<8x32xf32>, vector<32x256xf32>, vector<8x256xf32> -> vector<8x256xf32>
    %202 = vector.extract_strided_slice %201 {offsets = [0, 0], sizes = [1, 256], strides = [1, 1]} : vector<8x256xf32> to vector<1x256xf32>
    %c14 = arith.constant 14 : index
    %c0_146 = arith.constant 0 : index
    %203 = vector.load %arg8[%c14, %c0_146] : memref<28x256xf32, #tpu.memory_space<vmem>>, vector<1x256xf32>
    tpu.vector_store %arg8[%c14, %c0_146], %202 {strides = array<i32>} : memref<28x256xf32, #tpu.memory_space<vmem>>, vector<1x256xf32>,
    %204 = vector.extract_strided_slice %196 {offsets = [32, 0], sizes = [1, 256], strides = [1, 1]} : vector<40x256xf32> to vector<1x256xf32>
    %c14_147 = arith.constant 14 : index
    %c0_148 = arith.constant 0 : index
    %205 = vector.load %arg9[%c14_147, %c0_148] : memref<28x256xf32, #tpu.memory_space<vmem>>, vector<1x256xf32>
    tpu.vector_store %arg9[%c14_147, %c0_148], %204 {strides = array<i32>} : memref<28x256xf32, #tpu.memory_space<vmem>>, vector<1x256xf32>,
    %c5_149 = arith.constant 5 : index
    %c0_150 = arith.constant 0 : index
    %c0_151 = arith.constant 0 : index
    %206 = vector.load %arg1[%c5_149, %c0_150, %c0_151] : memref<8x32x256xf32, #tpu.memory_space<vmem>>, vector<1x32x256xf32>
    %207 = vector.shape_cast %206 : vector<1x32x256xf32> to vector<32x256xf32>
    %208 = arith.mulf %179, %207 : vector<32x256xf32>
    %cst_152 = arith.constant dense<0.000000e+00> : vector<40x256xf32>
    %209 = tpu.matmul %0, %208, %cst_152 {dimension_numbers = #tpu.dot_dimension_numbers<[1], [0], [0], [1], [0, 0, 1, 1], [], []>} : vector<40x32xf32>, vector<32x256xf32>, vector<40x256xf32> -> vector<40x256xf32>
    %210 = vector.extract_strided_slice %209 {offsets = [0, 0], sizes = [32, 256], strides = [1, 1]} : vector<40x256xf32> to vector<32x256xf32>
    %211 = arith.addf %210, %4 : vector<32x256xf32>
    %cst_153 = arith.constant 0.000000e+00 : f32
    %212 = vector.broadcast %cst_153 : f32 to vector<32x256xf32>
    %213 = arith.maximumf %211, %212 : vector<32x256xf32>
    %cst_154 = arith.constant dense<0.000000e+00> : vector<8x256xf32>
    %214 = tpu.matmul %1, %213, %cst_154 {dimension_numbers = #tpu.dot_dimension_numbers<[1], [0], [0], [1], [0, 0, 1, 1], [], []>} : vector<8x32xf32>, vector<32x256xf32>, vector<8x256xf32> -> vector<8x256xf32>
    %215 = vector.extract_strided_slice %214 {offsets = [0, 0], sizes = [1, 256], strides = [1, 1]} : vector<8x256xf32> to vector<1x256xf32>
    %c15 = arith.constant 15 : index
    %c0_155 = arith.constant 0 : index
    %216 = vector.load %arg8[%c15, %c0_155] : memref<28x256xf32, #tpu.memory_space<vmem>>, vector<1x256xf32>
    tpu.vector_store %arg8[%c15, %c0_155], %215 {strides = array<i32>} : memref<28x256xf32, #tpu.memory_space<vmem>>, vector<1x256xf32>,
    %217 = vector.extract_strided_slice %209 {offsets = [32, 0], sizes = [1, 256], strides = [1, 1]} : vector<40x256xf32> to vector<1x256xf32>
    %c15_156 = arith.constant 15 : index
    %c0_157 = arith.constant 0 : index
    %218 = vector.load %arg9[%c15_156, %c0_157] : memref<28x256xf32, #tpu.memory_space<vmem>>, vector<1x256xf32>
    tpu.vector_store %arg9[%c15_156, %c0_157], %217 {strides = array<i32>} : memref<28x256xf32, #tpu.memory_space<vmem>>, vector<1x256xf32>,
    %c6_158 = arith.constant 6 : index
    %c0_159 = arith.constant 0 : index
    %c0_160 = arith.constant 0 : index
    %219 = vector.load %arg1[%c6_158, %c0_159, %c0_160] : memref<8x32x256xf32, #tpu.memory_space<vmem>>, vector<1x32x256xf32>
    %220 = vector.shape_cast %219 : vector<1x32x256xf32> to vector<32x256xf32>
    %221 = arith.mulf %179, %220 : vector<32x256xf32>
    %cst_161 = arith.constant dense<0.000000e+00> : vector<40x256xf32>
    %222 = tpu.matmul %0, %221, %cst_161 {dimension_numbers = #tpu.dot_dimension_numbers<[1], [0], [0], [1], [0, 0, 1, 1], [], []>} : vector<40x32xf32>, vector<32x256xf32>, vector<40x256xf32> -> vector<40x256xf32>
    %223 = vector.extract_strided_slice %222 {offsets = [0, 0], sizes = [32, 256], strides = [1, 1]} : vector<40x256xf32> to vector<32x256xf32>
    %224 = arith.addf %223, %4 : vector<32x256xf32>
    %cst_162 = arith.constant 0.000000e+00 : f32
    %225 = vector.broadcast %cst_162 : f32 to vector<32x256xf32>
    %226 = arith.maximumf %224, %225 : vector<32x256xf32>
    %cst_163 = arith.constant dense<0.000000e+00> : vector<8x256xf32>
    %227 = tpu.matmul %1, %226, %cst_163 {dimension_numbers = #tpu.dot_dimension_numbers<[1], [0], [0], [1], [0, 0, 1, 1], [], []>} : vector<8x32xf32>, vector<32x256xf32>, vector<8x256xf32> -> vector<8x256xf32>
    %228 = vector.extract_strided_slice %227 {offsets = [0, 0], sizes = [1, 256], strides = [1, 1]} : vector<8x256xf32> to vector<1x256xf32>
    %c16 = arith.constant 16 : index
    %c0_164 = arith.constant 0 : index
    %229 = vector.load %arg8[%c16, %c0_164] : memref<28x256xf32, #tpu.memory_space<vmem>>, vector<1x256xf32>
    tpu.vector_store %arg8[%c16, %c0_164], %228 {strides = array<i32>} : memref<28x256xf32, #tpu.memory_space<vmem>>, vector<1x256xf32>,
    %230 = vector.extract_strided_slice %222 {offsets = [32, 0], sizes = [1, 256], strides = [1, 1]} : vector<40x256xf32> to vector<1x256xf32>
    %c16_165 = arith.constant 16 : index
    %c0_166 = arith.constant 0 : index
    %231 = vector.load %arg9[%c16_165, %c0_166] : memref<28x256xf32, #tpu.memory_space<vmem>>, vector<1x256xf32>
    tpu.vector_store %arg9[%c16_165, %c0_166], %230 {strides = array<i32>} : memref<28x256xf32, #tpu.memory_space<vmem>>, vector<1x256xf32>,
    %c7_167 = arith.constant 7 : index
    %c0_168 = arith.constant 0 : index
    %c0_169 = arith.constant 0 : index
    %232 = vector.load %arg1[%c7_167, %c0_168, %c0_169] : memref<8x32x256xf32, #tpu.memory_space<vmem>>, vector<1x32x256xf32>
    %233 = vector.shape_cast %232 : vector<1x32x256xf32> to vector<32x256xf32>
    %234 = arith.mulf %179, %233 : vector<32x256xf32>
    %cst_170 = arith.constant dense<0.000000e+00> : vector<40x256xf32>
    %235 = tpu.matmul %0, %234, %cst_170 {dimension_numbers = #tpu.dot_dimension_numbers<[1], [0], [0], [1], [0, 0, 1, 1], [], []>} : vector<40x32xf32>, vector<32x256xf32>, vector<40x256xf32> -> vector<40x256xf32>
    %236 = vector.extract_strided_slice %235 {offsets = [0, 0], sizes = [32, 256], strides = [1, 1]} : vector<40x256xf32> to vector<32x256xf32>
    %237 = arith.addf %236, %4 : vector<32x256xf32>
    %cst_171 = arith.constant 0.000000e+00 : f32
    %238 = vector.broadcast %cst_171 : f32 to vector<32x256xf32>
    %239 = arith.maximumf %237, %238 : vector<32x256xf32>
    %cst_172 = arith.constant dense<0.000000e+00> : vector<8x256xf32>
    %240 = tpu.matmul %1, %239, %cst_172 {dimension_numbers = #tpu.dot_dimension_numbers<[1], [0], [0], [1], [0, 0, 1, 1], [], []>} : vector<8x32xf32>, vector<32x256xf32>, vector<8x256xf32> -> vector<8x256xf32>
    %241 = vector.extract_strided_slice %240 {offsets = [0, 0], sizes = [1, 256], strides = [1, 1]} : vector<8x256xf32> to vector<1x256xf32>
    %c17 = arith.constant 17 : index
    %c0_173 = arith.constant 0 : index
    %242 = vector.load %arg8[%c17, %c0_173] : memref<28x256xf32, #tpu.memory_space<vmem>>, vector<1x256xf32>
    tpu.vector_store %arg8[%c17, %c0_173], %241 {strides = array<i32>} : memref<28x256xf32, #tpu.memory_space<vmem>>, vector<1x256xf32>,
    %243 = vector.extract_strided_slice %235 {offsets = [32, 0], sizes = [1, 256], strides = [1, 1]} : vector<40x256xf32> to vector<1x256xf32>
    %c17_174 = arith.constant 17 : index
    %c0_175 = arith.constant 0 : index
    %244 = vector.load %arg9[%c17_174, %c0_175] : memref<28x256xf32, #tpu.memory_space<vmem>>, vector<1x256xf32>
    tpu.vector_store %arg9[%c17_174, %c0_175], %243 {strides = array<i32>} : memref<28x256xf32, #tpu.memory_space<vmem>>, vector<1x256xf32>,
    %c3_176 = arith.constant 3 : index
    %c0_177 = arith.constant 0 : index
    %c0_178 = arith.constant 0 : index
    %245 = vector.load %arg1[%c3_176, %c0_177, %c0_178] : memref<8x32x256xf32, #tpu.memory_space<vmem>>, vector<1x32x256xf32>
    %246 = vector.shape_cast %245 : vector<1x32x256xf32> to vector<32x256xf32>
    %c4_179 = arith.constant 4 : index
    %c0_180 = arith.constant 0 : index
    %c0_181 = arith.constant 0 : index
    %247 = vector.load %arg1[%c4_179, %c0_180, %c0_181] : memref<8x32x256xf32, #tpu.memory_space<vmem>>, vector<1x32x256xf32>
    %248 = vector.shape_cast %247 : vector<1x32x256xf32> to vector<32x256xf32>
    %249 = arith.mulf %246, %248 : vector<32x256xf32>
    %cst_182 = arith.constant dense<0.000000e+00> : vector<40x256xf32>
    %250 = tpu.matmul %0, %249, %cst_182 {dimension_numbers = #tpu.dot_dimension_numbers<[1], [0], [0], [1], [0, 0, 1, 1], [], []>} : vector<40x32xf32>, vector<32x256xf32>, vector<40x256xf32> -> vector<40x256xf32>
    %251 = vector.extract_strided_slice %250 {offsets = [0, 0], sizes = [32, 256], strides = [1, 1]} : vector<40x256xf32> to vector<32x256xf32>
    %252 = arith.addf %251, %4 : vector<32x256xf32>
    %cst_183 = arith.constant 0.000000e+00 : f32
    %253 = vector.broadcast %cst_183 : f32 to vector<32x256xf32>
    %254 = arith.maximumf %252, %253 : vector<32x256xf32>
    %cst_184 = arith.constant dense<0.000000e+00> : vector<8x256xf32>
    %255 = tpu.matmul %1, %254, %cst_184 {dimension_numbers = #tpu.dot_dimension_numbers<[1], [0], [0], [1], [0, 0, 1, 1], [], []>} : vector<8x32xf32>, vector<32x256xf32>, vector<8x256xf32> -> vector<8x256xf32>
    %256 = vector.extract_strided_slice %255 {offsets = [0, 0], sizes = [1, 256], strides = [1, 1]} : vector<8x256xf32> to vector<1x256xf32>
    %c18 = arith.constant 18 : index
    %c0_185 = arith.constant 0 : index
    %257 = vector.load %arg8[%c18, %c0_185] : memref<28x256xf32, #tpu.memory_space<vmem>>, vector<1x256xf32>
    tpu.vector_store %arg8[%c18, %c0_185], %256 {strides = array<i32>} : memref<28x256xf32, #tpu.memory_space<vmem>>, vector<1x256xf32>,
    %258 = vector.extract_strided_slice %250 {offsets = [32, 0], sizes = [1, 256], strides = [1, 1]} : vector<40x256xf32> to vector<1x256xf32>
    %c18_186 = arith.constant 18 : index
    %c0_187 = arith.constant 0 : index
    %259 = vector.load %arg9[%c18_186, %c0_187] : memref<28x256xf32, #tpu.memory_space<vmem>>, vector<1x256xf32>
    tpu.vector_store %arg9[%c18_186, %c0_187], %258 {strides = array<i32>} : memref<28x256xf32, #tpu.memory_space<vmem>>, vector<1x256xf32>,
    %c5_188 = arith.constant 5 : index
    %c0_189 = arith.constant 0 : index
    %c0_190 = arith.constant 0 : index
    %260 = vector.load %arg1[%c5_188, %c0_189, %c0_190] : memref<8x32x256xf32, #tpu.memory_space<vmem>>, vector<1x32x256xf32>
    %261 = vector.shape_cast %260 : vector<1x32x256xf32> to vector<32x256xf32>
    %262 = arith.mulf %246, %261 : vector<32x256xf32>
    %cst_191 = arith.constant dense<0.000000e+00> : vector<40x256xf32>
    %263 = tpu.matmul %0, %262, %cst_191 {dimension_numbers = #tpu.dot_dimension_numbers<[1], [0], [0], [1], [0, 0, 1, 1], [], []>} : vector<40x32xf32>, vector<32x256xf32>, vector<40x256xf32> -> vector<40x256xf32>
    %264 = vector.extract_strided_slice %263 {offsets = [0, 0], sizes = [32, 256], strides = [1, 1]} : vector<40x256xf32> to vector<32x256xf32>
    %265 = arith.addf %264, %4 : vector<32x256xf32>
    %cst_192 = arith.constant 0.000000e+00 : f32
    %266 = vector.broadcast %cst_192 : f32 to vector<32x256xf32>
    %267 = arith.maximumf %265, %266 : vector<32x256xf32>
    %cst_193 = arith.constant dense<0.000000e+00> : vector<8x256xf32>
    %268 = tpu.matmul %1, %267, %cst_193 {dimension_numbers = #tpu.dot_dimension_numbers<[1], [0], [0], [1], [0, 0, 1, 1], [], []>} : vector<8x32xf32>, vector<32x256xf32>, vector<8x256xf32> -> vector<8x256xf32>
    %269 = vector.extract_strided_slice %268 {offsets = [0, 0], sizes = [1, 256], strides = [1, 1]} : vector<8x256xf32> to vector<1x256xf32>
    %c19 = arith.constant 19 : index
    %c0_194 = arith.constant 0 : index
    %270 = vector.load %arg8[%c19, %c0_194] : memref<28x256xf32, #tpu.memory_space<vmem>>, vector<1x256xf32>
    tpu.vector_store %arg8[%c19, %c0_194], %269 {strides = array<i32>} : memref<28x256xf32, #tpu.memory_space<vmem>>, vector<1x256xf32>,
    %271 = vector.extract_strided_slice %263 {offsets = [32, 0], sizes = [1, 256], strides = [1, 1]} : vector<40x256xf32> to vector<1x256xf32>
    %c19_195 = arith.constant 19 : index
    %c0_196 = arith.constant 0 : index
    %272 = vector.load %arg9[%c19_195, %c0_196] : memref<28x256xf32, #tpu.memory_space<vmem>>, vector<1x256xf32>
    tpu.vector_store %arg9[%c19_195, %c0_196], %271 {strides = array<i32>} : memref<28x256xf32, #tpu.memory_space<vmem>>, vector<1x256xf32>,
    %c6_197 = arith.constant 6 : index
    %c0_198 = arith.constant 0 : index
    %c0_199 = arith.constant 0 : index
    %273 = vector.load %arg1[%c6_197, %c0_198, %c0_199] : memref<8x32x256xf32, #tpu.memory_space<vmem>>, vector<1x32x256xf32>
    %274 = vector.shape_cast %273 : vector<1x32x256xf32> to vector<32x256xf32>
    %275 = arith.mulf %246, %274 : vector<32x256xf32>
    %cst_200 = arith.constant dense<0.000000e+00> : vector<40x256xf32>
    %276 = tpu.matmul %0, %275, %cst_200 {dimension_numbers = #tpu.dot_dimension_numbers<[1], [0], [0], [1], [0, 0, 1, 1], [], []>} : vector<40x32xf32>, vector<32x256xf32>, vector<40x256xf32> -> vector<40x256xf32>
    %277 = vector.extract_strided_slice %276 {offsets = [0, 0], sizes = [32, 256], strides = [1, 1]} : vector<40x256xf32> to vector<32x256xf32>
    %278 = arith.addf %277, %4 : vector<32x256xf32>
    %cst_201 = arith.constant 0.000000e+00 : f32
    %279 = vector.broadcast %cst_201 : f32 to vector<32x256xf32>
    %280 = arith.maximumf %278, %279 : vector<32x256xf32>
    %cst_202 = arith.constant dense<0.000000e+00> : vector<8x256xf32>
    %281 = tpu.matmul %1, %280, %cst_202 {dimension_numbers = #tpu.dot_dimension_numbers<[1], [0], [0], [1], [0, 0, 1, 1], [], []>} : vector<8x32xf32>, vector<32x256xf32>, vector<8x256xf32> -> vector<8x256xf32>
    %282 = vector.extract_strided_slice %281 {offsets = [0, 0], sizes = [1, 256], strides = [1, 1]} : vector<8x256xf32> to vector<1x256xf32>
    %c20 = arith.constant 20 : index
    %c0_203 = arith.constant 0 : index
    %283 = vector.load %arg8[%c20, %c0_203] : memref<28x256xf32, #tpu.memory_space<vmem>>, vector<1x256xf32>
    tpu.vector_store %arg8[%c20, %c0_203], %282 {strides = array<i32>} : memref<28x256xf32, #tpu.memory_space<vmem>>, vector<1x256xf32>,
    %284 = vector.extract_strided_slice %276 {offsets = [32, 0], sizes = [1, 256], strides = [1, 1]} : vector<40x256xf32> to vector<1x256xf32>
    %c20_204 = arith.constant 20 : index
    %c0_205 = arith.constant 0 : index
    %285 = vector.load %arg9[%c20_204, %c0_205] : memref<28x256xf32, #tpu.memory_space<vmem>>, vector<1x256xf32>
    tpu.vector_store %arg9[%c20_204, %c0_205], %284 {strides = array<i32>} : memref<28x256xf32, #tpu.memory_space<vmem>>, vector<1x256xf32>,
    %c7_206 = arith.constant 7 : index
    %c0_207 = arith.constant 0 : index
    %c0_208 = arith.constant 0 : index
    %286 = vector.load %arg1[%c7_206, %c0_207, %c0_208] : memref<8x32x256xf32, #tpu.memory_space<vmem>>, vector<1x32x256xf32>
    %287 = vector.shape_cast %286 : vector<1x32x256xf32> to vector<32x256xf32>
    %288 = arith.mulf %246, %287 : vector<32x256xf32>
    %cst_209 = arith.constant dense<0.000000e+00> : vector<40x256xf32>
    %289 = tpu.matmul %0, %288, %cst_209 {dimension_numbers = #tpu.dot_dimension_numbers<[1], [0], [0], [1], [0, 0, 1, 1], [], []>} : vector<40x32xf32>, vector<32x256xf32>, vector<40x256xf32> -> vector<40x256xf32>
    %290 = vector.extract_strided_slice %289 {offsets = [0, 0], sizes = [32, 256], strides = [1, 1]} : vector<40x256xf32> to vector<32x256xf32>
    %291 = arith.addf %290, %4 : vector<32x256xf32>
    %cst_210 = arith.constant 0.000000e+00 : f32
    %292 = vector.broadcast %cst_210 : f32 to vector<32x256xf32>
    %293 = arith.maximumf %291, %292 : vector<32x256xf32>
    %cst_211 = arith.constant dense<0.000000e+00> : vector<8x256xf32>
    %294 = tpu.matmul %1, %293, %cst_211 {dimension_numbers = #tpu.dot_dimension_numbers<[1], [0], [0], [1], [0, 0, 1, 1], [], []>} : vector<8x32xf32>, vector<32x256xf32>, vector<8x256xf32> -> vector<8x256xf32>
    %295 = vector.extract_strided_slice %294 {offsets = [0, 0], sizes = [1, 256], strides = [1, 1]} : vector<8x256xf32> to vector<1x256xf32>
    %c21 = arith.constant 21 : index
    %c0_212 = arith.constant 0 : index
    %296 = vector.load %arg8[%c21, %c0_212] : memref<28x256xf32, #tpu.memory_space<vmem>>, vector<1x256xf32>
    tpu.vector_store %arg8[%c21, %c0_212], %295 {strides = array<i32>} : memref<28x256xf32, #tpu.memory_space<vmem>>, vector<1x256xf32>,
    %297 = vector.extract_strided_slice %289 {offsets = [32, 0], sizes = [1, 256], strides = [1, 1]} : vector<40x256xf32> to vector<1x256xf32>
    %c21_213 = arith.constant 21 : index
    %c0_214 = arith.constant 0 : index
    %298 = vector.load %arg9[%c21_213, %c0_214] : memref<28x256xf32, #tpu.memory_space<vmem>>, vector<1x256xf32>
    tpu.vector_store %arg9[%c21_213, %c0_214], %297 {strides = array<i32>} : memref<28x256xf32, #tpu.memory_space<vmem>>, vector<1x256xf32>,
    %c4_215 = arith.constant 4 : index
    %c0_216 = arith.constant 0 : index
    %c0_217 = arith.constant 0 : index
    %299 = vector.load %arg1[%c4_215, %c0_216, %c0_217] : memref<8x32x256xf32, #tpu.memory_space<vmem>>, vector<1x32x256xf32>
    %300 = vector.shape_cast %299 : vector<1x32x256xf32> to vector<32x256xf32>
    %c5_218 = arith.constant 5 : index
    %c0_219 = arith.constant 0 : index
    %c0_220 = arith.constant 0 : index
    %301 = vector.load %arg1[%c5_218, %c0_219, %c0_220] : memref<8x32x256xf32, #tpu.memory_space<vmem>>, vector<1x32x256xf32>
    %302 = vector.shape_cast %301 : vector<1x32x256xf32> to vector<32x256xf32>
    %303 = arith.mulf %300, %302 : vector<32x256xf32>
    %cst_221 = arith.constant dense<0.000000e+00> : vector<40x256xf32>
    %304 = tpu.matmul %0, %303, %cst_221 {dimension_numbers = #tpu.dot_dimension_numbers<[1], [0], [0], [1], [0, 0, 1, 1], [], []>} : vector<40x32xf32>, vector<32x256xf32>, vector<40x256xf32> -> vector<40x256xf32>
    %305 = vector.extract_strided_slice %304 {offsets = [0, 0], sizes = [32, 256], strides = [1, 1]} : vector<40x256xf32> to vector<32x256xf32>
    %306 = arith.addf %305, %4 : vector<32x256xf32>
    %cst_222 = arith.constant 0.000000e+00 : f32
    %307 = vector.broadcast %cst_222 : f32 to vector<32x256xf32>
    %308 = arith.maximumf %306, %307 : vector<32x256xf32>
    %cst_223 = arith.constant dense<0.000000e+00> : vector<8x256xf32>
    %309 = tpu.matmul %1, %308, %cst_223 {dimension_numbers = #tpu.dot_dimension_numbers<[1], [0], [0], [1], [0, 0, 1, 1], [], []>} : vector<8x32xf32>, vector<32x256xf32>, vector<8x256xf32> -> vector<8x256xf32>
    %310 = vector.extract_strided_slice %309 {offsets = [0, 0], sizes = [1, 256], strides = [1, 1]} : vector<8x256xf32> to vector<1x256xf32>
    %c22 = arith.constant 22 : index
    %c0_224 = arith.constant 0 : index
    %311 = vector.load %arg8[%c22, %c0_224] : memref<28x256xf32, #tpu.memory_space<vmem>>, vector<1x256xf32>
    tpu.vector_store %arg8[%c22, %c0_224], %310 {strides = array<i32>} : memref<28x256xf32, #tpu.memory_space<vmem>>, vector<1x256xf32>,
    %312 = vector.extract_strided_slice %304 {offsets = [32, 0], sizes = [1, 256], strides = [1, 1]} : vector<40x256xf32> to vector<1x256xf32>
    %c22_225 = arith.constant 22 : index
    %c0_226 = arith.constant 0 : index
    %313 = vector.load %arg9[%c22_225, %c0_226] : memref<28x256xf32, #tpu.memory_space<vmem>>, vector<1x256xf32>
    tpu.vector_store %arg9[%c22_225, %c0_226], %312 {strides = array<i32>} : memref<28x256xf32, #tpu.memory_space<vmem>>, vector<1x256xf32>,
    %c6_227 = arith.constant 6 : index
    %c0_228 = arith.constant 0 : index
    %c0_229 = arith.constant 0 : index
    %314 = vector.load %arg1[%c6_227, %c0_228, %c0_229] : memref<8x32x256xf32, #tpu.memory_space<vmem>>, vector<1x32x256xf32>
    %315 = vector.shape_cast %314 : vector<1x32x256xf32> to vector<32x256xf32>
    %316 = arith.mulf %300, %315 : vector<32x256xf32>
    %cst_230 = arith.constant dense<0.000000e+00> : vector<40x256xf32>
    %317 = tpu.matmul %0, %316, %cst_230 {dimension_numbers = #tpu.dot_dimension_numbers<[1], [0], [0], [1], [0, 0, 1, 1], [], []>} : vector<40x32xf32>, vector<32x256xf32>, vector<40x256xf32> -> vector<40x256xf32>
    %318 = vector.extract_strided_slice %317 {offsets = [0, 0], sizes = [32, 256], strides = [1, 1]} : vector<40x256xf32> to vector<32x256xf32>
    %319 = arith.addf %318, %4 : vector<32x256xf32>
    %cst_231 = arith.constant 0.000000e+00 : f32
    %320 = vector.broadcast %cst_231 : f32 to vector<32x256xf32>
    %321 = arith.maximumf %319, %320 : vector<32x256xf32>
    %cst_232 = arith.constant dense<0.000000e+00> : vector<8x256xf32>
    %322 = tpu.matmul %1, %321, %cst_232 {dimension_numbers = #tpu.dot_dimension_numbers<[1], [0], [0], [1], [0, 0, 1, 1], [], []>} : vector<8x32xf32>, vector<32x256xf32>, vector<8x256xf32> -> vector<8x256xf32>
    %323 = vector.extract_strided_slice %322 {offsets = [0, 0], sizes = [1, 256], strides = [1, 1]} : vector<8x256xf32> to vector<1x256xf32>
    %c23 = arith.constant 23 : index
    %c0_233 = arith.constant 0 : index
    %324 = vector.load %arg8[%c23, %c0_233] : memref<28x256xf32, #tpu.memory_space<vmem>>, vector<1x256xf32>
    tpu.vector_store %arg8[%c23, %c0_233], %323 {strides = array<i32>} : memref<28x256xf32, #tpu.memory_space<vmem>>, vector<1x256xf32>,
    %325 = vector.extract_strided_slice %317 {offsets = [32, 0], sizes = [1, 256], strides = [1, 1]} : vector<40x256xf32> to vector<1x256xf32>
    %c23_234 = arith.constant 23 : index
    %c0_235 = arith.constant 0 : index
    %326 = vector.load %arg9[%c23_234, %c0_235] : memref<28x256xf32, #tpu.memory_space<vmem>>, vector<1x256xf32>
    tpu.vector_store %arg9[%c23_234, %c0_235], %325 {strides = array<i32>} : memref<28x256xf32, #tpu.memory_space<vmem>>, vector<1x256xf32>,
    %c7_236 = arith.constant 7 : index
    %c0_237 = arith.constant 0 : index
    %c0_238 = arith.constant 0 : index
    %327 = vector.load %arg1[%c7_236, %c0_237, %c0_238] : memref<8x32x256xf32, #tpu.memory_space<vmem>>, vector<1x32x256xf32>
    %328 = vector.shape_cast %327 : vector<1x32x256xf32> to vector<32x256xf32>
    %329 = arith.mulf %300, %328 : vector<32x256xf32>
    %cst_239 = arith.constant dense<0.000000e+00> : vector<40x256xf32>
    %330 = tpu.matmul %0, %329, %cst_239 {dimension_numbers = #tpu.dot_dimension_numbers<[1], [0], [0], [1], [0, 0, 1, 1], [], []>} : vector<40x32xf32>, vector<32x256xf32>, vector<40x256xf32> -> vector<40x256xf32>
    %331 = vector.extract_strided_slice %330 {offsets = [0, 0], sizes = [32, 256], strides = [1, 1]} : vector<40x256xf32> to vector<32x256xf32>
    %332 = arith.addf %331, %4 : vector<32x256xf32>
    %cst_240 = arith.constant 0.000000e+00 : f32
    %333 = vector.broadcast %cst_240 : f32 to vector<32x256xf32>
    %334 = arith.maximumf %332, %333 : vector<32x256xf32>
    %cst_241 = arith.constant dense<0.000000e+00> : vector<8x256xf32>
    %335 = tpu.matmul %1, %334, %cst_241 {dimension_numbers = #tpu.dot_dimension_numbers<[1], [0], [0], [1], [0, 0, 1, 1], [], []>} : vector<8x32xf32>, vector<32x256xf32>, vector<8x256xf32> -> vector<8x256xf32>
    %336 = vector.extract_strided_slice %335 {offsets = [0, 0], sizes = [1, 256], strides = [1, 1]} : vector<8x256xf32> to vector<1x256xf32>
    %c24 = arith.constant 24 : index
    %c0_242 = arith.constant 0 : index
    %337 = vector.load %arg8[%c24, %c0_242] : memref<28x256xf32, #tpu.memory_space<vmem>>, vector<1x256xf32>
    tpu.vector_store %arg8[%c24, %c0_242], %336 {strides = array<i32>} : memref<28x256xf32, #tpu.memory_space<vmem>>, vector<1x256xf32>,
    %338 = vector.extract_strided_slice %330 {offsets = [32, 0], sizes = [1, 256], strides = [1, 1]} : vector<40x256xf32> to vector<1x256xf32>
    %c24_243 = arith.constant 24 : index
    %c0_244 = arith.constant 0 : index
    %339 = vector.load %arg9[%c24_243, %c0_244] : memref<28x256xf32, #tpu.memory_space<vmem>>, vector<1x256xf32>
    tpu.vector_store %arg9[%c24_243, %c0_244], %338 {strides = array<i32>} : memref<28x256xf32, #tpu.memory_space<vmem>>, vector<1x256xf32>,
    %c5_245 = arith.constant 5 : index
    %c0_246 = arith.constant 0 : index
    %c0_247 = arith.constant 0 : index
    %340 = vector.load %arg1[%c5_245, %c0_246, %c0_247] : memref<8x32x256xf32, #tpu.memory_space<vmem>>, vector<1x32x256xf32>
    %341 = vector.shape_cast %340 : vector<1x32x256xf32> to vector<32x256xf32>
    %c6_248 = arith.constant 6 : index
    %c0_249 = arith.constant 0 : index
    %c0_250 = arith.constant 0 : index
    %342 = vector.load %arg1[%c6_248, %c0_249, %c0_250] : memref<8x32x256xf32, #tpu.memory_space<vmem>>, vector<1x32x256xf32>
    %343 = vector.shape_cast %342 : vector<1x32x256xf32> to vector<32x256xf32>
    %344 = arith.mulf %341, %343 : vector<32x256xf32>
    %cst_251 = arith.constant dense<0.000000e+00> : vector<40x256xf32>
    %345 = tpu.matmul %0, %344, %cst_251 {dimension_numbers = #tpu.dot_dimension_numbers<[1], [0], [0], [1], [0, 0, 1, 1], [], []>} : vector<40x32xf32>, vector<32x256xf32>, vector<40x256xf32> -> vector<40x256xf32>
    %346 = vector.extract_strided_slice %345 {offsets = [0, 0], sizes = [32, 256], strides = [1, 1]} : vector<40x256xf32> to vector<32x256xf32>
    %347 = arith.addf %346, %4 : vector<32x256xf32>
    %cst_252 = arith.constant 0.000000e+00 : f32
    %348 = vector.broadcast %cst_252 : f32 to vector<32x256xf32>
    %349 = arith.maximumf %347, %348 : vector<32x256xf32>
    %cst_253 = arith.constant dense<0.000000e+00> : vector<8x256xf32>
    %350 = tpu.matmul %1, %349, %cst_253 {dimension_numbers = #tpu.dot_dimension_numbers<[1], [0], [0], [1], [0, 0, 1, 1], [], []>} : vector<8x32xf32>, vector<32x256xf32>, vector<8x256xf32> -> vector<8x256xf32>
    %351 = vector.extract_strided_slice %350 {offsets = [0, 0], sizes = [1, 256], strides = [1, 1]} : vector<8x256xf32> to vector<1x256xf32>
    %c25 = arith.constant 25 : index
    %c0_254 = arith.constant 0 : index
    %352 = vector.load %arg8[%c25, %c0_254] : memref<28x256xf32, #tpu.memory_space<vmem>>, vector<1x256xf32>
    tpu.vector_store %arg8[%c25, %c0_254], %351 {strides = array<i32>} : memref<28x256xf32, #tpu.memory_space<vmem>>, vector<1x256xf32>,
    %353 = vector.extract_strided_slice %345 {offsets = [32, 0], sizes = [1, 256], strides = [1, 1]} : vector<40x256xf32> to vector<1x256xf32>
    %c25_255 = arith.constant 25 : index
    %c0_256 = arith.constant 0 : index
    %354 = vector.load %arg9[%c25_255, %c0_256] : memref<28x256xf32, #tpu.memory_space<vmem>>, vector<1x256xf32>
    tpu.vector_store %arg9[%c25_255, %c0_256], %353 {strides = array<i32>} : memref<28x256xf32, #tpu.memory_space<vmem>>, vector<1x256xf32>,
    %c7_257 = arith.constant 7 : index
    %c0_258 = arith.constant 0 : index
    %c0_259 = arith.constant 0 : index
    %355 = vector.load %arg1[%c7_257, %c0_258, %c0_259] : memref<8x32x256xf32, #tpu.memory_space<vmem>>, vector<1x32x256xf32>
    %356 = vector.shape_cast %355 : vector<1x32x256xf32> to vector<32x256xf32>
    %357 = arith.mulf %341, %356 : vector<32x256xf32>
    %cst_260 = arith.constant dense<0.000000e+00> : vector<40x256xf32>
    %358 = tpu.matmul %0, %357, %cst_260 {dimension_numbers = #tpu.dot_dimension_numbers<[1], [0], [0], [1], [0, 0, 1, 1], [], []>} : vector<40x32xf32>, vector<32x256xf32>, vector<40x256xf32> -> vector<40x256xf32>
    %359 = vector.extract_strided_slice %358 {offsets = [0, 0], sizes = [32, 256], strides = [1, 1]} : vector<40x256xf32> to vector<32x256xf32>
    %360 = arith.addf %359, %4 : vector<32x256xf32>
    %cst_261 = arith.constant 0.000000e+00 : f32
    %361 = vector.broadcast %cst_261 : f32 to vector<32x256xf32>
    %362 = arith.maximumf %360, %361 : vector<32x256xf32>
    %cst_262 = arith.constant dense<0.000000e+00> : vector<8x256xf32>
    %363 = tpu.matmul %1, %362, %cst_262 {dimension_numbers = #tpu.dot_dimension_numbers<[1], [0], [0], [1], [0, 0, 1, 1], [], []>} : vector<8x32xf32>, vector<32x256xf32>, vector<8x256xf32> -> vector<8x256xf32>
    %364 = vector.extract_strided_slice %363 {offsets = [0, 0], sizes = [1, 256], strides = [1, 1]} : vector<8x256xf32> to vector<1x256xf32>
    %c26 = arith.constant 26 : index
    %c0_263 = arith.constant 0 : index
    %365 = vector.load %arg8[%c26, %c0_263] : memref<28x256xf32, #tpu.memory_space<vmem>>, vector<1x256xf32>
    tpu.vector_store %arg8[%c26, %c0_263], %364 {strides = array<i32>} : memref<28x256xf32, #tpu.memory_space<vmem>>, vector<1x256xf32>,
    %366 = vector.extract_strided_slice %358 {offsets = [32, 0], sizes = [1, 256], strides = [1, 1]} : vector<40x256xf32> to vector<1x256xf32>
    %c26_264 = arith.constant 26 : index
    %c0_265 = arith.constant 0 : index
    %367 = vector.load %arg9[%c26_264, %c0_265] : memref<28x256xf32, #tpu.memory_space<vmem>>, vector<1x256xf32>
    tpu.vector_store %arg9[%c26_264, %c0_265], %366 {strides = array<i32>} : memref<28x256xf32, #tpu.memory_space<vmem>>, vector<1x256xf32>,
    %c6_266 = arith.constant 6 : index
    %c0_267 = arith.constant 0 : index
    %c0_268 = arith.constant 0 : index
    %368 = vector.load %arg1[%c6_266, %c0_267, %c0_268] : memref<8x32x256xf32, #tpu.memory_space<vmem>>, vector<1x32x256xf32>
    %369 = vector.shape_cast %368 : vector<1x32x256xf32> to vector<32x256xf32>
    %c7_269 = arith.constant 7 : index
    %c0_270 = arith.constant 0 : index
    %c0_271 = arith.constant 0 : index
    %370 = vector.load %arg1[%c7_269, %c0_270, %c0_271] : memref<8x32x256xf32, #tpu.memory_space<vmem>>, vector<1x32x256xf32>
    %371 = vector.shape_cast %370 : vector<1x32x256xf32> to vector<32x256xf32>
    %372 = arith.mulf %369, %371 : vector<32x256xf32>
    %cst_272 = arith.constant dense<0.000000e+00> : vector<40x256xf32>
    %373 = tpu.matmul %0, %372, %cst_272 {dimension_numbers = #tpu.dot_dimension_numbers<[1], [0], [0], [1], [0, 0, 1, 1], [], []>} : vector<40x32xf32>, vector<32x256xf32>, vector<40x256xf32> -> vector<40x256xf32>
    %374 = vector.extract_strided_slice %373 {offsets = [0, 0], sizes = [32, 256], strides = [1, 1]} : vector<40x256xf32> to vector<32x256xf32>
    %375 = arith.addf %374, %4 : vector<32x256xf32>
    %cst_273 = arith.constant 0.000000e+00 : f32
    %376 = vector.broadcast %cst_273 : f32 to vector<32x256xf32>
    %377 = arith.maximumf %375, %376 : vector<32x256xf32>
    %cst_274 = arith.constant dense<0.000000e+00> : vector<8x256xf32>
    %378 = tpu.matmul %1, %377, %cst_274 {dimension_numbers = #tpu.dot_dimension_numbers<[1], [0], [0], [1], [0, 0, 1, 1], [], []>} : vector<8x32xf32>, vector<32x256xf32>, vector<8x256xf32> -> vector<8x256xf32>
    %379 = vector.extract_strided_slice %378 {offsets = [0, 0], sizes = [1, 256], strides = [1, 1]} : vector<8x256xf32> to vector<1x256xf32>
    %c27 = arith.constant 27 : index
    %c0_275 = arith.constant 0 : index
    %380 = vector.load %arg8[%c27, %c0_275] : memref<28x256xf32, #tpu.memory_space<vmem>>, vector<1x256xf32>
    tpu.vector_store %arg8[%c27, %c0_275], %379 {strides = array<i32>} : memref<28x256xf32, #tpu.memory_space<vmem>>, vector<1x256xf32>,
    %381 = vector.extract_strided_slice %373 {offsets = [32, 0], sizes = [1, 256], strides = [1, 1]} : vector<40x256xf32> to vector<1x256xf32>
    %c27_276 = arith.constant 27 : index
    %c0_277 = arith.constant 0 : index
    %382 = vector.load %arg9[%c27_276, %c0_277] : memref<28x256xf32, #tpu.memory_space<vmem>>, vector<1x256xf32>
    tpu.vector_store %arg9[%c27_276, %c0_277], %381 {strides = array<i32>} : memref<28x256xf32, #tpu.memory_space<vmem>>, vector<1x256xf32>,
    %c0_278 = arith.constant 0 : index
    %c0_279 = arith.constant 0 : index
    %383 = vector.load %arg8[%c0_278, %c0_279] : memref<28x256xf32, #tpu.memory_space<vmem>>, vector<28x256xf32>
    %c0_280 = arith.constant 0 : index
    %c0_281 = arith.constant 0 : index
    %384 = vector.load %arg9[%c0_280, %c0_281] : memref<28x256xf32, #tpu.memory_space<vmem>>, vector<28x256xf32>
    %cst_282 = arith.constant dense<0xFF800000> : vector<256xf32>
    %385 = vector.multi_reduction <maximumf>, %383, %cst_282 [0] : vector<28x256xf32> to vector<256xf32>
    %386 = vector.shape_cast %385 : vector<256xf32> to vector<1x256xf32>
    %387 = vector.broadcast %386 : vector<1x256xf32> to vector<28x256xf32>
    %388 = arith.subf %383, %387 : vector<28x256xf32>
    %389 = math.exp %388 : vector<28x256xf32>
    %cst_283 = arith.constant dense<0.000000e+00> : vector<256xf32>
    %390 = vector.multi_reduction <add>, %389, %cst_283 [0] : vector<28x256xf32> to vector<256xf32>
    %391 = vector.shape_cast %390 : vector<256xf32> to vector<1x256xf32>
    %392 = arith.mulf %389, %384 : vector<28x256xf32>
    %cst_284 = arith.constant dense<0.000000e+00> : vector<256xf32>
    %393 = vector.multi_reduction <add>, %392, %cst_284 [0] : vector<28x256xf32> to vector<256xf32>
    %394 = vector.shape_cast %393 : vector<256xf32> to vector<1x256xf32>
    %395 = arith.divf %394, %391 : vector<1x256xf32>
    %c0_285 = arith.constant 0 : index
    %c0_286 = arith.constant 0 : index
    %396 = vector.load %arg2[%c0_285, %c0_286] : memref<8x256xf32, #tpu.memory_space<vmem>>, vector<8x256xf32>
    %cst_287 = arith.constant dense<0.000000e+00> : vector<256xf32>
    %397 = vector.multi_reduction <add>, %396, %cst_287 [0] : vector<8x256xf32> to vector<256xf32>
    %398 = vector.shape_cast %397 : vector<256xf32> to vector<1x256xf32>
    %c0_288 = arith.constant 0 : index
    %399 = memref.load %arg6[%c0_288] : memref<1xf32, #tpu.memory_space<smem>>
    %400 = vector.broadcast %399 : f32 to vector<1x256xf32>
    %401 = arith.addf %398, %400 : vector<1x256xf32>
    %402 = arith.addf %401, %395 : vector<1x256xf32>
    %403 = arith.negf %402 : vector<1x256xf32>
    %404 = math.exp %403 : vector<1x256xf32>
    %cst_289 = arith.constant 1.000000e+00 : f32
    %405 = vector.broadcast %cst_289 : f32 to vector<1x256xf32>
    %406 = arith.addf %405, %404 : vector<1x256xf32>
    %407 = arith.divf %405, %406 : vector<1x256xf32>
    %408 = vector.shape_cast %407 : vector<1x256xf32> to vector<1x256xf32>
    %409 = vector.broadcast %408 : vector<1x256xf32> to vector<8x256xf32>
    %c0_290 = arith.constant 0 : index
    %c0_291 = arith.constant 0 : index
    %410 = vector.load %arg7[%c0_290, %c0_291] : memref<8x256xf32, #tpu.memory_space<vmem>>, vector<8x256xf32>
    tpu.vector_store %arg7[%c0_290, %c0_291], %409 {strides = array<i32>} : memref<8x256xf32, #tpu.memory_space<vmem>>, vector<8x256xf32>,
    return
  }
  func.func @transform_0(%arg0: i32) -> (i32, i32, i32) {
    %c0_i32 = arith.constant 0 : i32
    %c0_i32_0 = arith.constant 0 : i32
    %c0_i32_1 = arith.constant 0 : i32
    return %c0_i32, %c0_i32_0, %arg0 : i32, i32, i32
  }
  func.func @transform_1(%arg0: i32) -> (i32, i32) {
    %c0_i32 = arith.constant 0 : i32
    %c0_i32_0 = arith.constant 0 : i32
    return %c0_i32, %arg0 : i32, i32
  }
  func.func @transform_2(%arg0: i32) -> (i32, i32) {
    %c0_i32 = arith.constant 0 : i32
    %c0_i32_0 = arith.constant 0 : i32
    %c0_i32_1 = arith.constant 0 : i32
    return %c0_i32, %c0_i32_0 : i32, i32
  }
  func.func @transform_3(%arg0: i32) -> (i32, i32) {
    %c0_i32 = arith.constant 0 : i32
    %c0_i32_0 = arith.constant 0 : i32
    %c0_i32_1 = arith.constant 0 : i32
    return %c0_i32, %c0_i32_0 : i32, i32
  }
  func.func @transform_4(%arg0: i32) -> (i32, i32) {
    %c0_i32 = arith.constant 0 : i32
    %c0_i32_0 = arith.constant 0 : i32
    %c0_i32_1 = arith.constant 0 : i32
    return %c0_i32, %c0_i32_0 : i32, i32
  }
  func.func @transform_5(%arg0: i32) -> i32 {
    %c0_i32 = arith.constant 0 : i32
    %c0_i32_0 = arith.constant 0 : i32
    return %c0_i32 : i32
  }
  func.func @transform_6(%arg0: i32) -> (i32, i32) {
    %c0_i32 = arith.constant 0 : i32
    %c0_i32_0 = arith.constant 0 : i32
    return %c0_i32, %arg0 : i32, i32
  }
}

</mosaic_0001>

<bundles_post_ra>
// kernel: tpu_custom_call.1
= control target key start
LH: loop header
LB: loop body
LE: loop exit
PB: predicated region body
PF: predicated region fallthrough
CT: control target
= control target key end

     0   :  { %s8093_s0 = inlined_call_operand.hbm [shape: f32[8,32,512], index: 0, kind: input, shape index: {}]   ;;  %s8094_s1 = inlined_call_operand.vmem [shape: f32[8,512], index: 1, kind: input, shape index: {}]   ;;  %s8095_s2 = inlined_call_operand.vmem [shape: f32[40,32], index: 2, kind: input, shape index: {}]   ;;  %s8096_s3 = inlined_call_operand.vmem [shape: f32[32,1], index: 3, kind: input, shape index: {}]   ;;  %s8097_s4 = inlined_call_operand.vmem [shape: f32[8,32], index: 4, kind: input, shape index: {}]   ;;  %s8098_s5 = inlined_call_operand.<no memory space> [shape: f32[1], index: 5, kind: input, shape index: {}]   ;;  %s8099_s6 = inlined_call_operand.hbm [shape: f32[8,512], index: 6, kind: output, shape index: {}]  }
   0x1   :  { %11 = sst [smem:[#allocation4]] %s8098_s5 }
   0x2   :  { %12 = vsyncpa [#allocation6], 0 }
   0x3   :  { %14 = vsyncpa [#allocation6 + $0x1], 0 }
   0x4   :  { %15 = vsyncpa [#allocation7], 0 }
   0x5   :  { %17 = vsyncpa [#allocation7 + $0x1], 0  ;;  %s5840_s23 = smov 0   ;;  %s5842_s24 = smov 0  }
   0x6   :  { %s5844_s25 = smov 0   ;;  %s5846_s26 = smov 0  }
   0x7 LB: > { %s5861_s5 = sadd.s32 4294967295, %s5796_s26   ;;  %s4966_s27 = sadd.s32 4294967294, %s5796_s26   ;;  %s5796_s26 = sphi %s5846_s26, %s8170_s26   ;;  %s5792_s25 = sphi %s5844_s25, %s8169_s25   ;;  %s5788_s24 = sphi %s5842_s24, %s8168_s24   ;;  %s5784_s23 = sphi %s5840_s23, %s8167_s23  }
   0x8   : > { %s5865_s28 = sadd.s32 1, %s5796_s26   ;;  %s30_s29 = sadd.s32 1, %s5792_s25 }
   0x9   : > { %s27_s30 = ssub.s32 %s5796_s26, %s5865_s28  ;;  %p37_p0 = scmp.ne.s32.totalorder %s5792_s25, %s5788_s24 }
   0xa   : > { %p28_p1 = scmp.eq.s32.totalorder %s27_s30, 0  ;;  %p38_p2 = scmp.eq.s32.totalorder %s5796_s26, 0 }
   0xb   : > { %p43_p3 = scmp.ne.s32.totalorder %s5788_s24, %s5784_s23  ;;  %p44_p4 = scmp.eq.s32.totalorder %s5861_s5, 0 }
   0xc   : > { %s5877_s7 = scalar_select %p28_p1, %s5792_s25, %s30_s29  }
   0xd   : > { %p5879_p5 = por %p38_p2, %p37_p0  ;;  %p5883_p6 = por %p44_p4, %p43_p3 }
   0xe   : > { %p177_p7 = scmp.eq.s32.totalorder %s5861_s5, 1  ;;  %p183_p8 = scmp.eq.s32.totalorder %s4966_s27, 1 }
   0xf   : > { %p4968_p9 = scmp.ge.s32.totalorder %s5796_s26, 2  ;;  %p5606_p10 = scmp.lt.s32.totalorder %s5796_s26, 2 }
  0x10   : > { %p5890_p11 = por %p177_p7, %p37_p0  ;;  %p5894_p12 = por %p183_p8, %p43_p3 }
  0x11   : > { %s215_s12 = sand.u32 1, %s5792_s25   ;;  %s5592_s13 = sshll.u32 %s5796_s26, 4 }
  0x12   : > { %s4969_s14 = sshll.u32 %s215_s12, 9  ;;  %s224_s17 = scalar_lea.hbm %s8093_s0, %s5592_s13 }
  0x13   : > { %s225_s18 = sshll.u32 %s224_s17, 4  ;;  %s219_s19 = scalar_lea.vmem [#allocation5], %s4969_s14  ;;  %s226_s18 = int_to_ptr.hbm [resolvable:$true] %s225_s18 }
  0x14   : > { %s227_s20 = sshll.u32 %s219_s19, 4  ;;  %p5905_p13 = pnand %p5606_p10, %p5879_p5  ;;  %s228_s20 = int_to_ptr.vmem [resolvable:$true] %s227_s20 }
  0x15   : > { %p4972_p0 = scmp.ge.s32.totalorder %s5796_s26, 1  ;;  %s216_s22 = scalar_lea.sflag [#allocation6], %s215_s12 }
  0x16   : > { %s5700_s27 = sshra.s32 %s226_s18, 4  ;;  %p5704_p2 = pneg %p5905_p13  ;;  %s5701_s27 = int_to_ptr.hbm [resolvable:$true] %s5700_s27 }
  0x17   : > { %s5702_s29 = scalar_lea.hbm %s5701_s27, 512  ;;  %s5707_s14 = scalar_lea.hbm %s8093_s0, 1024 }
  0x18   : > { %p5703_p1 = scmp.ne.s32.totalorder %s5701_s27, %s5702_s29  ;;  %p5708_p5 = scmp.lt.s32.totalorder %s5701_s27, %s8093_s0 }
  0x19   : > { %p5709_p7 = scmp.lt.s32.totalorder %s5707_s14, %s5702_s29 }
  0x1a   : > { %p5705_p3 = pnand %p5704_p2, %p5703_p1 }
  0x1b   : > { %p5710_p8 = por %p5709_p7, %p5708_p5 }
  0x1c   : > { %p5706_p4 = pneg %p5705_p3 }
  0x1e   : > { %p5711_p10 = pnand %p5710_p8, %p5706_p4 }
  0x20   : > { %5714 = shalt.err (!%p5711_p10)
}
  0x21   : > { %s5798_s12 = smov 512   ;;  %s5799_s16 = smov 256  }
  0x22   : > { %s5800_s17 = smov 16   ;;  %p244_p1 = scmp.lt.s32.totalorder %s5796_s26, 3 }
  0x23   : > { %5601 = dma.hbm_to_vmem [thread:$0]  (!%p5905_p13), %s226_s18, 8192, %s228_s20, %s216_s22, %s5798_s12, %s5799_s16, %s5800_s17  }
  0x24   : > { %p245_p2 = pnand %p4972_p0, %p244_p1 }
  0x26   : > { %248 = sbr.rel (%p245_p2) target bundleno = 5105 (0x13f1), region = 44 }
  0x2b   : > { %s5924_s19 = sand.u32 1, %s5788_s24  }
  0x2c   : > { %s4973_s27 = sshll.u32 %s5924_s19, 9  ;;  %s251_s29 = scalar_lea.sflag [#allocation6], %s5924_s19 }
  0x2d   : > { %s5928_s30 = scalar_lea.vmem [#allocation5], %s4973_s27 }
  0x2e   : > { %5775 = dma.done.wait (%p5883_p6), %s251_s29, 8192  }
  0x2f   : > { %5777 = vsyncadd (%p5883_p6), %s251_s29, 4294959104  ;;  %v5801_v0 = vmov 0   ;;  %v5935_v1 = vld [vmem:[%s5928_s30 + $0x30] sm:$0xff]  ;;  %v5939_v3 = vld [vmem:[%s5928_s30 + $0x38] sm:$0xff]  ;;  %vm352_vm0 = vcmask 261120   ;;  %vm494_vm1 = vcmask 1040384  }
  0x30   : > { %5645 = vset.pattern.permute.xlu1 %v5801_v0  ;;  %5644 = vset.pattern.permute.xlu0 %v5801_v0  ;;  %v4983_v2 = vld [vmem:[%s5928_s30 + $0x70] sm:$0xff]  ;;  %v4984_v5 = vld [vmem:[%s5928_s30 + $0x78] sm:$0xff]  ;;  %v5944_v6 = vld [vmem:[%s5928_s30 + $0x20] sm:$0xff]  ;;  %vm4685_vm3 = vcmask 1043456   ;;  %s8056_s22 = sld [smem:[#allocation4]]  ;;  %s4974_s13 = sshll.u32 %s5924_s19, 4 }
  0x31   : > { %v350_v4 = vmul.f32 %v4983_v2, %v5935_v1  ;;  %v4981_v7 = vld [vmem:[%s5928_s30 + $0x60] sm:$0xff]  ;;  %v351_v8 = vmul.f32 %v4984_v5, %v5939_v3  ;;  %v5950_v10 = vld [vmem:[%s5928_s30 + $0x28] sm:$0xff]  ;;  %v5954_v12 = vld [vmem:[%s5928_s30 + $0x10] sm:$0xff]  ;;  %s5593_s14 = sshll.u32 %s5861_s5, 4  ;;  %s288_s16 = scalar_lea.vmem [#allocation8], %s4974_s13 }
  0x32   : > { %v348_v9 = vmul.f32 %v4981_v7, %v5944_v6  ;;  %v4982_v11 = vld [vmem:[%s5928_s30 + $0x68] sm:$0xff]  ;;  %v4979_v14 = vld [vmem:[%s5928_s30 + $0x50] sm:$0xff]  ;;  %v5959_v15 = vld [vmem:[%s5928_s30 + $0x18] sm:$0xff]  ;;  %s4879_s12 = scalar_lea.hbm %s8099_s6, %s5593_s14  ;;  %s4881_s17 = sshll.u32 %s288_s16, 4  ;;  %s4882_s17 = int_to_ptr.vmem [resolvable:$true] %s4881_s17 }
  0x33   : > { %380 = vmatpush.msra.mxu0 %v350_v4  ;;  %v349_v13 = vmul.f32 %v4982_v11, %v5950_v10  ;;  %v4980_v16 = vld [vmem:[%s5928_s30 + $0x58] sm:$0xff]  ;;  %412 = vmatpush.msra.mxu1 %v351_v8  ;;  %v346_v17 = vmul.f32 %v4979_v14, %v5954_v12  ;;  %v5965_v19 = vld [vmem:[%s5928_s30] sm:$0xff]  ;;  %v5969_v21 = vld [vmem:[%s5928_s30 + $0x8] sm:$0xff]  ;;  %s4868_s27 = scalar_lea.sflag [#allocation7], %s5924_s19  ;;  %s5750_s20 = scalar_lea.hbm %s8099_s6, 32 }
  0x34   : > { %v347_v18 = vmul.f32 %v4980_v16, %v5959_v15  ;;  %v4977_v20 = vld [vmem:[%s5928_s30 + $0x40] sm:$0xff]  ;;  %v4978_v23 = vld [vmem:[%s5928_s30 + $0x48] sm:$0xff]  ;;  %v306_v27 = vld [vmem:[%s8096_s3 + $0x18] sm:$0xff] }
  0x35   : > { %381 = vmatpush.msra.mxu0 %v348_v9  ;;  %v344_v22 = vmul.f32 %v4977_v20, %v5965_v19  ;;  %v304_v24 = vld [vmem:[%s8096_s3 + $0x8] sm:$0xff]  ;;  %413 = vmatpush.msra.mxu1 %v349_v13  ;;  %v345_v25 = vmul.f32 %v4978_v23, %v5969_v21  ;;  %v5980_v26 = vld [vmem:[%s8095_s2] sm:$0xff]  ;;  %v305_v29 = vld [vmem:[%s8096_s3 + $0x10] sm:$0xff] }
  0x36   : > { %314 = vperm.xlu1 %5645, %v304_v24   ;;  %324 = vperm.xlu0 %5644, %v306_v27   ;;  %v303_v28 = vld [vmem:[%s8096_s3] sm:$0xff]  ;;  %v5998_v30 = vld [vmem:[%s8095_s2 + $0x8] sm:$0xff]  ;;  %v6007_v31 = vld [vmem:[%s8095_s2 + $0x10] sm:$0xff] }
  0x37   : > { %382 = vmatpush.msra.mxu0 %v346_v17  ;;  %414 = vmatpush.msra.mxu1 %v347_v18  ;;  %v6016_v32 = vld [vmem:[%s8095_s2 + $0x18] sm:$0xff]  ;;  %v6039_v57 = vld [vmem:[%s5928_s30 + $0xb0] sm:$0xff]  ;;  %v6045_v61 = vld [vmem:[%s5928_s30 + $0xa0] sm:$0xff] }
  0x38   : > { %v6042_v59 = vld [vmem:[%s5928_s30 + $0xb8] sm:$0xff]  ;;  %v6050_v63 = vld [vmem:[%s8097_s4] sm:$0xff]  ;;  %v525_v0 = vmul.f32 %v6039_v57, %v5935_v1  ;;  %v6055_v2 = vld [vmem:[%s5928_s30 + $0xa8] sm:$0xff]  ;;  %v523_v8 = vmul.f32 %v6045_v61, %v5944_v6 }
  0x39   : > { %383 = vmatpush.msra.mxu0 %v344_v22  ;;  %415 = vmatpush.msra.mxu1 %v345_v25  ;;  %v526_v5 = vmul.f32 %v6042_v59, %v5939_v3  ;;  %v6060_v7 = vld [vmem:[%s5928_s30 + $0x90] sm:$0xff]  ;;  %v6065_v9 = vld [vmem:[%s5928_s30 + $0x98] sm:$0xff]  ;;  %v524_v11 = vmul.f32 %v6055_v2, %v5950_v10  ;;  %v6072_v13 = vld [vmem:[%s5928_s30 + $0x80] sm:$0xff]  ;;  %v497_v22 = vlaneseq }
  0x3a   : > { %4985 = vmatmul.msk.f32.vlgmr.msra.gmra.mxu0 %vm352_vm0, %v5980_v26  ;;  %4990 = vmatmul.msk.f32.vlgmr.msra.gmra.mxu1 %vm352_vm0, %v5980_v26  ;;  %v521_v14 = vmul.f32 %v6060_v7, %v5954_v12  ;;  %v6079_v16 = vld [vmem:[%s5928_s30 + $0x88] sm:$0xff]  ;;  %v522_v17 = vmul.f32 %v6065_v9, %v5959_v15  ;;  %v519_v18 = vmul.f32 %v6072_v13, %v5965_v19 }
  0x3b   : > { %v520_v20 = vmul.f32 %v6079_v16, %v5969_v21  ;;  %vm6103_vm2 = vcmp.lt.s32.totalorder %v497_v22, 256  ;;  %v6153_v22 = vld [vmem:[%s5928_s30 + $0xd8] sm:$0xff] }
  0x3e   : > { %309 = vperm.xlu1 %5645, %v303_v28   ;;  %319 = vperm.xlu0 %5644, %v305_v29   ;;  %v6110_v28 = vld [vmem:[%s8095_s2 + $0x20] sm:$0xff] }
  0x42   : > { %4986 = vmatmul.msk.f32.gmra.mxu0 %vm352_vm0, %v5998_v30  ;;  %4991 = vmatmul.msk.f32.gmra.mxu1 %vm352_vm0, %v5998_v30 }
  0x4a   : > { %4987 = vmatmul.msk.f32.gmra.mxu0 %vm352_vm0, %v6007_v31  ;;  %4992 = vmatmul.msk.f32.gmra.mxu1 %vm352_vm0, %v6007_v31 }
  0x52   : > { %4988 = vmatmul.msk.f32.gmra.mxu0 %vm352_vm0, %v6016_v32  ;;  %4993 = vmatmul.msk.f32.gmra.mxu1 %vm352_vm0, %v6016_v32 }
  0x5a   : > { %4989 = vmatmul.msk.f32.gmra.mxu0 %vm352_vm0, %v6110_v28  ;;  %4994 = vmatmul.msk.f32.gmra.mxu1 %vm352_vm0, %v6110_v28 }
  0xa8   : > { %v6022_v37 = vpop.permute.xlu0 %324  ;;  %v6024_v39 = vpop.permute.xlu1 %314 }
  0xb0   : > { %v6026_v41 = vpop.permute.xlu0 %319  ;;  %v6032_v48 = vpop.permute.xlu1 %309 }
  0xb7   : > { %v385_v33 = vpop.f32.mrf.mxu0  ;;  %v417_v34 = vpop.f32.mrf.mxu1 }
  0xb8   : > { %v432_v53 = vadd.f32 %v385_v33, %v6032_v48  ;;  %v433_v55 = vadd.f32 %v417_v34, %v6032_v48 }
  0xba   : > { %v440_v62 = vmax.f32 %v432_v53, 0.0  ;;  %v441_v4 = vmax.f32 %v433_v55, 0.0 }
  0xbf   : > { %v388_v35 = vpop.f32.mrf.mxu0  ;;  %v420_v36 = vpop.f32.mrf.mxu1 }
  0xc0   : > { %v434_v49 = vadd.f32 %v388_v35, %v6024_v39  ;;  %v435_v51 = vadd.f32 %v420_v36, %v6024_v39 }
  0xc2   : > { %v442_v58 = vmax.f32 %v434_v49, 0.0  ;;  %v443_v60 = vmax.f32 %v435_v51, 0.0 }
  0xc7   : > { %v391_v38 = vpop.f32.mrf.mxu0  ;;  %v423_v40 = vpop.f32.mrf.mxu1 }
  0xc8   : > { %v436_v43 = vadd.f32 %v391_v38, %v6026_v41  ;;  %v437_v46 = vadd.f32 %v423_v40, %v6026_v41 }
  0xca   : > { %v444_v54 = vmax.f32 %v436_v43, 0.0  ;;  %v445_v56 = vmax.f32 %v437_v46, 0.0 }
  0xcf   : > { %v394_v42 = vpop.f32.mrf.mxu0  ;;  %v426_v44 = vpop.f32.mrf.mxu1 }
  0xd0   : > { %v438_v45 = vadd.f32 %v394_v42, %v6022_v37  ;;  %v439_v47 = vadd.f32 %v426_v44, %v6022_v37 }
  0xd2   : > { %v446_v50 = vmax.f32 %v438_v45, 0.0  ;;  %v447_v52 = vmax.f32 %v439_v47, 0.0 }
  0xd4   : > { %463 = vmatpush.msra.mxu2 %v446_v50  ;;  %483 = vmatpush.msra.mxu3 %v447_v52 }
  0xd6   : > { %464 = vmatpush.msra.mxu2 %v444_v54  ;;  %484 = vmatpush.msra.mxu3 %v445_v56 }
  0xd8   : > { %465 = vmatpush.msra.mxu2 %v442_v58  ;;  %485 = vmatpush.msra.mxu3 %v443_v60  ;;  %v6132_v58 = vld [vmem:[%s5928_s30 + $0xf0] sm:$0xff] }
  0xda   : > { %466 = vmatpush.msra.mxu2 %v440_v62  ;;  %486 = vmatpush.msra.mxu3 %v441_v4  ;;  %v6135_v62 = vld [vmem:[%s5928_s30 + $0xf8] sm:$0xff]  ;;  %v6138_v4 = vld [vmem:[%s5928_s30 + $0xe0] sm:$0xff] }
  0xdb   : > { %4995 = vmatmul.msk.f32.vlgmr.msra.gmra.mxu2 %vm352_vm0, %v6050_v63  ;;  %4996 = vmatmul.msk.f32.vlgmr.msra.gmra.mxu3 %vm352_vm0, %v6050_v63 }
  0xdc   : > { %539 = vmatpush.msrb.mxu2 %v525_v0  ;;  %571 = vmatpush.msrb.mxu3 %v526_v5 }
  0xde   : > { %540 = vmatpush.msrb.mxu2 %v523_v8  ;;  %572 = vmatpush.msrb.mxu3 %v524_v11  ;;  %v678_v8 = vmul.f32 %v6132_v58, %v5935_v1  ;;  %v6143_v11 = vld [vmem:[%s5928_s30 + $0xe8] sm:$0xff] }
  0xe0   : > { %541 = vmatpush.msrb.mxu2 %v521_v14  ;;  %573 = vmatpush.msrb.mxu3 %v522_v17  ;;  %v679_v17 = vmul.f32 %v6135_v62, %v5939_v3 }
  0xe2   : > { %542 = vmatpush.msrb.mxu2 %v519_v18  ;;  %574 = vmatpush.msrb.mxu3 %v520_v20  ;;  %v6148_v18 = vld [vmem:[%s5928_s30 + $0xd0] sm:$0xff]  ;;  %v676_v20 = vmul.f32 %v6138_v4, %v5944_v6 }
  0xe3   : > { %5005 = vmatmul.msk.f32.vlgmr.msrb.gmra.mxu2 %vm352_vm0, %v5980_v26  ;;  %5010 = vmatmul.msk.f32.vlgmr.msrb.gmra.mxu3 %vm352_vm0, %v5980_v26 }
  0xeb   : > { %5006 = vmatmul.msk.f32.gmra.mxu2 %vm352_vm0, %v5998_v30  ;;  %5011 = vmatmul.msk.f32.gmra.mxu3 %vm352_vm0, %v5998_v30 }
  0xf3   : > { %5007 = vmatmul.msk.f32.gmra.mxu2 %vm352_vm0, %v6007_v31  ;;  %5012 = vmatmul.msk.f32.gmra.mxu3 %vm352_vm0, %v6007_v31 }
  0xfb   : > { %5008 = vmatmul.msk.f32.gmra.mxu2 %vm352_vm0, %v6016_v32  ;;  %5013 = vmatmul.msk.f32.gmra.mxu3 %vm352_vm0, %v6016_v32 }
 0x103   : > { %5009 = vmatmul.msk.f32.gmra.mxu2 %vm352_vm0, %v6110_v28  ;;  %5014 = vmatmul.msk.f32.gmra.mxu3 %vm352_vm0, %v6110_v28 }
 0x15e   : > { %v468_v23 = vpop.f32.mrf.mxu2  ;;  %v488_v24 = vpop.f32.mrf.mxu3 }
 0x15f   : > { %v493_v25 = vrot.slane %v488_v24, 7  ;;  %v6160_v24 = vld [vmem:[%s5928_s30 + $0xc0] sm:$0xff] }
 0x161   : > { %v495_v29 = vsel %vm494_vm1, %v468_v23, %v493_v25  ;;  %v677_v23 = vmul.f32 %v6143_v11, %v5950_v10  ;;  %v674_v25 = vmul.f32 %v6148_v18, %v5954_v12 }
 0x162   : > { %501 = vst.msk [vmem:[#allocation2] ss:$8 sm:$0x3] %vm6103_vm2, %v495_v29  ;;  %v6167_v29 = vld [vmem:[%s5928_s30 + $0xc8] sm:$0xff] }
 0x166   : > { %v544_v33 = vpop.f32.mrf.mxu2  ;;  %v576_v34 = vpop.f32.mrf.mxu3 }
 0x167   : > { %v591_v53 = vadd.f32 %v544_v33, %v6032_v48  ;;  %v592_v55 = vadd.f32 %v576_v34, %v6032_v48  ;;  %v675_v33 = vmul.f32 %v6153_v22, %v5959_v15  ;;  %v672_v34 = vmul.f32 %v6160_v24, %v5965_v19 }
 0x169   : > { %v599_v5 = vmax.f32 %v591_v53, 0.0  ;;  %v600_v14 = vmax.f32 %v592_v55, 0.0 }
 0x16e   : > { %v547_v35 = vpop.f32.mrf.mxu2  ;;  %v579_v36 = vpop.f32.mrf.mxu3 }
 0x16f   : > { %v593_v49 = vadd.f32 %v547_v35, %v6024_v39  ;;  %v594_v51 = vadd.f32 %v579_v36, %v6024_v39  ;;  %v673_v35 = vmul.f32 %v6167_v29, %v5969_v21  ;;  %v429_v36 = vpop.f32.mrf.mxu1 }
 0x171   : > { %v601_v60 = vmax.f32 %v593_v49, 0.0  ;;  %v602_v0 = vmax.f32 %v594_v51, 0.0 }
 0x176   : > { %v550_v38 = vpop.f32.mrf.mxu2  ;;  %v582_v40 = vpop.f32.mrf.mxu3 }
 0x177   : > { %v595_v43 = vadd.f32 %v550_v38, %v6026_v41  ;;  %v596_v46 = vadd.f32 %v582_v40, %v6026_v41  ;;  %v505_v38 = vrot.slane %v429_v36, 7  ;;  %v397_v40 = vpop.f32.mrf.mxu0 }
 0x179   : > { %v603_v54 = vmax.f32 %v595_v43, 0.0  ;;  %v604_v56 = vmax.f32 %v596_v46, 0.0 }
 0x17e   : > { %v553_v42 = vpop.f32.mrf.mxu2  ;;  %v585_v45 = vpop.f32.mrf.mxu3 }
 0x17f   : > { %v597_v44 = vadd.f32 %v553_v42, %v6022_v37  ;;  %v598_v47 = vadd.f32 %v585_v45, %v6022_v37  ;;  %v506_v42 = vsel %vm494_vm1, %v397_v40, %v505_v38  ;;  %v6213_v38 = vld [vmem:[%s5928_s30 + $0x138] sm:$0xff] }
 0x180   : > { %508 = vst.msk [vmem:[#allocation3] ss:$8 sm:$0x3] %vm6103_vm2, %v506_v42  ;;  %v6216_v42 = vld [vmem:[%s5928_s30 + $0x120] sm:$0xff] }
 0x181   : > { %v605_v50 = vmax.f32 %v597_v44, 0.0  ;;  %v606_v52 = vmax.f32 %v598_v47, 0.0 }
 0x183   : > { %619 = vmatpush.msrb.mxu0 %v605_v50  ;;  %639 = vmatpush.msrb.mxu1 %v606_v52 }
 0x185   : > { %620 = vmatpush.msrb.mxu0 %v603_v54  ;;  %640 = vmatpush.msrb.mxu1 %v604_v56 }
 0x187   : > { %621 = vmatpush.msrb.mxu0 %v601_v60  ;;  %641 = vmatpush.msrb.mxu1 %v602_v0 }
 0x189   : > { %622 = vmatpush.msrb.mxu0 %v599_v5  ;;  %642 = vmatpush.msrb.mxu1 %v600_v14 }
 0x18a   : > { %5015 = vmatmul.msk.f32.vlgmr.msrb.gmra.mxu0 %vm352_vm0, %v6050_v63  ;;  %5016 = vmatmul.msk.f32.vlgmr.msrb.gmra.mxu1 %vm352_vm0, %v6050_v63 }
 0x18b   : > { %692 = vmatpush.msra.mxu0 %v678_v8  ;;  %724 = vmatpush.msra.mxu1 %v679_v17 }
 0x18d   : > { %693 = vmatpush.msra.mxu0 %v676_v20  ;;  %725 = vmatpush.msra.mxu1 %v677_v23 }
 0x18f   : > { %694 = vmatpush.msra.mxu0 %v674_v25  ;;  %726 = vmatpush.msra.mxu1 %v675_v33 }
 0x191   : > { %695 = vmatpush.msra.mxu0 %v672_v34  ;;  %727 = vmatpush.msra.mxu1 %v673_v35  ;;  %v6210_v35 = vld [vmem:[%s5928_s30 + $0x130] sm:$0xff] }
 0x192   : > { %5025 = vmatmul.msk.f32.vlgmr.msra.gmra.mxu0 %vm352_vm0, %v5980_v26  ;;  %5030 = vmatmul.msk.f32.vlgmr.msra.gmra.mxu1 %vm352_vm0, %v5980_v26 }
 0x19a   : > { %5026 = vmatmul.msk.f32.gmra.mxu0 %vm352_vm0, %v5998_v30  ;;  %5031 = vmatmul.msk.f32.gmra.mxu1 %vm352_vm0, %v5998_v30 }
 0x1a2   : > { %5027 = vmatmul.msk.f32.gmra.mxu0 %vm352_vm0, %v6007_v31  ;;  %5032 = vmatmul.msk.f32.gmra.mxu1 %vm352_vm0, %v6007_v31 }
 0x1aa   : > { %5028 = vmatmul.msk.f32.gmra.mxu0 %vm352_vm0, %v6016_v32  ;;  %5033 = vmatmul.msk.f32.gmra.mxu1 %vm352_vm0, %v6016_v32 }
 0x1b2   : > { %5029 = vmatmul.msk.f32.gmra.mxu0 %vm352_vm0, %v6110_v28  ;;  %5034 = vmatmul.msk.f32.gmra.mxu1 %vm352_vm0, %v6110_v28 }
 0x207   : > { %v624_v43 = vpop.f32.mrf.mxu0  ;;  %v644_v44 = vpop.f32.mrf.mxu1 }
 0x208   : > { %v649_v45 = vrot.slane %v644_v44, 7  ;;  %v831_v44 = vmul.f32 %v6210_v35, %v5935_v1 }
 0x20a   : > { %v650_v46 = vsel %vm494_vm1, %v624_v43, %v649_v45  ;;  %v6221_v45 = vld [vmem:[%s5928_s30 + $0x128] sm:$0xff] }
 0x20b   : > { %653 = vst.msk [vmem:[#allocation2 + $0x1] ss:$8 sm:$0x3] %vm6103_vm2, %v650_v46 }
 0x20f   : > { %v697_v47 = vpop.f32.mrf.mxu0  ;;  %v729_v49 = vpop.f32.mrf.mxu1 }
 0x210   : > { %v744_v23 = vadd.f32 %v697_v47, %v6032_v48  ;;  %v745_v33 = vadd.f32 %v729_v49, %v6032_v48  ;;  %v832_v47 = vmul.f32 %v6213_v38, %v5939_v3  ;;  %v6226_v49 = vld [vmem:[%s5928_s30 + $0x110] sm:$0xff] }
 0x212   : > { %v752_v43 = vmax.f32 %v744_v23, 0.0  ;;  %v753_v46 = vmax.f32 %v745_v33, 0.0 }
 0x217   : > { %v700_v50 = vpop.f32.mrf.mxu0  ;;  %v732_v51 = vpop.f32.mrf.mxu1 }
 0x218   : > { %v746_v8 = vadd.f32 %v700_v50, %v6024_v39  ;;  %v747_v17 = vadd.f32 %v732_v51, %v6024_v39  ;;  %v829_v50 = vmul.f32 %v6216_v42, %v5944_v6  ;;  %v6231_v51 = vld [vmem:[%s5928_s30 + $0x118] sm:$0xff] }
 0x21a   : > { %v754_v36 = vmax.f32 %v746_v8, 0.0  ;;  %v755_v40 = vmax.f32 %v747_v17, 0.0  ;;  %v556_v8 = vpop.f32.mrf.mxu2 }
 0x21f   : > { %v703_v52 = vpop.f32.mrf.mxu0  ;;  %v735_v53 = vpop.f32.mrf.mxu1 }
 0x220   : > { %v748_v55 = vadd.f32 %v703_v52, %v6026_v41  ;;  %v749_v0 = vadd.f32 %v735_v53, %v6026_v41  ;;  %v830_v52 = vmul.f32 %v6221_v45, %v5950_v10  ;;  %v6238_v53 = vld [vmem:[%s5928_s30 + $0x100] sm:$0xff] }
 0x222   : > { %v756_v25 = vmax.f32 %v748_v55, 0.0  ;;  %v757_v34 = vmax.f32 %v749_v0, 0.0  ;;  %v6245_v55 = vld [vmem:[%s5928_s30 + $0x108] sm:$0xff] }
 0x227   : > { %v706_v54 = vpop.f32.mrf.mxu0  ;;  %v738_v60 = vpop.f32.mrf.mxu1 }
 0x228   : > { %v750_v56 = vadd.f32 %v706_v54, %v6022_v37  ;;  %v751_v5 = vadd.f32 %v738_v60, %v6022_v37  ;;  %v827_v54 = vmul.f32 %v6226_v49, %v5954_v12  ;;  %v828_v60 = vmul.f32 %v6231_v51, %v5959_v15 }
 0x22a   : > { %v758_v14 = vmax.f32 %v750_v56, 0.0  ;;  %v759_v20 = vmax.f32 %v751_v5, 0.0  ;;  %v588_v56 = vpop.f32.mrf.mxu3  ;;  %v825_v5 = vmul.f32 %v6238_v53, %v5965_v19 }
 0x22b   : > { %v657_v0 = vrot.slane %v588_v56, 7 }
 0x22c   : > { %772 = vmatpush.msra.mxu2 %v758_v14  ;;  %792 = vmatpush.msra.mxu3 %v759_v20  ;;  %v826_v14 = vmul.f32 %v6245_v55, %v5969_v21 }
 0x22d   : > { %v658_v17 = vsel %vm494_vm1, %v556_v8, %v657_v0 }
 0x22e   : > { %773 = vmatpush.msra.mxu2 %v756_v25  ;;  %793 = vmatpush.msra.mxu3 %v757_v34  ;;  %661 = vst.msk [vmem:[#allocation3 + $0x1] ss:$8 sm:$0x3] %vm6103_vm2, %v658_v17 }
 0x230   : > { %774 = vmatpush.msra.mxu2 %v754_v36  ;;  %794 = vmatpush.msra.mxu3 %v755_v40 }
 0x232   : > { %775 = vmatpush.msra.mxu2 %v752_v43  ;;  %795 = vmatpush.msra.mxu3 %v753_v46 }
 0x233   : > { %5035 = vmatmul.msk.f32.vlgmr.msra.gmra.mxu2 %vm352_vm0, %v6050_v63  ;;  %5036 = vmatmul.msk.f32.vlgmr.msra.gmra.mxu3 %vm352_vm0, %v6050_v63 }
 0x234   : > { %845 = vmatpush.msrb.mxu2 %v831_v44  ;;  %877 = vmatpush.msrb.mxu3 %v832_v47 }
 0x236   : > { %846 = vmatpush.msrb.mxu2 %v829_v50  ;;  %878 = vmatpush.msrb.mxu3 %v830_v52 }
 0x238   : > { %847 = vmatpush.msrb.mxu2 %v827_v54  ;;  %879 = vmatpush.msrb.mxu3 %v828_v60 }
 0x23a   : > { %848 = vmatpush.msrb.mxu2 %v825_v5  ;;  %880 = vmatpush.msrb.mxu3 %v826_v14 }
 0x23b   : > { %5045 = vmatmul.msk.f32.vlgmr.msrb.gmra.mxu2 %vm352_vm0, %v5980_v26  ;;  %5050 = vmatmul.msk.f32.vlgmr.msrb.gmra.mxu3 %vm352_vm0, %v5980_v26 }
 0x243   : > { %5046 = vmatmul.msk.f32.gmra.mxu2 %vm352_vm0, %v5998_v30  ;;  %5051 = vmatmul.msk.f32.gmra.mxu3 %vm352_vm0, %v5998_v30 }
 0x24b   : > { %5047 = vmatmul.msk.f32.gmra.mxu2 %vm352_vm0, %v6007_v31  ;;  %5052 = vmatmul.msk.f32.gmra.mxu3 %vm352_vm0, %v6007_v31 }
 0x253   : > { %5048 = vmatmul.msk.f32.gmra.mxu2 %vm352_vm0, %v6016_v32  ;;  %5053 = vmatmul.msk.f32.gmra.mxu3 %vm352_vm0, %v6016_v32 }
 0x25b   : > { %5049 = vmatmul.msk.f32.gmra.mxu2 %vm352_vm0, %v6110_v28  ;;  %5054 = vmatmul.msk.f32.gmra.mxu3 %vm352_vm0, %v6110_v28 }
 0x2b6   : > { %v777_v20 = vpop.f32.mrf.mxu2  ;;  %v797_v23 = vpop.f32.mrf.mxu3 }
 0x2b7   : > { %v802_v25 = vrot.slane %v797_v23, 7 }
 0x2b9   : > { %v803_v33 = vsel %vm494_vm1, %v777_v20, %v802_v25 }
 0x2ba   : > { %806 = vst.msk [vmem:[#allocation2 + $0x2] ss:$8 sm:$0x3] %vm6103_vm2, %v803_v33  ;;  %v6288_v33 = vld [vmem:[%s5928_s30 + $0x170] sm:$0xff] }
 0x2be   : > { %v850_v34 = vpop.f32.mrf.mxu2  ;;  %v882_v36 = vpop.f32.mrf.mxu3 }
 0x2bf   : > { %v897_v17 = vadd.f32 %v850_v34, %v6032_v48  ;;  %v898_v23 = vadd.f32 %v882_v36, %v6032_v48  ;;  %v984_v36 = vmul.f32 %v6288_v33, %v5935_v1 }
 0x2c1   : > { %v905_v34 = vmax.f32 %v897_v17, 0.0  ;;  %v741_v17 = vpop.f32.mrf.mxu1 }
 0x2c6   : > { %v853_v40 = vpop.f32.mrf.mxu2  ;;  %v885_v43 = vpop.f32.mrf.mxu3 }
 0x2c7   : > { %v899_v0 = vadd.f32 %v853_v40, %v6024_v39  ;;  %v900_v8 = vadd.f32 %v885_v43, %v6024_v39  ;;  %v6291_v40 = vld [vmem:[%s5928_s30 + $0x178] sm:$0xff]  ;;  %v6294_v43 = vld [vmem:[%s5928_s30 + $0x160] sm:$0xff] }
 0x2ce   : > { %v856_v44 = vpop.f32.mrf.mxu2  ;;  %v888_v46 = vpop.f32.mrf.mxu3 }
 0x2cf   : > { %v901_v50 = vadd.f32 %v856_v44, %v6026_v41  ;;  %v902_v56 = vadd.f32 %v888_v46, %v6026_v41  ;;  %v907_v44 = vmax.f32 %v899_v0, 0.0  ;;  %v908_v46 = vmax.f32 %v900_v8, 0.0 }
 0x2d1   : > { %v909_v20 = vmax.f32 %v901_v50, 0.0  ;;  %v910_v25 = vmax.f32 %v902_v56, 0.0  ;;  %v906_v50 = vmax.f32 %v898_v23, 0.0  ;;  %v982_v56 = vmul.f32 %v6294_v43, %v5944_v6 }
 0x2d2   : > { %v810_v23 = vrot.slane %v741_v17, 7 }
 0x2d6   : > { %v859_v47 = vpop.f32.mrf.mxu2  ;;  %v891_v54 = vpop.f32.mrf.mxu3 }
 0x2d7   : > { %v903_v52 = vadd.f32 %v859_v47, %v6022_v37  ;;  %v904_v60 = vadd.f32 %v891_v54, %v6022_v37  ;;  %v6299_v47 = vld [vmem:[%s5928_s30 + $0x168] sm:$0xff]  ;;  %v6304_v54 = vld [vmem:[%s5928_s30 + $0x150] sm:$0xff] }
 0x2d8   : > { %8127 = vst [vmem:[#allocation11_spill] sm:$0xff] %v6299_v47  ;;  %v983_v0 = vmul.f32 %v6299_v47, %v5950_v10  ;;  %v980_v8 = vmul.f32 %v6304_v54, %v5954_v12 }
 0x2d9   : > { %v911_v5 = vmax.f32 %v903_v52, 0.0  ;;  %v912_v14 = vmax.f32 %v904_v60, 0.0  ;;  %v985_v52 = vmul.f32 %v6291_v40, %v5939_v3  ;;  %8128 = vst [vmem:[#allocation12_spill] sm:$0xff] %v6304_v54  ;;  %v6309_v60 = vld [vmem:[%s5928_s30 + $0x158] sm:$0xff] }
 0x2da   : > { %8129 = vst [vmem:[#allocation13_spill] sm:$0xff] %v6309_v60 }
 0x2db   : > { %925 = vmatpush.msrb.mxu0 %v911_v5  ;;  %945 = vmatpush.msrb.mxu1 %v912_v14  ;;  %v6316_v5 = vld [vmem:[%s5928_s30 + $0x140] sm:$0xff]  ;;  %v6323_v14 = vld [vmem:[%s5928_s30 + $0x148] sm:$0xff] }
 0x2dc   : > { %8130 = vst [vmem:[#allocation14_spill] sm:$0xff] %v6316_v5 }
 0x2dd   : > { %926 = vmatpush.msrb.mxu0 %v909_v20  ;;  %946 = vmatpush.msrb.mxu1 %v910_v25  ;;  %8131 = vst [vmem:[#allocation15_spill] sm:$0xff] %v6323_v14  ;;  %v981_v20 = vmul.f32 %v6309_v60, %v5959_v15  ;;  %v978_v25 = vmul.f32 %v6316_v5, %v5965_v19 }
 0x2df   : > { %927 = vmatpush.msrb.mxu0 %v907_v44  ;;  %947 = vmatpush.msrb.mxu1 %v908_v46  ;;  %v709_v44 = vpop.f32.mrf.mxu0  ;;  %v979_v46 = vmul.f32 %v6323_v14, %v5969_v21 }
 0x2e1   : > { %928 = vmatpush.msrb.mxu0 %v905_v34  ;;  %948 = vmatpush.msrb.mxu1 %v906_v50  ;;  %v811_v34 = vsel %vm494_vm1, %v709_v44, %v810_v23 }
 0x2e2   : > { %5055 = vmatmul.msk.f32.vlgmr.msrb.gmra.mxu0 %vm352_vm0, %v6050_v63  ;;  %5056 = vmatmul.msk.f32.vlgmr.msrb.gmra.mxu1 %vm352_vm0, %v6050_v63  ;;  %814 = vst.msk [vmem:[#allocation3 + $0x2] ss:$8 sm:$0x3] %vm6103_vm2, %v811_v34 }
 0x2e3   : > { %998 = vmatpush.msra.mxu0 %v984_v36  ;;  %1030 = vmatpush.msra.mxu1 %v985_v52 }
 0x2e5   : > { %999 = vmatpush.msra.mxu0 %v982_v56  ;;  %1031 = vmatpush.msra.mxu1 %v983_v0 }
 0x2e7   : > { %1000 = vmatpush.msra.mxu0 %v980_v8  ;;  %1032 = vmatpush.msra.mxu1 %v981_v20 }
 0x2e9   : > { %1001 = vmatpush.msra.mxu0 %v978_v25  ;;  %1033 = vmatpush.msra.mxu1 %v979_v46 }
 0x2ea   : > { %5065 = vmatmul.msk.f32.vlgmr.msra.gmra.mxu0 %vm352_vm0, %v5980_v26  ;;  %5070 = vmatmul.msk.f32.vlgmr.msra.gmra.mxu1 %vm352_vm0, %v5980_v26 }
 0x2f2   : > { %5066 = vmatmul.msk.f32.gmra.mxu0 %vm352_vm0, %v5998_v30  ;;  %5071 = vmatmul.msk.f32.gmra.mxu1 %vm352_vm0, %v5998_v30 }
 0x2fa   : > { %5067 = vmatmul.msk.f32.gmra.mxu0 %vm352_vm0, %v6007_v31  ;;  %5072 = vmatmul.msk.f32.gmra.mxu1 %vm352_vm0, %v6007_v31 }
 0x302   : > { %5068 = vmatmul.msk.f32.gmra.mxu0 %vm352_vm0, %v6016_v32  ;;  %5073 = vmatmul.msk.f32.gmra.mxu1 %vm352_vm0, %v6016_v32 }
 0x30a   : > { %5069 = vmatmul.msk.f32.gmra.mxu0 %vm352_vm0, %v6110_v28  ;;  %5074 = vmatmul.msk.f32.gmra.mxu1 %vm352_vm0, %v6110_v28 }
 0x35f   : > { %v930_v36 = vpop.f32.mrf.mxu0  ;;  %v950_v50 = vpop.f32.mrf.mxu1 }
 0x360   : > { %v955_v52 = vrot.slane %v950_v50, 7 }
 0x362   : > { %v956_v56 = vsel %vm494_vm1, %v930_v36, %v955_v52 }
 0x363   : > { %959 = vst.msk [vmem:[#allocation2 + $0x3] ss:$8 sm:$0x3] %vm6103_vm2, %v956_v56 }
 0x367   : > { %v1003_v0 = vpop.f32.mrf.mxu0  ;;  %v1035_v8 = vpop.f32.mrf.mxu1 }
 0x368   : > { %v1050_v54 = vadd.f32 %v1003_v0, %v6032_v48 }
 0x36a   : > { %v1058_v0 = vmax.f32 %v1050_v54, 0.0 }
 0x36f   : > { %v1006_v17 = vpop.f32.mrf.mxu0  ;;  %v1038_v20 = vpop.f32.mrf.mxu1 }
 0x370   : > { %v1052_v52 = vadd.f32 %v1006_v17, %v6024_v39  ;;  %v1053_v5 = vadd.f32 %v1038_v20, %v6024_v39  ;;  %v6369_v17 = vld [vmem:[%s5928_s30 + $0x1b8] sm:$0xff]  ;;  %v6372_v20 = vld [vmem:[%s5928_s30 + $0x1a0] sm:$0xff] }
 0x371   : > { %8133 = vst [vmem:[#allocation17_spill] sm:$0xff] %v6369_v17 }
 0x372   : > { %8134 = vst [vmem:[#allocation18_spill] sm:$0xff] %v6372_v20 }
 0x377   : > { %v1009_v23 = vpop.f32.mrf.mxu0  ;;  %v1041_v25 = vpop.f32.mrf.mxu1 }
 0x378   : > { %v1054_v46 = vadd.f32 %v1009_v23, %v6026_v41  ;;  %v1055_v50 = vadd.f32 %v1041_v25, %v6026_v41  ;;  %v1051_v23 = vadd.f32 %v1035_v8, %v6032_v48  ;;  %v6366_v25 = vld [vmem:[%s5928_s30 + $0x1b0] sm:$0xff] }
 0x379   : > { %8132 = vst [vmem:[#allocation16_spill] sm:$0xff] %v6366_v25  ;;  %v1137_v8 = vmul.f32 %v6366_v25, %v5935_v1 }
 0x37a   : > { %v1062_v47 = vmax.f32 %v1054_v46, 0.0  ;;  %v6377_v46 = vld [vmem:[%s5928_s30 + $0x1a8] sm:$0xff] }
 0x37b   : > { %8135 = vst [vmem:[#allocation19_spill] sm:$0xff] %v6377_v46  ;;  %v1136_v54 = vmul.f32 %v6377_v46, %v5950_v10 }
 0x37f   : > { %v1012_v44 = vpop.f32.mrf.mxu0  ;;  %v1044_v14 = vpop.f32.mrf.mxu1 }
 0x380   : > { %v1056_v34 = vadd.f32 %v1012_v44, %v6022_v37  ;;  %v1057_v36 = vadd.f32 %v1044_v14, %v6022_v37  ;;  %v1063_v44 = vmax.f32 %v1055_v50, 0.0  ;;  %v1060_v14 = vmax.f32 %v1052_v52, 0.0  ;;  %v6382_v50 = vld [vmem:[%s5928_s30 + $0x190] sm:$0xff]  ;;  %v6394_v52 = vld [vmem:[%s5928_s30 + $0x180] sm:$0xff] }
 0x381   : > { %8136 = vst [vmem:[#allocation20_spill] sm:$0xff] %v6382_v50 }
 0x382   : > { %v1064_v56 = vmax.f32 %v1056_v34, 0.0  ;;  %v1065_v60 = vmax.f32 %v1057_v36, 0.0  ;;  %v1061_v34 = vmax.f32 %v1053_v5, 0.0  ;;  %v1135_v5 = vmul.f32 %v6372_v20, %v5944_v6  ;;  %v6387_v36 = vld [vmem:[%s5928_s30 + $0x198] sm:$0xff]  ;;  %8138 = vst [vmem:[#allocation22_spill] sm:$0xff] %v6394_v52 }
 0x383   : > { %8137 = vst [vmem:[#allocation21_spill] sm:$0xff] %v6387_v36 }
 0x384   : > { %1078 = vmatpush.msra.mxu2 %v1064_v56  ;;  %1098 = vmatpush.msra.mxu3 %v1065_v60  ;;  %v1059_v60 = vmax.f32 %v1051_v23, 0.0  ;;  %v1133_v56 = vmul.f32 %v6382_v50, %v5954_v12  ;;  %v6401_v23 = vld [vmem:[%s5928_s30 + $0x188] sm:$0xff] }
 0x385   : > { %8139 = vst [vmem:[#allocation23_spill] sm:$0xff] %v6401_v23 }
 0x386   : > { %1079 = vmatpush.msra.mxu2 %v1062_v47  ;;  %1099 = vmatpush.msra.mxu3 %v1063_v44  ;;  %v1138_v47 = vmul.f32 %v6369_v17, %v5939_v3  ;;  %v894_v44 = vpop.f32.mrf.mxu3 }
 0x388   : > { %1080 = vmatpush.msra.mxu2 %v1060_v14  ;;  %1100 = vmatpush.msra.mxu3 %v1061_v34  ;;  %v1134_v14 = vmul.f32 %v6387_v36, %v5959_v15  ;;  %v963_v34 = vrot.slane %v894_v44, 7 }
 0x38a   : > { %1081 = vmatpush.msra.mxu2 %v1058_v0  ;;  %1101 = vmatpush.msra.mxu3 %v1059_v60  ;;  %v1131_v0 = vmul.f32 %v6394_v52, %v5965_v19  ;;  %v862_v60 = vpop.f32.mrf.mxu2 }
 0x38b   : > { %5075 = vmatmul.msk.f32.vlgmr.msra.gmra.mxu2 %vm352_vm0, %v6050_v63  ;;  %5076 = vmatmul.msk.f32.vlgmr.msra.gmra.mxu3 %vm352_vm0, %v6050_v63  ;;  %v964_v46 = vsel %vm494_vm1, %v862_v60, %v963_v34 }
 0x38c   : > { %1151 = vmatpush.msrb.mxu2 %v1137_v8  ;;  %1183 = vmatpush.msrb.mxu3 %v1138_v47  ;;  %v1132_v8 = vmul.f32 %v6401_v23, %v5969_v21  ;;  %967 = vst.msk [vmem:[#allocation3 + $0x3] ss:$8 sm:$0x3] %vm6103_vm2, %v964_v46 }
 0x38e   : > { %1152 = vmatpush.msrb.mxu2 %v1135_v5  ;;  %1184 = vmatpush.msrb.mxu3 %v1136_v54 }
 0x390   : > { %1153 = vmatpush.msrb.mxu2 %v1133_v56  ;;  %1185 = vmatpush.msrb.mxu3 %v1134_v14 }
 0x392   : > { %1154 = vmatpush.msrb.mxu2 %v1131_v0  ;;  %1186 = vmatpush.msrb.mxu3 %v1132_v8 }
 0x393   : > { %5085 = vmatmul.msk.f32.vlgmr.msrb.gmra.mxu2 %vm352_vm0, %v5980_v26  ;;  %5090 = vmatmul.msk.f32.vlgmr.msrb.gmra.mxu3 %vm352_vm0, %v5980_v26 }
 0x39b   : > { %5086 = vmatmul.msk.f32.gmra.mxu2 %vm352_vm0, %v5998_v30  ;;  %5091 = vmatmul.msk.f32.gmra.mxu3 %vm352_vm0, %v5998_v30 }
 0x3a3   : > { %5087 = vmatmul.msk.f32.gmra.mxu2 %vm352_vm0, %v6007_v31  ;;  %5092 = vmatmul.msk.f32.gmra.mxu3 %vm352_vm0, %v6007_v31 }
 0x3ab   : > { %5088 = vmatmul.msk.f32.gmra.mxu2 %vm352_vm0, %v6016_v32  ;;  %5093 = vmatmul.msk.f32.gmra.mxu3 %vm352_vm0, %v6016_v32 }
 0x3b3   : > { %5089 = vmatmul.msk.f32.gmra.mxu2 %vm352_vm0, %v6110_v28  ;;  %5094 = vmatmul.msk.f32.gmra.mxu3 %vm352_vm0, %v6110_v28 }
 0x40e   : > { %v1083_v46 = vpop.f32.mrf.mxu2  ;;  %v1103_v47 = vpop.f32.mrf.mxu3 }
 0x40f   : > { %v1108_v5 = vrot.slane %v1103_v47, 7 }
 0x411   : > { %v1109_v54 = vsel %vm494_vm1, %v1083_v46, %v1108_v5 }
 0x412   : > { %1112 = vst.msk [vmem:[#allocation2 + $0x4] ss:$8 sm:$0x3] %vm6103_vm2, %v1109_v54 }
 0x416   : > { %v1156_v56 = vpop.f32.mrf.mxu2  ;;  %v1188_v44 = vpop.f32.mrf.mxu3 }
 0x417   : > { %v1203_v17 = vadd.f32 %v1156_v56, %v6032_v48 }
 0x419   : > { %v1211_v56 = vmax.f32 %v1203_v17, 0.0  ;;  %v6472_v17 = vld [vmem:[%s5928_s30 + $0x1c0] sm:$0xff] }
 0x41e   : > { %v1159_v14 = vpop.f32.mrf.mxu2  ;;  %v1191_v34 = vpop.f32.mrf.mxu3 }
 0x41f   : > { %v1205_v5 = vadd.f32 %v1159_v14, %v6024_v39  ;;  %v1206_v50 = vadd.f32 %v1191_v34, %v6024_v39  ;;  %v6447_v14 = vld [vmem:[%s5928_s30 + $0x1f8] sm:$0xff]  ;;  %v6450_v34 = vld [vmem:[%s5928_s30 + $0x1e0] sm:$0xff] }
 0x426   : > { %v1162_v0 = vpop.f32.mrf.mxu2  ;;  %v1194_v60 = vpop.f32.mrf.mxu3 }
 0x427   : > { %v1207_v23 = vadd.f32 %v1162_v0, %v6026_v41  ;;  %v1208_v47 = vadd.f32 %v1194_v60, %v6026_v41  ;;  %v1204_v0 = vadd.f32 %v1188_v44, %v6032_v48  ;;  %v6444_v60 = vld [vmem:[%s5928_s30 + $0x1f0] sm:$0xff]  ;;  %v6455_v44 = vld [vmem:[%s5928_s30 + $0x1e8] sm:$0xff] }
 0x429   : > { %v1215_v25 = vmax.f32 %v1207_v23, 0.0  ;;  %v1290_v23 = vmul.f32 %v6444_v60, %v5935_v1  ;;  %v1289_v1 = vmul.f32 %v6455_v44, %v5950_v10  ;;  %v1284_v10 = vmul.f32 %v6472_v17, %v5965_v19 }
 0x42e   : > { %v1165_v8 = vpop.f32.mrf.mxu2  ;;  %v1197_v36 = vpop.f32.mrf.mxu3 }
 0x42f   : > { %v1209_v52 = vadd.f32 %v1165_v8, %v6022_v37  ;;  %v1210_v46 = vadd.f32 %v1197_v36, %v6022_v37  ;;  %v1216_v8 = vmax.f32 %v1208_v47, 0.0  ;;  %v1213_v36 = vmax.f32 %v1205_v5, 0.0  ;;  %v6460_v47 = vld [vmem:[%s5928_s30 + $0x1d0] sm:$0xff]  ;;  %v6479_v5 = vld [vmem:[%s5928_s30 + $0x1c8] sm:$0xff] }
 0x431   : > { %v1217_v54 = vmax.f32 %v1209_v52, 0.0  ;;  %v1218_v20 = vmax.f32 %v1210_v46, 0.0  ;;  %v1214_v52 = vmax.f32 %v1206_v50, 0.0  ;;  %v1288_v50 = vmul.f32 %v6450_v34, %v5944_v6  ;;  %v6465_v46 = vld [vmem:[%s5928_s30 + $0x1d8] sm:$0xff]  ;;  %v1047_v6 = vpop.f32.mrf.mxu1 }
 0x433   : > { %1231 = vmatpush.msrb.mxu0 %v1217_v54  ;;  %1251 = vmatpush.msrb.mxu1 %v1218_v20  ;;  %v1212_v20 = vmax.f32 %v1204_v0, 0.0  ;;  %v1287_v54 = vmul.f32 %v6465_v46, %v5959_v15  ;;  %v1116_v0 = vrot.slane %v1047_v6, 7 }
 0x435   : > { %1232 = vmatpush.msrb.mxu0 %v1215_v25  ;;  %1252 = vmatpush.msrb.mxu1 %v1216_v8  ;;  %v1291_v25 = vmul.f32 %v6447_v14, %v5939_v3  ;;  %v1286_v3 = vmul.f32 %v6460_v47, %v5954_v12  ;;  %v1015_v8 = vpop.f32.mrf.mxu0 }
 0x437   : > { %1233 = vmatpush.msrb.mxu0 %v1213_v36  ;;  %1253 = vmatpush.msrb.mxu1 %v1214_v52  ;;  %v1285_v36 = vmul.f32 %v6479_v5, %v5969_v21  ;;  %v1117_v52 = vsel %vm494_vm1, %v1015_v8, %v1116_v0 }
 0x438   : > { %1120 = vst.msk [vmem:[#allocation3 + $0x4] ss:$8 sm:$0x3] %vm6103_vm2, %v1117_v52 }
 0x439   : > { %1234 = vmatpush.msrb.mxu0 %v1211_v56  ;;  %1254 = vmatpush.msrb.mxu1 %v1212_v20 }
 0x43a   : > { %5095 = vmatmul.msk.f32.vlgmr.msrb.gmra.mxu0 %vm352_vm0, %v6050_v63  ;;  %5096 = vmatmul.msk.f32.vlgmr.msrb.gmra.mxu1 %vm352_vm0, %v6050_v63 }
 0x43b   : > { %1304 = vmatpush.msra.mxu0 %v1290_v23  ;;  %1336 = vmatpush.msra.mxu1 %v1291_v25 }
 0x43d   : > { %1305 = vmatpush.msra.mxu0 %v1288_v50  ;;  %1337 = vmatpush.msra.mxu1 %v1289_v1 }
 0x43f   : > { %1306 = vmatpush.msra.mxu0 %v1286_v3  ;;  %1338 = vmatpush.msra.mxu1 %v1287_v54 }
 0x441   : > { %1307 = vmatpush.msra.mxu0 %v1284_v10  ;;  %1339 = vmatpush.msra.mxu1 %v1285_v36 }
 0x442   : > { %5105 = vmatmul.msk.f32.vlgmr.msra.gmra.mxu0 %vm352_vm0, %v5980_v26  ;;  %5110 = vmatmul.msk.f32.vlgmr.msra.gmra.mxu1 %vm352_vm0, %v5980_v26 }
 0x44a   : > { %5106 = vmatmul.msk.f32.gmra.mxu0 %vm352_vm0, %v5998_v30  ;;  %5111 = vmatmul.msk.f32.gmra.mxu1 %vm352_vm0, %v5998_v30 }
 0x452   : > { %5107 = vmatmul.msk.f32.gmra.mxu0 %vm352_vm0, %v6007_v31  ;;  %5112 = vmatmul.msk.f32.gmra.mxu1 %vm352_vm0, %v6007_v31 }
 0x45a   : > { %5108 = vmatmul.msk.f32.gmra.mxu0 %vm352_vm0, %v6016_v32  ;;  %5113 = vmatmul.msk.f32.gmra.mxu1 %vm352_vm0, %v6016_v32 }
 0x462   : > { %5109 = vmatmul.msk.f32.gmra.mxu0 %vm352_vm0, %v6110_v28  ;;  %5114 = vmatmul.msk.f32.gmra.mxu1 %vm352_vm0, %v6110_v28 }
 0x4b7   : > { %v1236_v12 = vpop.f32.mrf.mxu0  ;;  %v1256_v15 = vpop.f32.mrf.mxu1 }
 0x4b8   : > { %v1261_v19 = vrot.slane %v1256_v15, 7 }
 0x4ba   : > { %v1262_v21 = vsel %vm494_vm1, %v1236_v12, %v1261_v19  ;;  %v6522_v19 = vld [vmem:[%s5928_s30 + $0x70] sm:$0xff] }
 0x4bb   : > { %1265 = vst.msk [vmem:[#allocation2 + $0x5] ss:$8 sm:$0x3] %vm6103_vm2, %v1262_v21 }
 0x4bf   : > { %v1309_v26 = vpop.f32.mrf.mxu0  ;;  %v1341_v30 = vpop.f32.mrf.mxu1 }
 0x4c0   : > { %v1356_v36 = vadd.f32 %v1309_v26, %v6032_v48  ;;  %v1357_v12 = vadd.f32 %v1341_v30, %v6032_v48  ;;  %v1450_v30 = vmul.f32 %v6522_v19, %v6039_v57 }
 0x4c2   : > { %v1364_v26 = vmax.f32 %v1356_v36, 0.0  ;;  %v6598_v36 = vld [vmem:[%s8095_s2 + $0x18] sm:$0xff] }
 0x4c7   : > { %v1312_v31 = vpop.f32.mrf.mxu0  ;;  %v1344_v56 = vpop.f32.mrf.mxu1 }
 0x4c8   : > { %v1358_v54 = vadd.f32 %v1312_v31, %v6024_v39  ;;  %v1359_v10 = vadd.f32 %v1344_v56, %v6024_v39  ;;  %v6525_v31 = vld [vmem:[%s5928_s30 + $0x78] sm:$0xff]  ;;  %v6528_v56 = vld [vmem:[%s5928_s30 + $0x60] sm:$0xff] }
 0x4ca   : > { %v1366_v21 = vmax.f32 %v1358_v54, 0.0  ;;  %v6557_v54 = vld [vmem:[%s5928_s30 + $0x48] sm:$0xff] }
 0x4cf   : > { %v1315_v23 = vpop.f32.mrf.mxu0  ;;  %v1347_v32 = vpop.f32.mrf.mxu1 }
 0x4d0   : > { %v1360_v25 = vadd.f32 %v1315_v23, %v6026_v41  ;;  %v1361_v3 = vadd.f32 %v1347_v32, %v6026_v41  ;;  %v1367_v23 = vmax.f32 %v1359_v10, 0.0  ;;  %v6533_v32 = vld [vmem:[%s5928_s30 + $0x68] sm:$0xff] }
 0x4d1   : > { %v1449_v57 = vmul.f32 %v6533_v32, %v6055_v2  ;;  %v1445_v2 = vmul.f32 %v6557_v54, %v6079_v16  ;;  %v6580_v10 = vld [vmem:[%s8095_s2 + $0x8] sm:$0xff] }
 0x4d2   : > { %v1368_v52 = vmax.f32 %v1360_v25, 0.0  ;;  %v1369_v15 = vmax.f32 %v1361_v3, 0.0  ;;  %v1451_v25 = vmul.f32 %v6525_v31, %v6042_v59  ;;  %v6543_v3 = vld [vmem:[%s5928_s30 + $0x58] sm:$0xff] }
 0x4d7   : > { %v1318_v20 = vpop.f32.mrf.mxu0  ;;  %v1350_v1 = vpop.f32.mrf.mxu1 }
 0x4d8   : > { %v1362_v50 = vadd.f32 %v1318_v20, %v6022_v37  ;;  %v1363_v6 = vadd.f32 %v1350_v1, %v6022_v37  ;;  %v1365_v20 = vmax.f32 %v1357_v12, 0.0  ;;  %v1448_v1 = vmul.f32 %v6528_v56, %v6045_v61 }
 0x4d9   : > { %v1447_v61 = vmul.f32 %v6543_v3, %v6065_v9 }
 0x4da   : > { %v1370_v0 = vmax.f32 %v1362_v50, 0.0  ;;  %v1371_v8 = vmax.f32 %v1363_v6, 0.0  ;;  %v6538_v50 = vld [vmem:[%s5928_s30 + $0x50] sm:$0xff]  ;;  %v6550_v6 = vld [vmem:[%s5928_s30 + $0x40] sm:$0xff] }
 0x4db   : > { %v1446_v59 = vmul.f32 %v6538_v50, %v6060_v7  ;;  %v1200_v7 = vpop.f32.mrf.mxu3 }
 0x4dc   : > { %1384 = vmatpush.msra.mxu2 %v1370_v0  ;;  %1404 = vmatpush.msra.mxu3 %v1371_v8  ;;  %v1444_v0 = vmul.f32 %v6550_v6, %v6072_v13  ;;  %v1269_v9 = vrot.slane %v1200_v7, 7  ;;  %v1168_v13 = vpop.f32.mrf.mxu2  ;;  %v6589_v8 = vld [vmem:[%s8095_s2 + $0x10] sm:$0xff] }
 0x4de   : > { %1385 = vmatpush.msra.mxu2 %v1368_v52  ;;  %1405 = vmatpush.msra.mxu3 %v1369_v15  ;;  %v1270_v16 = vsel %vm494_vm1, %v1168_v13, %v1269_v9 }
 0x4df   : > { %1273 = vst.msk [vmem:[#allocation3 + $0x5] ss:$8 sm:$0x3] %vm6103_vm2, %v1270_v16 }
 0x4e0   : > { %1386 = vmatpush.msra.mxu2 %v1366_v21  ;;  %1406 = vmatpush.msra.mxu3 %v1367_v23 }
 0x4e2   : > { %1387 = vmatpush.msra.mxu2 %v1364_v26  ;;  %1407 = vmatpush.msra.mxu3 %v1365_v20  ;;  %v1353_v26 = vpop.f32.mrf.mxu1 }
 0x4e3   : > { %5115 = vmatmul.msk.f32.vlgmr.msra.gmra.mxu2 %vm352_vm0, %v6050_v63  ;;  %5116 = vmatmul.msk.f32.vlgmr.msra.gmra.mxu3 %vm352_vm0, %v6050_v63  ;;  %v6568_v63 = vld [vmem:[%s8095_s2] sm:$0xff]  ;;  %v1422_v20 = vrot.slane %v1353_v26, 7 }
 0x4e4   : > { %1464 = vmatpush.msrb.mxu2 %v1450_v30  ;;  %1496 = vmatpush.msrb.mxu3 %v1451_v25  ;;  %v1321_v25 = vpop.f32.mrf.mxu0 }
 0x4e6   : > { %1465 = vmatpush.msrb.mxu2 %v1448_v1  ;;  %1497 = vmatpush.msrb.mxu3 %v1449_v57  ;;  %v1423_v1 = vsel %vm494_vm1, %v1321_v25, %v1422_v20 }
 0x4e7   : > { %1426 = vst.msk [vmem:[#allocation3 + $0x6] ss:$8 sm:$0x3] %vm6103_vm2, %v1423_v1 }
 0x4e8   : > { %1466 = vmatpush.msrb.mxu2 %v1446_v59  ;;  %1498 = vmatpush.msrb.mxu3 %v1447_v61 }
 0x4ea   : > { %1467 = vmatpush.msrb.mxu2 %v1444_v0  ;;  %1499 = vmatpush.msrb.mxu3 %v1445_v2 }
 0x4eb   : > { %5133 = vmatmul.msk.f32.vlgmr.msrb.gmra.mxu2 %vm352_vm0, %v6568_v63  ;;  %5138 = vmatmul.msk.f32.vlgmr.msrb.gmra.mxu3 %vm352_vm0, %v6568_v63 }
 0x4f3   : > { %5134 = vmatmul.msk.f32.gmra.mxu2 %vm352_vm0, %v6580_v10  ;;  %5139 = vmatmul.msk.f32.gmra.mxu3 %vm352_vm0, %v6580_v10 }
 0x4fb   : > { %5135 = vmatmul.msk.f32.gmra.mxu2 %vm352_vm0, %v6589_v8  ;;  %5140 = vmatmul.msk.f32.gmra.mxu3 %vm352_vm0, %v6589_v8 }
 0x503   : > { %5136 = vmatmul.msk.f32.gmra.mxu2 %vm352_vm0, %v6598_v36  ;;  %5141 = vmatmul.msk.f32.gmra.mxu3 %vm352_vm0, %v6598_v36 }
 0x50b   : > { %5137 = vmatmul.msk.f32.gmra.mxu2 %vm352_vm0, %v6110_v28  ;;  %5142 = vmatmul.msk.f32.gmra.mxu3 %vm352_vm0, %v6110_v28 }
 0x566   : > { %v1389_v52 = vpop.f32.mrf.mxu2  ;;  %v1409_v12 = vpop.f32.mrf.mxu3 }
 0x567   : > { %v1414_v15 = vrot.slane %v1409_v12, 7 }
 0x569   : > { %v1415_v21 = vsel %vm494_vm1, %v1389_v52, %v1414_v15 }
 0x56a   : > { %1418 = vst.msk [vmem:[#allocation2 + $0x6] ss:$8 sm:$0x3] %vm6103_vm2, %v1415_v21 }
 0x56e   : > { %v1469_v23 = vpop.f32.mrf.mxu2  ;;  %v1501_v30 = vpop.f32.mrf.mxu3 }
 0x56f   : > { %v1516_v26 = vadd.f32 %v1469_v23, %v6032_v48  ;;  %v1517_v25 = vadd.f32 %v1501_v30, %v6032_v48  ;;  %v1603_v23 = vmul.f32 %v6525_v31, %v6135_v62  ;;  %v1600_v30 = vmul.f32 %v6528_v56, %v6138_v4 }
 0x570   : > { %v1598_v62 = vmul.f32 %v6538_v50, %v6148_v18  ;;  %v1599_v4 = vmul.f32 %v6543_v3, %v6153_v22  ;;  %v6669_v18 = vld [vmem:[%s8095_s2 + $0x20] sm:$0xff] }
 0x576   : > { %v1472_v57 = vpop.f32.mrf.mxu2  ;;  %v1504_v28 = vpop.f32.mrf.mxu3 }
 0x577   : > { %v1518_v52 = vadd.f32 %v1472_v57, %v6024_v39  ;;  %v1519_v15 = vadd.f32 %v1504_v28, %v6024_v39  ;;  %v1602_v28 = vmul.f32 %v6522_v19, %v6132_v58  ;;  %v1601_v58 = vmul.f32 %v6533_v32, %v6143_v11 }
 0x578   : > { %v1597_v11 = vmul.f32 %v6557_v54, %v6167_v29 }
 0x57e   : > { %v1475_v59 = vpop.f32.mrf.mxu2  ;;  %v1507_v61 = vpop.f32.mrf.mxu3 }
 0x57f   : > { %v1520_v2 = vadd.f32 %v1475_v59, %v6026_v41  ;;  %v1521_v13 = vadd.f32 %v1507_v61, %v6026_v41  ;;  %v1526_v59 = vmax.f32 %v1518_v52, 0.0  ;;  %v1524_v61 = vmax.f32 %v1516_v26, 0.0 }
 0x580   : > { %v1596_v52 = vmul.f32 %v6550_v6, %v6160_v24 }
 0x581   : > { %v1528_v20 = vmax.f32 %v1520_v2, 0.0  ;;  %v1529_v1 = vmax.f32 %v1521_v13, 0.0  ;;  %v6632_v13 = vld [vmem:[%s8097_s4] sm:$0xff] }
 0x586   : > { %v1478_v0 = vpop.f32.mrf.mxu2  ;;  %v1510_v9 = vpop.f32.mrf.mxu3 }
 0x587   : > { %v1522_v7 = vadd.f32 %v1478_v0, %v6022_v37  ;;  %v1523_v16 = vadd.f32 %v1510_v9, %v6022_v37  ;;  %v1527_v0 = vmax.f32 %v1519_v15, 0.0 }
 0x589   : > { %v1530_v12 = vmax.f32 %v1522_v7, 0.0  ;;  %v1531_v21 = vmax.f32 %v1523_v16, 0.0  ;;  %v1525_v7 = vmax.f32 %v1517_v25, 0.0 }
 0x58b   : > { %1544 = vmatpush.msrb.mxu0 %v1530_v12  ;;  %1564 = vmatpush.msrb.mxu1 %v1531_v21 }
 0x58d   : > { %1545 = vmatpush.msrb.mxu0 %v1528_v20  ;;  %1565 = vmatpush.msrb.mxu1 %v1529_v1 }
 0x58e   : > { %v1513_v9 = vpop.f32.mrf.mxu3  ;;  %v1481_v57 = vpop.f32.mrf.mxu2 }
 0x58f   : > { %1546 = vmatpush.msrb.mxu0 %v1526_v59  ;;  %v1582_v16 = vrot.slane %v1513_v9, 7  ;;  %1566 = vmatpush.msrb.mxu1 %v1527_v0 }
 0x591   : > { %1547 = vmatpush.msrb.mxu0 %v1524_v61  ;;  %v1583_v2 = vsel %vm494_vm1, %v1481_v57, %v1582_v16  ;;  %1567 = vmatpush.msrb.mxu1 %v1525_v7 }
 0x592   : > { %5143 = vmatmul.msk.f32.vlgmr.msrb.gmra.mxu0 %vm352_vm0, %v6632_v13  ;;  %1586 = vst.msk [vmem:[#allocation3 + $0x7] ss:$8 sm:$0x3] %vm6103_vm2, %v1583_v2  ;;  %5144 = vmatmul.msk.f32.vlgmr.msrb.gmra.mxu1 %vm352_vm0, %v6632_v13 }
 0x593   : > { %1616 = vmatpush.msra.mxu0 %v1602_v28  ;;  %1648 = vmatpush.msra.mxu1 %v1603_v23 }
 0x595   : > { %1617 = vmatpush.msra.mxu0 %v1600_v30  ;;  %1649 = vmatpush.msra.mxu1 %v1601_v58 }
 0x597   : > { %1618 = vmatpush.msra.mxu0 %v1598_v62  ;;  %1650 = vmatpush.msra.mxu1 %v1599_v4 }
 0x599   : > { %1619 = vmatpush.msra.mxu0 %v1596_v52  ;;  %1651 = vmatpush.msra.mxu1 %v1597_v11 }
 0x59a   : > { %5153 = vmatmul.msk.f32.vlgmr.msra.gmra.mxu0 %vm352_vm0, %v6568_v63  ;;  %5158 = vmatmul.msk.f32.vlgmr.msra.gmra.mxu1 %vm352_vm0, %v6568_v63 }
 0x5a2   : > { %5154 = vmatmul.msk.f32.gmra.mxu0 %vm352_vm0, %v6580_v10  ;;  %5159 = vmatmul.msk.f32.gmra.mxu1 %vm352_vm0, %v6580_v10 }
 0x5aa   : > { %5155 = vmatmul.msk.f32.gmra.mxu0 %vm352_vm0, %v6589_v8  ;;  %5160 = vmatmul.msk.f32.gmra.mxu1 %vm352_vm0, %v6589_v8 }
 0x5b2   : > { %5156 = vmatmul.msk.f32.gmra.mxu0 %vm352_vm0, %v6598_v36  ;;  %5161 = vmatmul.msk.f32.gmra.mxu1 %vm352_vm0, %v6598_v36 }
 0x5ba   : > { %5157 = vmatmul.msk.f32.gmra.mxu0 %vm352_vm0, %v6669_v18  ;;  %5162 = vmatmul.msk.f32.gmra.mxu1 %vm352_vm0, %v6669_v18 }
 0x60f   : > { %v1549_v22 = vpop.f32.mrf.mxu0  ;;  %v1569_v24 = vpop.f32.mrf.mxu1 }
 0x610   : > { %v1574_v29 = vrot.slane %v1569_v24, 7  ;;  %v1754_v24 = vmul.f32 %v6522_v19, %v6210_v35  ;;  %v1750_v35 = vmul.f32 %v6538_v50, %v6226_v49 }
 0x612   : > { %v1575_v12 = vsel %vm494_vm1, %v1549_v22, %v1574_v29 }
 0x613   : > { %1578 = vst.msk [vmem:[#allocation2 + $0x7] ss:$8 sm:$0x3] %vm6103_vm2, %v1575_v12  ;;  %v1755_v12 = vmul.f32 %v6525_v31, %v6213_v38  ;;  %v1751_v38 = vmul.f32 %v6543_v3, %v6231_v51 }
 0x617   : > { %v1621_v15 = vpop.f32.mrf.mxu0  ;;  %v1653_v21 = vpop.f32.mrf.mxu1 }
 0x618   : > { %v1668_v2 = vadd.f32 %v1621_v15, %v6032_v48  ;;  %v1669_v62 = vadd.f32 %v1653_v21, %v6032_v48  ;;  %v1752_v15 = vmul.f32 %v6528_v56, %v6216_v42  ;;  %v1753_v21 = vmul.f32 %v6533_v32, %v6221_v45 }
 0x619   : > { %v1748_v42 = vmul.f32 %v6550_v6, %v6238_v53 }
 0x61a   : > { %v1676_v22 = vmax.f32 %v1668_v2, 0.0  ;;  %v1677_v29 = vmax.f32 %v1669_v62, 0.0 }
 0x61f   : > { %v1624_v26 = vpop.f32.mrf.mxu0  ;;  %v1656_v20 = vpop.f32.mrf.mxu1 }
 0x620   : > { %v1670_v7 = vadd.f32 %v1624_v26, %v6024_v39  ;;  %v1671_v23 = vadd.f32 %v1656_v20, %v6024_v39  ;;  %v1749_v26 = vmul.f32 %v6557_v54, %v6245_v55 }
 0x622   : > { %v1678_v52 = vmax.f32 %v1670_v7, 0.0  ;;  %v1679_v11 = vmax.f32 %v1671_v23, 0.0 }
 0x627   : > { %v1627_v25 = vpop.f32.mrf.mxu0  ;;  %v1659_v1 = vpop.f32.mrf.mxu1 }
 0x628   : > { %v1672_v0 = vadd.f32 %v1627_v25, %v6026_v41  ;;  %v1673_v57 = vadd.f32 %v1659_v1, %v6026_v41 }
 0x62a   : > { %v1680_v58 = vmax.f32 %v1672_v0, 0.0  ;;  %v1681_v4 = vmax.f32 %v1673_v57, 0.0 }
 0x62f   : > { %v1630_v59 = vpop.f32.mrf.mxu0  ;;  %v1662_v9 = vpop.f32.mrf.mxu1 }
 0x630   : > { %v1674_v61 = vadd.f32 %v1630_v59, %v6022_v37  ;;  %v1675_v28 = vadd.f32 %v1662_v9, %v6022_v37 }
 0x632   : > { %v1682_v16 = vmax.f32 %v1674_v61, 0.0  ;;  %v1683_v30 = vmax.f32 %v1675_v28, 0.0 }
 0x634   : > { %1696 = vmatpush.msra.mxu2 %v1682_v16  ;;  %1716 = vmatpush.msra.mxu3 %v1683_v30 }
 0x636   : > { %1697 = vmatpush.msra.mxu2 %v1680_v58  ;;  %1717 = vmatpush.msra.mxu3 %v1681_v4 }
 0x638   : > { %1698 = vmatpush.msra.mxu2 %v1678_v52  ;;  %1718 = vmatpush.msra.mxu3 %v1679_v11 }
 0x63a   : > { %1699 = vmatpush.msra.mxu2 %v1676_v22  ;;  %1719 = vmatpush.msra.mxu3 %v1677_v29 }
 0x63b   : > { %5163 = vmatmul.msk.f32.vlgmr.msra.gmra.mxu2 %vm352_vm0, %v6632_v13  ;;  %5164 = vmatmul.msk.f32.vlgmr.msra.gmra.mxu3 %vm352_vm0, %v6632_v13 }
 0x63c   : > { %1768 = vmatpush.msrb.mxu2 %v1754_v24  ;;  %1800 = vmatpush.msrb.mxu3 %v1755_v12  ;;  %v1906_v12 = vmul.f32 %v6522_v19, %v6288_v33  ;;  %v8141_v33 = vld [vmem:[#allocation12_spill] sm:$0xff] }
 0x63e   : > { %1769 = vmatpush.msrb.mxu2 %v1752_v15  ;;  %1801 = vmatpush.msrb.mxu3 %v1753_v21  ;;  %v1907_v21 = vmul.f32 %v6525_v31, %v6291_v40  ;;  %v8142_v40 = vld [vmem:[#allocation13_spill] sm:$0xff] }
 0x640   : > { %1770 = vmatpush.msrb.mxu2 %v1750_v35  ;;  %1802 = vmatpush.msrb.mxu3 %v1751_v38  ;;  %v1904_v35 = vmul.f32 %v6528_v56, %v6294_v43  ;;  %v8140_v38 = vld [vmem:[#allocation11_spill] sm:$0xff] }
 0x642   : > { %1771 = vmatpush.msrb.mxu2 %v1748_v42  ;;  %1803 = vmatpush.msrb.mxu3 %v1749_v26  ;;  %v1905_v42 = vmul.f32 %v6533_v32, %v8140_v38  ;;  %v1902_v26 = vmul.f32 %v6538_v50, %v8141_v33 }
 0x643   : > { %5173 = vmatmul.msk.f32.vlgmr.msrb.gmra.mxu2 %vm352_vm0, %v6568_v63  ;;  %5178 = vmatmul.msk.f32.vlgmr.msrb.gmra.mxu3 %vm352_vm0, %v6568_v63 }
 0x64b   : > { %5174 = vmatmul.msk.f32.gmra.mxu2 %vm352_vm0, %v6580_v10  ;;  %5179 = vmatmul.msk.f32.gmra.mxu3 %vm352_vm0, %v6580_v10 }
 0x653   : > { %5175 = vmatmul.msk.f32.gmra.mxu2 %vm352_vm0, %v6589_v8  ;;  %5180 = vmatmul.msk.f32.gmra.mxu3 %vm352_vm0, %v6589_v8 }
 0x65b   : > { %5176 = vmatmul.msk.f32.gmra.mxu2 %vm352_vm0, %v6598_v36  ;;  %5181 = vmatmul.msk.f32.gmra.mxu3 %vm352_vm0, %v6598_v36 }
 0x663   : > { %5177 = vmatmul.msk.f32.gmra.mxu2 %vm352_vm0, %v6669_v18  ;;  %5182 = vmatmul.msk.f32.gmra.mxu3 %vm352_vm0, %v6669_v18 }
 0x6be   : > { %v1701_v45 = vpop.f32.mrf.mxu2  ;;  %v1721_v49 = vpop.f32.mrf.mxu3 }
 0x6bf   : > { %v1726_v51 = vrot.slane %v1721_v49, 7  ;;  %v1903_v49 = vmul.f32 %v6543_v3, %v8142_v40 }
 0x6c1   : > { %v1727_v53 = vsel %vm494_vm1, %v1701_v45, %v1726_v51  ;;  %v1665_v45 = vpop.f32.mrf.mxu1  ;;  %v8143_v51 = vld [vmem:[#allocation14_spill] sm:$0xff] }
 0x6c2   : > { %1730 = vst.msk [vmem:[#allocation2 + $0x10] ss:$8 sm:$0x3] %vm6103_vm2, %v1727_v53  ;;  %v1734_v43 = vrot.slane %v1665_v45, 7  ;;  %v1900_v53 = vmul.f32 %v6550_v6, %v8143_v51  ;;  %v8145_v45 = vld [vmem:[#allocation16_spill] sm:$0xff] }
 0x6c3   : > { %v2058_v40 = vmul.f32 %v6522_v19, %v8145_v45 }
 0x6c6   : > { %v1773_v55 = vpop.f32.mrf.mxu2  ;;  %v1805_v20 = vpop.f32.mrf.mxu3 }
 0x6c7   : > { %v1820_v62 = vadd.f32 %v1773_v55, %v6032_v48  ;;  %v1821_v52 = vadd.f32 %v1805_v20, %v6032_v48  ;;  %v1633_v55 = vpop.f32.mrf.mxu0  ;;  %v8144_v20 = vld [vmem:[#allocation15_spill] sm:$0xff] }
 0x6c9   : > { %v1828_v29 = vmax.f32 %v1820_v62, 0.0  ;;  %v1829_v15 = vmax.f32 %v1821_v52, 0.0 }
 0x6ce   : > { %v1776_v25 = vpop.f32.mrf.mxu2  ;;  %v1808_v1 = vpop.f32.mrf.mxu3 }
 0x6cf   : > { %v1822_v23 = vadd.f32 %v1776_v25, %v6024_v39  ;;  %v1823_v2 = vadd.f32 %v1808_v1, %v6024_v39  ;;  %v1901_v25 = vmul.f32 %v6557_v54, %v8144_v20  ;;  %v1735_v1 = vsel %vm494_vm1, %v1633_v55, %v1734_v43  ;;  %v8146_v43 = vld [vmem:[#allocation17_spill] sm:$0xff]  ;;  %v8148_v20 = vld [vmem:[#allocation19_spill] sm:$0xff] }
 0x6d0   : > { %1738 = vst.msk [vmem:[#allocation3 + $0x10] ss:$8 sm:$0x3] %vm6103_vm2, %v1735_v1  ;;  %v2059_v51 = vmul.f32 %v6525_v31, %v8146_v43  ;;  %v8149_v1 = vld [vmem:[#allocation20_spill] sm:$0xff] }
 0x6d1   : > { %v1830_v22 = vmax.f32 %v1822_v23, 0.0  ;;  %v1831_v24 = vmax.f32 %v1823_v2, 0.0 }
 0x6d6   : > { %v1779_v59 = vpop.f32.mrf.mxu2  ;;  %v1811_v0 = vpop.f32.mrf.mxu3 }
 0x6d7   : > { %v1824_v9 = vadd.f32 %v1779_v59, %v6026_v41  ;;  %v1825_v7 = vadd.f32 %v1811_v0, %v6026_v41 }
 0x6d9   : > { %v1832_v4 = vmax.f32 %v1824_v9, 0.0  ;;  %v1833_v11 = vmax.f32 %v1825_v7, 0.0 }
 0x6de   : > { %v1782_v61 = vpop.f32.mrf.mxu2  ;;  %v1814_v28 = vpop.f32.mrf.mxu3 }
 0x6df   : > { %v1826_v57 = vadd.f32 %v1782_v61, %v6022_v37  ;;  %v1827_v16 = vadd.f32 %v1814_v28, %v6022_v37 }
 0x6e1   : > { %v1834_v30 = vmax.f32 %v1826_v57, 0.0  ;;  %v1835_v58 = vmax.f32 %v1827_v16, 0.0 }
 0x6e3   : > { %1848 = vmatpush.msrb.mxu0 %v1834_v30  ;;  %1868 = vmatpush.msrb.mxu1 %v1835_v58 }
 0x6e5   : > { %1849 = vmatpush.msrb.mxu0 %v1832_v4  ;;  %1869 = vmatpush.msrb.mxu1 %v1833_v11 }
 0x6e7   : > { %1850 = vmatpush.msrb.mxu0 %v1830_v22  ;;  %1870 = vmatpush.msrb.mxu1 %v1831_v24 }
 0x6e9   : > { %1851 = vmatpush.msrb.mxu0 %v1828_v29  ;;  %1871 = vmatpush.msrb.mxu1 %v1829_v15 }
 0x6ea   : > { %5183 = vmatmul.msk.f32.vlgmr.msrb.gmra.mxu0 %vm352_vm0, %v6632_v13  ;;  %5184 = vmatmul.msk.f32.vlgmr.msrb.gmra.mxu1 %vm352_vm0, %v6632_v13 }
 0x6eb   : > { %1920 = vmatpush.msra.mxu0 %v1906_v12  ;;  %1952 = vmatpush.msra.mxu1 %v1907_v21 }
 0x6ed   : > { %1921 = vmatpush.msra.mxu0 %v1904_v35  ;;  %1953 = vmatpush.msra.mxu1 %v1905_v42 }
 0x6ef   : > { %1922 = vmatpush.msra.mxu0 %v1902_v26  ;;  %1954 = vmatpush.msra.mxu1 %v1903_v49 }
 0x6f1   : > { %1923 = vmatpush.msra.mxu0 %v1900_v53  ;;  %1955 = vmatpush.msra.mxu1 %v1901_v25  ;;  %v8147_v53 = vld [vmem:[#allocation18_spill] sm:$0xff]  ;;  %v2057_v25 = vmul.f32 %v6533_v32, %v8148_v20 }
 0x6f2   : > { %5193 = vmatmul.msk.f32.vlgmr.msra.gmra.mxu0 %vm352_vm0, %v6568_v63  ;;  %5198 = vmatmul.msk.f32.vlgmr.msra.gmra.mxu1 %vm352_vm0, %v6568_v63  ;;  %v2056_v55 = vmul.f32 %v6528_v56, %v8147_v53 }
 0x6fa   : > { %5194 = vmatmul.msk.f32.gmra.mxu0 %vm352_vm0, %v6580_v10  ;;  %5199 = vmatmul.msk.f32.gmra.mxu1 %vm352_vm0, %v6580_v10 }
 0x702   : > { %5195 = vmatmul.msk.f32.gmra.mxu0 %vm352_vm0, %v6589_v8  ;;  %5200 = vmatmul.msk.f32.gmra.mxu1 %vm352_vm0, %v6589_v8 }
 0x70a   : > { %5196 = vmatmul.msk.f32.gmra.mxu0 %vm352_vm0, %v6598_v36  ;;  %5201 = vmatmul.msk.f32.gmra.mxu1 %vm352_vm0, %v6598_v36 }
 0x712   : > { %5197 = vmatmul.msk.f32.gmra.mxu0 %vm352_vm0, %v6669_v18  ;;  %5202 = vmatmul.msk.f32.gmra.mxu1 %vm352_vm0, %v6669_v18 }
 0x767   : > { %v1853_v59 = vpop.f32.mrf.mxu0  ;;  %v1873_v0 = vpop.f32.mrf.mxu1 }
 0x768   : > { %v1878_v61 = vrot.slane %v1873_v0, 7  ;;  %v1817_v0 = vpop.f32.mrf.mxu3 }
 0x76a   : > { %v1879_v9 = vsel %vm494_vm1, %v1853_v59, %v1878_v61  ;;  %v2054_v59 = vmul.f32 %v6538_v50, %v8149_v1  ;;  %v8150_v61 = vld [vmem:[#allocation21_spill] sm:$0xff] }
 0x76b   : > { %1882 = vst.msk [vmem:[#allocation2 + $0x11] ss:$8 sm:$0x3] %vm6103_vm2, %v1879_v9  ;;  %v2055_v9 = vmul.f32 %v6543_v3, %v8150_v61 }
 0x76f   : > { %v1925_v57 = vpop.f32.mrf.mxu0  ;;  %v1957_v28 = vpop.f32.mrf.mxu1 }
 0x770   : > { %v1972_v15 = vadd.f32 %v1925_v57, %v6032_v48  ;;  %v1973_v35 = vadd.f32 %v1957_v28, %v6032_v48  ;;  %v1886_v57 = vrot.slane %v1817_v0, 7  ;;  %v8151_v28 = vld [vmem:[#allocation22_spill] sm:$0xff]  ;;  %v2210_v0 = vmul.f32 %v6522_v19, %v6444_v60 }
 0x771   : > { %v2206_v60 = vmul.f32 %v6538_v50, %v6460_v47 }
 0x772   : > { %v1980_v26 = vmax.f32 %v1972_v15, 0.0  ;;  %v1981_v49 = vmax.f32 %v1973_v35, 0.0 }
 0x777   : > { %v1928_v7 = vpop.f32.mrf.mxu0  ;;  %v1960_v16 = vpop.f32.mrf.mxu1 }
 0x778   : > { %v1974_v22 = vadd.f32 %v1928_v7, %v6024_v39  ;;  %v1975_v29 = vadd.f32 %v1960_v16, %v6024_v39  ;;  %v2052_v7 = vmul.f32 %v6550_v6, %v8151_v28  ;;  %v1785_v16 = vpop.f32.mrf.mxu2  ;;  %v2209_v28 = vmul.f32 %v6533_v32, %v6455_v44 }
 0x779   : > { %v2205_v44 = vmul.f32 %v6557_v54, %v6479_v5 }
 0x77a   : > { %v1982_v42 = vmax.f32 %v1974_v22, 0.0  ;;  %v1983_v33 = vmax.f32 %v1975_v29, 0.0 }
 0x77f   : > { %v1931_v23 = vpop.f32.mrf.mxu0  ;;  %v1963_v30 = vpop.f32.mrf.mxu1 }
 0x780   : > { %v1976_v58 = vadd.f32 %v1931_v23, %v6026_v41  ;;  %v1977_v52 = vadd.f32 %v1963_v30, %v6026_v41  ;;  %v8152_v23 = vld [vmem:[#allocation23_spill] sm:$0xff] }
 0x781   : > { %v2053_v30 = vmul.f32 %v6557_v54, %v8152_v23 }
 0x782   : > { %v1984_v21 = vmax.f32 %v1976_v58, 0.0  ;;  %v1985_v38 = vmax.f32 %v1977_v52, 0.0 }
 0x787   : > { %v1934_v2 = vpop.f32.mrf.mxu0  ;;  %v1966_v4 = vpop.f32.mrf.mxu1 }
 0x788   : > { %v1978_v62 = vadd.f32 %v1934_v2, %v6022_v37  ;;  %v1979_v11 = vadd.f32 %v1966_v4, %v6022_v37  ;;  %v1887_v2 = vsel %vm494_vm1, %v1785_v16, %v1886_v57  ;;  %v2208_v57 = vmul.f32 %v6528_v56, %v6450_v34 }
 0x789   : > { %1890 = vst.msk [vmem:[#allocation3 + $0x11] ss:$8 sm:$0x3] %vm6103_vm2, %v1887_v2 }
 0x78a   : > { %v1986_v24 = vmax.f32 %v1978_v62, 0.0  ;;  %v1987_v12 = vmax.f32 %v1979_v11, 0.0 }
 0x78c   : > { %2000 = vmatpush.msra.mxu2 %v1986_v24  ;;  %2020 = vmatpush.msra.mxu3 %v1987_v12 }
 0x78e   : > { %2001 = vmatpush.msra.mxu2 %v1984_v21  ;;  %2021 = vmatpush.msra.mxu3 %v1985_v38 }
 0x78f   : > { %v1969_v19 = vpop.f32.mrf.mxu1  ;;  %v1937_v56 = vpop.f32.mrf.mxu0 }
 0x790   : > { %2002 = vmatpush.msra.mxu2 %v1982_v42  ;;  %2022 = vmatpush.msra.mxu3 %v1983_v33  ;;  %v2038_v34 = vrot.slane %v1969_v19, 7 }
 0x792   : > { %2003 = vmatpush.msra.mxu2 %v1980_v26  ;;  %2023 = vmatpush.msra.mxu3 %v1981_v49  ;;  %v2039_v32 = vsel %vm494_vm1, %v1937_v56, %v2038_v34  ;;  %v6959_v34 = vld [vmem:[%s5928_s30 + $0xc8] sm:$0xff] }
 0x793   : > { %5203 = vmatmul.msk.f32.vlgmr.msra.gmra.mxu2 %vm352_vm0, %v6632_v13  ;;  %5204 = vmatmul.msk.f32.vlgmr.msra.gmra.mxu3 %vm352_vm0, %v6632_v13  ;;  %2042 = vst.msk [vmem:[#allocation3 + $0x12] ss:$8 sm:$0x3] %vm6103_vm2, %v2039_v32 }
 0x794   : > { %2072 = vmatpush.msrb.mxu2 %v2058_v40  ;;  %2104 = vmatpush.msrb.mxu3 %v2059_v51 }
 0x796   : > { %2073 = vmatpush.msrb.mxu2 %v2056_v55  ;;  %2105 = vmatpush.msrb.mxu3 %v2057_v25 }
 0x798   : > { %2074 = vmatpush.msrb.mxu2 %v2054_v59  ;;  %2106 = vmatpush.msrb.mxu3 %v2055_v9  ;;  %v2211_v9 = vmul.f32 %v6525_v31, %v6447_v14  ;;  %v2207_v14 = vmul.f32 %v6543_v3, %v6465_v46  ;;  %v2204_v31 = vmul.f32 %v6550_v6, %v6472_v17 }
 0x79a   : > { %2075 = vmatpush.msrb.mxu2 %v2052_v7  ;;  %2107 = vmatpush.msrb.mxu3 %v2053_v30 }
 0x79b   : > { %5213 = vmatmul.msk.f32.vlgmr.msrb.gmra.mxu2 %vm352_vm0, %v6568_v63  ;;  %5218 = vmatmul.msk.f32.vlgmr.msrb.gmra.mxu3 %vm352_vm0, %v6568_v63 }
 0x7a3   : > { %5214 = vmatmul.msk.f32.gmra.mxu2 %vm352_vm0, %v6580_v10  ;;  %5219 = vmatmul.msk.f32.gmra.mxu3 %vm352_vm0, %v6580_v10 }
 0x7ab   : > { %5215 = vmatmul.msk.f32.gmra.mxu2 %vm352_vm0, %v6589_v8  ;;  %5220 = vmatmul.msk.f32.gmra.mxu3 %vm352_vm0, %v6589_v8 }
 0x7b3   : > { %5216 = vmatmul.msk.f32.gmra.mxu2 %vm352_vm0, %v6598_v36  ;;  %5221 = vmatmul.msk.f32.gmra.mxu3 %vm352_vm0, %v6598_v36 }
 0x7bb   : > { %5217 = vmatmul.msk.f32.gmra.mxu2 %vm352_vm0, %v6669_v18  ;;  %5222 = vmatmul.msk.f32.gmra.mxu3 %vm352_vm0, %v6669_v18 }
 0x816   : > { %v2005_v58 = vpop.f32.mrf.mxu2  ;;  %v2025_v62 = vpop.f32.mrf.mxu3 }
 0x817   : > { %v2030_v4 = vrot.slane %v2025_v62, 7 }
 0x819   : > { %v2031_v52 = vsel %vm494_vm1, %v2005_v58, %v2030_v4 }
 0x81a   : > { %2034 = vst.msk [vmem:[#allocation2 + $0x12] ss:$8 sm:$0x3] %vm6103_vm2, %v2031_v52 }
 0x81e   : > { %v2077_v11 = vpop.f32.mrf.mxu2  ;;  %v2109_v22 = vpop.f32.mrf.mxu3 }
 0x81f   : > { %v2124_v51 = vadd.f32 %v2077_v11, %v6032_v48  ;;  %v2125_v55 = vadd.f32 %v2109_v22, %v6032_v48 }
 0x821   : > { %v2132_v59 = vmax.f32 %v2124_v51, 0.0  ;;  %v2133_v61 = vmax.f32 %v2125_v55, 0.0  ;;  %v6923_v55 = vld [vmem:[%s5928_s30 + $0xe8] sm:$0xff] }
 0x826   : > { %v2080_v24 = vpop.f32.mrf.mxu2  ;;  %v2112_v29 = vpop.f32.mrf.mxu3 }
 0x827   : > { %v2126_v45 = vadd.f32 %v2080_v24, %v6024_v39  ;;  %v2127_v49 = vadd.f32 %v2112_v29, %v6024_v39 }
 0x829   : > { %v2134_v25 = vmax.f32 %v2126_v45, 0.0  ;;  %v2135_v1 = vmax.f32 %v2127_v49, 0.0  ;;  %v6915_v49 = vld [vmem:[%s5928_s30 + $0xe0] sm:$0xff] }
 0x82e   : > { %v2083_v12 = vpop.f32.mrf.mxu2  ;;  %v2115_v15 = vpop.f32.mrf.mxu3 }
 0x82f   : > { %v2128_v35 = vadd.f32 %v2083_v12, %v6026_v41  ;;  %v2129_v33 = vadd.f32 %v2115_v15, %v6026_v41 }
 0x831   : > { %v2136_v53 = vmax.f32 %v2128_v35, 0.0  ;;  %v2137_v20 = vmax.f32 %v2129_v33, 0.0  ;;  %v6900_v35 = vld [vmem:[%s5928_s30 + $0xb0] sm:$0xff]  ;;  %v6906_v33 = vld [vmem:[%s5928_s30 + $0xb8] sm:$0xff] }
 0x836   : > { %v2086_v21 = vpop.f32.mrf.mxu2  ;;  %v2118_v42 = vpop.f32.mrf.mxu3 }
 0x837   : > { %v2130_v38 = vadd.f32 %v2086_v21, %v6022_v37  ;;  %v2131_v26 = vadd.f32 %v2118_v42, %v6022_v37 }
 0x839   : > { %v2138_v40 = vmax.f32 %v2130_v38, 0.0  ;;  %v2139_v43 = vmax.f32 %v2131_v26, 0.0  ;;  %v6903_v38 = vld [vmem:[%s5928_s30 + $0xf0] sm:$0xff]  ;;  %v6909_v26 = vld [vmem:[%s5928_s30 + $0xf8] sm:$0xff] }
 0x83a   : > { %v2370_v51 = vmul.f32 %v6903_v38, %v6900_v35 }
 0x83b   : > { %2152 = vmatpush.msrb.mxu0 %v2138_v40  ;;  %2172 = vmatpush.msrb.mxu1 %v2139_v43  ;;  %v6912_v40 = vld [vmem:[%s5928_s30 + $0xa0] sm:$0xff] }
 0x83d   : > { %2153 = vmatpush.msrb.mxu0 %v2136_v53  ;;  %2173 = vmatpush.msrb.mxu1 %v2137_v20  ;;  %v6920_v53 = vld [vmem:[%s5928_s30 + $0xa8] sm:$0xff] }
 0x83f   : > { %2154 = vmatpush.msrb.mxu0 %v2134_v25  ;;  %2174 = vmatpush.msrb.mxu1 %v2135_v1  ;;  %v2371_v25 = vmul.f32 %v6909_v26, %v6906_v33  ;;  %v6928_v1 = vld [vmem:[%s5928_s30 + $0x90] sm:$0xff] }
 0x841   : > { %2155 = vmatpush.msrb.mxu0 %v2132_v59  ;;  %2175 = vmatpush.msrb.mxu1 %v2133_v61  ;;  %v6931_v59 = vld [vmem:[%s5928_s30 + $0xd0] sm:$0xff]  ;;  %v6936_v61 = vld [vmem:[%s5928_s30 + $0x98] sm:$0xff] }
 0x842   : > { %5223 = vmatmul.msk.f32.vlgmr.msrb.gmra.mxu0 %vm352_vm0, %v6632_v13  ;;  %5224 = vmatmul.msk.f32.vlgmr.msrb.gmra.mxu1 %vm352_vm0, %v6632_v13  ;;  %v2366_v19 = vmul.f32 %v6931_v59, %v6928_v1 }
 0x843   : > { %2224 = vmatpush.msra.mxu0 %v2210_v0  ;;  %2256 = vmatpush.msra.mxu1 %v2211_v9  ;;  %v2368_v0 = vmul.f32 %v6915_v49, %v6912_v40  ;;  %v6939_v9 = vld [vmem:[%s5928_s30 + $0xd8] sm:$0xff] }
 0x844   : > { %v2367_v56 = vmul.f32 %v6939_v9, %v6936_v61 }
 0x845   : > { %2225 = vmatpush.msra.mxu0 %v2208_v57  ;;  %2257 = vmatpush.msra.mxu1 %v2209_v28  ;;  %v2369_v57 = vmul.f32 %v6923_v55, %v6920_v53  ;;  %v6946_v28 = vld [vmem:[%s5928_s30 + $0x80] sm:$0xff] }
 0x847   : > { %2226 = vmatpush.msra.mxu0 %v2206_v60  ;;  %2258 = vmatpush.msra.mxu1 %v2207_v14  ;;  %v6949_v60 = vld [vmem:[%s5928_s30 + $0xc0] sm:$0xff]  ;;  %v6956_v14 = vld [vmem:[%s5928_s30 + $0x88] sm:$0xff] }
 0x848   : > { %v2364_v32 = vmul.f32 %v6949_v60, %v6946_v28 }
 0x849   : > { %2227 = vmatpush.msra.mxu0 %v2204_v31  ;;  %2259 = vmatpush.msra.mxu1 %v2205_v44  ;;  %v2121_v31 = vpop.f32.mrf.mxu3 }
 0x84a   : > { %5233 = vmatmul.msk.f32.vlgmr.msra.gmra.mxu0 %vm352_vm0, %v6568_v63  ;;  %5238 = vmatmul.msk.f32.vlgmr.msra.gmra.mxu1 %vm352_vm0, %v6568_v63  ;;  %v2190_v44 = vrot.slane %v2121_v31, 7  ;;  %v7018_v31 = vld [vmem:[%s5928_s30 + $0x110] sm:$0xff] }
 0x852   : > { %5234 = vmatmul.msk.f32.gmra.mxu0 %vm352_vm0, %v6580_v10  ;;  %5239 = vmatmul.msk.f32.gmra.mxu1 %vm352_vm0, %v6580_v10 }
 0x85a   : > { %5235 = vmatmul.msk.f32.gmra.mxu0 %vm352_vm0, %v6589_v8  ;;  %5240 = vmatmul.msk.f32.gmra.mxu1 %vm352_vm0, %v6589_v8 }
 0x862   : > { %5236 = vmatmul.msk.f32.gmra.mxu0 %vm352_vm0, %v6598_v36  ;;  %5241 = vmatmul.msk.f32.gmra.mxu1 %vm352_vm0, %v6598_v36 }
 0x86a   : > { %5237 = vmatmul.msk.f32.gmra.mxu0 %vm352_vm0, %v6669_v18  ;;  %5242 = vmatmul.msk.f32.gmra.mxu1 %vm352_vm0, %v6669_v18 }
 0x8bf   : > { %v2157_v47 = vpop.f32.mrf.mxu0  ;;  %v2177_v46 = vpop.f32.mrf.mxu1 }
 0x8c0   : > { %v2182_v17 = vrot.slane %v2177_v46, 7  ;;  %v2365_v46 = vmul.f32 %v6959_v34, %v6956_v14 }
 0x8c2   : > { %v2183_v5 = vsel %vm494_vm1, %v2157_v47, %v2182_v17  ;;  %v2089_v47 = vpop.f32.mrf.mxu2 }
 0x8c3   : > { %2186 = vst.msk [vmem:[#allocation2 + $0x13] ss:$8 sm:$0x3] %vm6103_vm2, %v2183_v5  ;;  %v2191_v17 = vsel %vm494_vm1, %v2089_v47, %v2190_v44  ;;  %v7023_v44 = vld [vmem:[%s5928_s30 + $0x118] sm:$0xff]  ;;  %v7030_v47 = vld [vmem:[%s5928_s30 + $0x100] sm:$0xff] }
 0x8c4   : > { %2194 = vst.msk [vmem:[#allocation3 + $0x13] ss:$8 sm:$0x3] %vm6103_vm2, %v2191_v17  ;;  %v7037_v17 = vld [vmem:[%s5928_s30 + $0x108] sm:$0xff] }
 0x8c7   : > { %v2229_v50 = vpop.f32.mrf.mxu0  ;;  %v2261_v3 = vpop.f32.mrf.mxu1 }
 0x8c8   : > { %v2276_v29 = vadd.f32 %v2229_v50, %v6032_v48  ;;  %v2277_v15 = vadd.f32 %v2261_v3, %v6032_v48 }
 0x8ca   : > { %v2284_v43 = vmax.f32 %v2276_v29, 0.0  ;;  %v2285_v20 = vmax.f32 %v2277_v15, 0.0 }
 0x8cf   : > { %v2232_v6 = vpop.f32.mrf.mxu0  ;;  %v2264_v54 = vpop.f32.mrf.mxu1 }
 0x8d0   : > { %v2278_v52 = vadd.f32 %v2232_v6, %v6024_v39  ;;  %v2279_v22 = vadd.f32 %v2264_v54, %v6024_v39 }
 0x8d2   : > { %v2286_v42 = vmax.f32 %v2278_v52, 0.0  ;;  %v2287_v45 = vmax.f32 %v2279_v22, 0.0 }
 0x8d7   : > { %v2235_v7 = vpop.f32.mrf.mxu0  ;;  %v2267_v16 = vpop.f32.mrf.mxu1 }
 0x8d8   : > { %v2280_v30 = vadd.f32 %v2235_v7, %v6026_v41  ;;  %v2281_v62 = vadd.f32 %v2267_v16, %v6026_v41 }
 0x8da   : > { %v2288_v12 = vmax.f32 %v2280_v30, 0.0  ;;  %v2289_v21 = vmax.f32 %v2281_v62, 0.0 }
 0x8df   : > { %v2238_v23 = vpop.f32.mrf.mxu0  ;;  %v2270_v58 = vpop.f32.mrf.mxu1 }
 0x8e0   : > { %v2282_v2 = vadd.f32 %v2238_v23, %v6022_v37  ;;  %v2283_v4 = vadd.f32 %v2270_v58, %v6022_v37 }
 0x8e2   : > { %v2290_v11 = vmax.f32 %v2282_v2, 0.0  ;;  %v2291_v24 = vmax.f32 %v2283_v4, 0.0 }
 0x8e4   : > { %2304 = vmatpush.msra.mxu2 %v2290_v11  ;;  %2324 = vmatpush.msra.mxu3 %v2291_v24 }
 0x8e6   : > { %2305 = vmatpush.msra.mxu2 %v2288_v12  ;;  %2325 = vmatpush.msra.mxu3 %v2289_v21  ;;  %v7002_v21 = vld [vmem:[%s5928_s30 + $0x130] sm:$0xff] }
 0x8e8   : > { %2306 = vmatpush.msra.mxu2 %v2286_v42  ;;  %2326 = vmatpush.msra.mxu3 %v2287_v45  ;;  %v7005_v45 = vld [vmem:[%s5928_s30 + $0x138] sm:$0xff] }
 0x8ea   : > { %2307 = vmatpush.msra.mxu2 %v2284_v43  ;;  %2327 = vmatpush.msra.mxu3 %v2285_v20 }
 0x8eb   : > { %5243 = vmatmul.msk.f32.vlgmr.msra.gmra.mxu2 %vm352_vm0, %v6632_v13  ;;  %5244 = vmatmul.msk.f32.vlgmr.msra.gmra.mxu3 %vm352_vm0, %v6632_v13 }
 0x8ec   : > { %2384 = vmatpush.msrb.mxu2 %v2370_v51  ;;  %2416 = vmatpush.msrb.mxu3 %v2371_v25  ;;  %v7008_v51 = vld [vmem:[%s5928_s30 + $0x120] sm:$0xff]  ;;  %v2522_v25 = vmul.f32 %v7002_v21, %v6900_v35 }
 0x8ee   : > { %2385 = vmatpush.msrb.mxu2 %v2368_v0  ;;  %2417 = vmatpush.msrb.mxu3 %v2369_v57  ;;  %v7013_v0 = vld [vmem:[%s5928_s30 + $0x128] sm:$0xff] }
 0x8f0   : > { %2386 = vmatpush.msrb.mxu2 %v2366_v19  ;;  %2418 = vmatpush.msrb.mxu3 %v2367_v56  ;;  %v2523_v19 = vmul.f32 %v7005_v45, %v6906_v33  ;;  %v2520_v56 = vmul.f32 %v7008_v51, %v6912_v40 }
 0x8f2   : > { %2387 = vmatpush.msrb.mxu2 %v2364_v32  ;;  %2419 = vmatpush.msrb.mxu3 %v2365_v46  ;;  %v2521_v32 = vmul.f32 %v7013_v0, %v6920_v53  ;;  %v2518_v46 = vmul.f32 %v7018_v31, %v6928_v1 }
 0x8f3   : > { %5261 = vmatmul.msk.f32.vlgmr.msrb.gmra.mxu2 %vm352_vm0, %v6568_v63  ;;  %5266 = vmatmul.msk.f32.vlgmr.msrb.gmra.mxu3 %vm352_vm0, %v6568_v63 }
 0x8fb   : > { %5262 = vmatmul.msk.f32.gmra.mxu2 %vm352_vm0, %v6580_v10  ;;  %5267 = vmatmul.msk.f32.gmra.mxu3 %vm352_vm0, %v6580_v10 }
 0x903   : > { %5263 = vmatmul.msk.f32.gmra.mxu2 %vm352_vm0, %v6589_v8  ;;  %5268 = vmatmul.msk.f32.gmra.mxu3 %vm352_vm0, %v6589_v8 }
 0x90b   : > { %5264 = vmatmul.msk.f32.gmra.mxu2 %vm352_vm0, %v6598_v36  ;;  %5269 = vmatmul.msk.f32.gmra.mxu3 %vm352_vm0, %v6598_v36 }
 0x913   : > { %5265 = vmatmul.msk.f32.gmra.mxu2 %vm352_vm0, %v6669_v18  ;;  %5270 = vmatmul.msk.f32.gmra.mxu3 %vm352_vm0, %v6669_v18 }
 0x96e   : > { %v2309_v63 = vpop.f32.mrf.mxu2  ;;  %v2329_v10 = vpop.f32.mrf.mxu3 }
 0x96f   : > { %v2334_v5 = vrot.slane %v2329_v10, 7  ;;  %v2519_v10 = vmul.f32 %v7023_v44, %v6936_v61 }
 0x971   : > { %v2335_v50 = vsel %vm494_vm1, %v2309_v63, %v2334_v5  ;;  %v2273_v63 = vpop.f32.mrf.mxu1 }
 0x972   : > { %2338 = vst.msk [vmem:[#allocation2 + $0x14] ss:$8 sm:$0x3] %vm6103_vm2, %v2335_v50  ;;  %v2342_v5 = vrot.slane %v2273_v63, 7  ;;  %v2516_v50 = vmul.f32 %v7030_v47, %v6946_v28 }
 0x976   : > { %v2389_v8 = vpop.f32.mrf.mxu2  ;;  %v2421_v3 = vpop.f32.mrf.mxu3 }
 0x977   : > { %v2436_v24 = vadd.f32 %v2389_v8, %v6032_v48  ;;  %v2437_v12 = vadd.f32 %v2421_v3, %v6032_v48  ;;  %v2241_v8 = vpop.f32.mrf.mxu0  ;;  %v2517_v3 = vmul.f32 %v7037_v17, %v6956_v14 }
 0x979   : > { %v2444_v20 = vmax.f32 %v2436_v24, 0.0  ;;  %v2445_v57 = vmax.f32 %v2437_v12, 0.0 }
 0x97e   : > { %v2392_v6 = vpop.f32.mrf.mxu2  ;;  %v2424_v54 = vpop.f32.mrf.mxu3 }
 0x97f   : > { %v2438_v4 = vadd.f32 %v2392_v6, %v6024_v39  ;;  %v2439_v11 = vadd.f32 %v2424_v54, %v6024_v39  ;;  %v2343_v6 = vsel %vm494_vm1, %v2241_v8, %v2342_v5  ;;  %v7051_v54 = vld [vmem:[%s8095_s2] sm:$0xff] }
 0x980   : > { %2346 = vst.msk [vmem:[#allocation3 + $0x14] ss:$8 sm:$0x3] %vm6103_vm2, %v2343_v6 }
 0x981   : > { %v2446_v42 = vmax.f32 %v2438_v4, 0.0  ;;  %v2447_v43 = vmax.f32 %v2439_v11, 0.0 }
 0x986   : > { %v2395_v7 = vpop.f32.mrf.mxu2  ;;  %v2427_v36 = vpop.f32.mrf.mxu3 }
 0x987   : > { %v2440_v23 = vadd.f32 %v2395_v7, %v6026_v41  ;;  %v2441_v58 = vadd.f32 %v2427_v36, %v6026_v41  ;;  %v7060_v7 = vld [vmem:[%s8095_s2 + $0x8] sm:$0xff]  ;;  %v7069_v36 = vld [vmem:[%s8095_s2 + $0x10] sm:$0xff] }
 0x989   : > { %v2448_v29 = vmax.f32 %v2440_v23, 0.0  ;;  %v2449_v15 = vmax.f32 %v2441_v58, 0.0 }
 0x98e   : > { %v2398_v16 = vpop.f32.mrf.mxu2  ;;  %v2430_v2 = vpop.f32.mrf.mxu3 }
 0x98f   : > { %v2442_v30 = vadd.f32 %v2398_v16, %v6022_v37  ;;  %v2443_v62 = vadd.f32 %v2430_v2, %v6022_v37  ;;  %v7078_v16 = vld [vmem:[%s8095_s2 + $0x18] sm:$0xff] }
 0x991   : > { %v2450_v52 = vmax.f32 %v2442_v30, 0.0  ;;  %v2451_v22 = vmax.f32 %v2443_v62, 0.0 }
 0x993   : > { %2464 = vmatpush.msrb.mxu0 %v2450_v52  ;;  %2484 = vmatpush.msrb.mxu1 %v2451_v22 }
 0x995   : > { %2465 = vmatpush.msrb.mxu0 %v2448_v29  ;;  %2485 = vmatpush.msrb.mxu1 %v2449_v15 }
 0x997   : > { %2466 = vmatpush.msrb.mxu0 %v2446_v42  ;;  %2486 = vmatpush.msrb.mxu1 %v2447_v43 }
 0x999   : > { %2467 = vmatpush.msrb.mxu0 %v2444_v20  ;;  %2487 = vmatpush.msrb.mxu1 %v2445_v57 }
 0x99a   : > { %5271 = vmatmul.msk.f32.vlgmr.msrb.gmra.mxu0 %vm352_vm0, %v6632_v13  ;;  %5272 = vmatmul.msk.f32.vlgmr.msrb.gmra.mxu1 %vm352_vm0, %v6632_v13 }
 0x99b   : > { %2536 = vmatpush.msra.mxu0 %v2522_v25  ;;  %2568 = vmatpush.msra.mxu1 %v2523_v19 }
 0x99d   : > { %2537 = vmatpush.msra.mxu0 %v2520_v56  ;;  %2569 = vmatpush.msra.mxu1 %v2521_v32 }
 0x99f   : > { %2538 = vmatpush.msra.mxu0 %v2518_v46  ;;  %2570 = vmatpush.msra.mxu1 %v2519_v10  ;;  %v7100_v10 = vld [vmem:[%s5928_s30 + $0x170] sm:$0xff] }
 0x9a1   : > { %2539 = vmatpush.msra.mxu0 %v2516_v50  ;;  %2571 = vmatpush.msra.mxu1 %v2517_v3  ;;  %v7103_v50 = vld [vmem:[%s5928_s30 + $0x178] sm:$0xff]  ;;  %v7106_v3 = vld [vmem:[%s5928_s30 + $0x160] sm:$0xff] }
 0x9a2   : > { %5281 = vmatmul.msk.f32.vlgmr.msra.gmra.mxu0 %vm352_vm0, %v7051_v54  ;;  %5286 = vmatmul.msk.f32.vlgmr.msra.gmra.mxu1 %vm352_vm0, %v7051_v54 }
 0x9aa   : > { %5282 = vmatmul.msk.f32.gmra.mxu0 %vm352_vm0, %v7060_v7  ;;  %5287 = vmatmul.msk.f32.gmra.mxu1 %vm352_vm0, %v7060_v7 }
 0x9b2   : > { %5283 = vmatmul.msk.f32.gmra.mxu0 %vm352_vm0, %v7069_v36  ;;  %5288 = vmatmul.msk.f32.gmra.mxu1 %vm352_vm0, %v7069_v36 }
 0x9ba   : > { %5284 = vmatmul.msk.f32.gmra.mxu0 %vm352_vm0, %v7078_v16  ;;  %5289 = vmatmul.msk.f32.gmra.mxu1 %vm352_vm0, %v7078_v16 }
 0x9c2   : > { %5285 = vmatmul.msk.f32.gmra.mxu0 %vm352_vm0, %v6669_v18  ;;  %5290 = vmatmul.msk.f32.gmra.mxu1 %vm352_vm0, %v6669_v18 }
 0xa17   : > { %v2469_v23 = vpop.f32.mrf.mxu0  ;;  %v2489_v30 = vpop.f32.mrf.mxu1 }
 0xa18   : > { %v2494_v2 = vrot.slane %v2489_v30, 7  ;;  %v7111_v30 = vld [vmem:[%s5928_s30 + $0x168] sm:$0xff] }
 0xa1a   : > { %v2495_v58 = vsel %vm494_vm1, %v2469_v23, %v2494_v2  ;;  %v2674_v23 = vmul.f32 %v7100_v10, %v6900_v35 }
 0xa1b   : > { %2498 = vst.msk [vmem:[#allocation2 + $0x15] ss:$8 sm:$0x3] %vm6103_vm2, %v2495_v58  ;;  %v2675_v58 = vmul.f32 %v7103_v50, %v6906_v33 }
 0xa1f   : > { %v2541_v62 = vpop.f32.mrf.mxu0  ;;  %v2573_v4 = vpop.f32.mrf.mxu1 }
 0xa20   : > { %v2588_v56 = vadd.f32 %v2541_v62, %v6032_v48  ;;  %v2589_v46 = vadd.f32 %v2573_v4, %v6032_v48  ;;  %v7116_v62 = vld [vmem:[%s5928_s30 + $0x150] sm:$0xff]  ;;  %v2672_v4 = vmul.f32 %v7106_v3, %v6912_v40 }
 0xa22   : > { %v2596_v6 = vmax.f32 %v2588_v56, 0.0  ;;  %v2597_v2 = vmax.f32 %v2589_v46, 0.0 }
 0xa27   : > { %v2544_v52 = vpop.f32.mrf.mxu0  ;;  %v2576_v11 = vpop.f32.mrf.mxu1 }
 0xa28   : > { %v2590_v20 = vadd.f32 %v2544_v52, %v6024_v39  ;;  %v2591_v57 = vadd.f32 %v2576_v11, %v6024_v39  ;;  %v7121_v52 = vld [vmem:[%s5928_s30 + $0x158] sm:$0xff]  ;;  %v2673_v11 = vmul.f32 %v7111_v30, %v6920_v53 }
 0xa2a   : > { %v2598_v5 = vmax.f32 %v2590_v20, 0.0  ;;  %v2599_v8 = vmax.f32 %v2591_v57, 0.0  ;;  %v2401_v20 = vpop.f32.mrf.mxu2  ;;  %v7170_v57 = vld [vmem:[%s8095_s2 + $0x20] sm:$0xff] }
 0xa2f   : > { %v2547_v22 = vpop.f32.mrf.mxu0  ;;  %v2579_v24 = vpop.f32.mrf.mxu1 }
 0xa30   : > { %v2592_v12 = vadd.f32 %v2547_v22, %v6026_v41  ;;  %v2593_v42 = vadd.f32 %v2579_v24, %v6026_v41  ;;  %v7128_v22 = vld [vmem:[%s5928_s30 + $0x140] sm:$0xff] }
 0xa31   : > { %v7133_v24 = vld [vmem:[%s8097_s4] sm:$0xff] }
 0xa32   : > { %v2600_v32 = vmax.f32 %v2592_v12, 0.0  ;;  %v2601_v63 = vmax.f32 %v2593_v42, 0.0  ;;  %v7140_v12 = vld [vmem:[%s5928_s30 + $0x148] sm:$0xff]  ;;  %v2433_v42 = vpop.f32.mrf.mxu3 }
 0xa37   : > { %v2550_v29 = vpop.f32.mrf.mxu0  ;;  %v2582_v15 = vpop.f32.mrf.mxu1 }
 0xa38   : > { %v2594_v18 = vadd.f32 %v2550_v29, %v6022_v37  ;;  %v2595_v43 = vadd.f32 %v2582_v15, %v6022_v37  ;;  %v2670_v29 = vmul.f32 %v7116_v62, %v6928_v1  ;;  %v2669_v15 = vmul.f32 %v7140_v12, %v6956_v14 }
 0xa3a   : > { %v2602_v25 = vmax.f32 %v2594_v18, 0.0  ;;  %v2603_v19 = vmax.f32 %v2595_v43, 0.0  ;;  %v2668_v18 = vmul.f32 %v7128_v22, %v6946_v28  ;;  %v2502_v43 = vrot.slane %v2433_v42, 7 }
 0xa3c   : > { %2616 = vmatpush.msra.mxu2 %v2602_v25  ;;  %2636 = vmatpush.msra.mxu3 %v2603_v19  ;;  %v2503_v25 = vsel %vm494_vm1, %v2401_v20, %v2502_v43 }
 0xa3d   : > { %2506 = vst.msk [vmem:[#allocation3 + $0x15] ss:$8 sm:$0x3] %vm6103_vm2, %v2503_v25 }
 0xa3e   : > { %2617 = vmatpush.msra.mxu2 %v2600_v32  ;;  %2637 = vmatpush.msra.mxu3 %v2601_v63 }
 0xa40   : > { %2618 = vmatpush.msra.mxu2 %v2598_v5  ;;  %2638 = vmatpush.msra.mxu3 %v2599_v8  ;;  %v2585_v5 = vpop.f32.mrf.mxu1 }
 0xa42   : > { %2619 = vmatpush.msra.mxu2 %v2596_v6  ;;  %2639 = vmatpush.msra.mxu3 %v2597_v2  ;;  %v2654_v6 = vrot.slane %v2585_v5, 7 }
 0xa43   : > { %5291 = vmatmul.msk.f32.vlgmr.msra.gmra.mxu2 %vm352_vm0, %v6632_v13  ;;  %5292 = vmatmul.msk.f32.vlgmr.msra.gmra.mxu3 %vm352_vm0, %v7133_v24  ;;  %v2671_v13 = vmul.f32 %v7121_v52, %v6936_v61 }
 0xa44   : > { %2688 = vmatpush.msrb.mxu2 %v2674_v23  ;;  %2720 = vmatpush.msrb.mxu3 %v2675_v58  ;;  %v2553_v23 = vpop.f32.mrf.mxu0 }
 0xa45   : > { %v2655_v2 = vsel %vm494_vm1, %v2553_v23, %v2654_v6 }
 0xa46   : > { %2689 = vmatpush.msrb.mxu2 %v2672_v4  ;;  %2721 = vmatpush.msrb.mxu3 %v2673_v11  ;;  %2658 = vst.msk [vmem:[#allocation3 + $0x16] ss:$8 sm:$0x3] %vm6103_vm2, %v2655_v2  ;;  %v7191_v2 = vld [vmem:[%s5928_s30 + $0x1b0] sm:$0xff] }
 0xa48   : > { %2690 = vmatpush.msrb.mxu2 %v2670_v29  ;;  %2722 = vmatpush.msrb.mxu3 %v2671_v13 }
 0xa4a   : > { %2691 = vmatpush.msrb.mxu2 %v2668_v18  ;;  %2723 = vmatpush.msrb.mxu3 %v2669_v15 }
 0xa4b   : > { %5301 = vmatmul.msk.f32.vlgmr.msrb.gmra.mxu2 %vm352_vm0, %v7051_v54  ;;  %5306 = vmatmul.msk.f32.vlgmr.msrb.gmra.mxu3 %vm352_vm0, %v7051_v54 }
 0xa53   : > { %5302 = vmatmul.msk.f32.gmra.mxu2 %vm352_vm0, %v7060_v7  ;;  %5307 = vmatmul.msk.f32.gmra.mxu3 %vm352_vm0, %v7060_v7 }
 0xa5b   : > { %5303 = vmatmul.msk.f32.gmra.mxu2 %vm352_vm0, %v7069_v36  ;;  %5308 = vmatmul.msk.f32.gmra.mxu3 %vm352_vm0, %v7069_v36 }
 0xa63   : > { %5304 = vmatmul.msk.f32.gmra.mxu2 %vm352_vm0, %v7078_v16  ;;  %5309 = vmatmul.msk.f32.gmra.mxu3 %vm352_vm0, %v7078_v16 }
 0xa6b   : > { %5305 = vmatmul.msk.f32.gmra.mxu2 %vm352_vm0, %v7170_v57  ;;  %5310 = vmatmul.msk.f32.gmra.mxu3 %vm352_vm0, %v7170_v57 }
 0xac6   : > { %v2621_v19 = vpop.f32.mrf.mxu2  ;;  %v2641_v56 = vpop.f32.mrf.mxu3 }
 0xac7   : > { %v2646_v32 = vrot.slane %v2641_v56, 7 }
 0xac9   : > { %v2647_v46 = vsel %vm494_vm1, %v2621_v19, %v2646_v32 }
 0xaca   : > { %2650 = vst.msk [vmem:[#allocation2 + $0x16] ss:$8 sm:$0x3] %vm6103_vm2, %v2647_v46 }
 0xace   : > { %v2693_v63 = vpop.f32.mrf.mxu2  ;;  %v2725_v8 = vpop.f32.mrf.mxu3 }
 0xacf   : > { %v2740_v46 = vadd.f32 %v2693_v63, %v6032_v48  ;;  %v2741_v6 = vadd.f32 %v2725_v8, %v6032_v48  ;;  %v2826_v8 = vmul.f32 %v7191_v2, %v6900_v35 }
 0xad1   : > { %v2748_v63 = vmax.f32 %v2740_v46, 0.0 }
 0xad6   : > { %v2696_v58 = vpop.f32.mrf.mxu2  ;;  %v2728_v4 = vpop.f32.mrf.mxu3 }
 0xad7   : > { %v2742_v25 = vadd.f32 %v2696_v58, %v6024_v39  ;;  %v2743_v56 = vadd.f32 %v2728_v4, %v6024_v39  ;;  %v7194_v58 = vld [vmem:[%s5928_s30 + $0x1b8] sm:$0xff]  ;;  %v7197_v4 = vld [vmem:[%s5928_s30 + $0x1a0] sm:$0xff] }
 0xade   : > { %v2699_v11 = vpop.f32.mrf.mxu2  ;;  %v2731_v29 = vpop.f32.mrf.mxu3 }
 0xadf   : > { %v2744_v18 = vadd.f32 %v2699_v11, %v6026_v41  ;;  %v2745_v43 = vadd.f32 %v2731_v29, %v6026_v41  ;;  %v2750_v11 = vmax.f32 %v2742_v25, 0.0  ;;  %v2751_v29 = vmax.f32 %v2743_v56, 0.0  ;;  %v7207_v25 = vld [vmem:[%s5928_s30 + $0x190] sm:$0xff]  ;;  %v7212_v56 = vld [vmem:[%s5928_s30 + $0x198] sm:$0xff] }
 0xae0   : > { %8154 = vst [vmem:[#allocation12_spill] sm:$0xff] %v7207_v25 }
 0xae1   : > { %v2752_v5 = vmax.f32 %v2744_v18, 0.0  ;;  %v2753_v23 = vmax.f32 %v2745_v43, 0.0  ;;  %8155 = vst [vmem:[#allocation13_spill] sm:$0xff] %v7212_v56 }
 0xae6   : > { %v2702_v13 = vpop.f32.mrf.mxu2  ;;  %v2734_v42 = vpop.f32.mrf.mxu3 }
 0xae7   : > { %v2746_v15 = vadd.f32 %v2702_v13, %v6022_v37  ;;  %v2747_v20 = vadd.f32 %v2734_v42, %v6022_v37  ;;  %v2749_v42 = vmax.f32 %v2741_v6, 0.0  ;;  %v2822_v6 = vmul.f32 %v7207_v25, %v6928_v1 }
 0xae9   : > { %v2754_v19 = vmax.f32 %v2746_v15, 0.0  ;;  %v2755_v32 = vmax.f32 %v2747_v20, 0.0  ;;  %v7202_v15 = vld [vmem:[%s5928_s30 + $0x1a8] sm:$0xff]  ;;  %v2827_v20 = vmul.f32 %v7194_v58, %v6906_v33 }
 0xaea   : > { %8153 = vst [vmem:[#allocation11_spill] sm:$0xff] %v7202_v15  ;;  %v2825_v46 = vmul.f32 %v7202_v15, %v6920_v53 }
 0xaeb   : > { %2768 = vmatpush.msrb.mxu0 %v2754_v19  ;;  %2788 = vmatpush.msrb.mxu1 %v2755_v32  ;;  %v2824_v19 = vmul.f32 %v7197_v4, %v6912_v40 }
 0xaed   : > { %2769 = vmatpush.msrb.mxu0 %v2752_v5  ;;  %2789 = vmatpush.msrb.mxu1 %v2753_v23  ;;  %v7220_v5 = vld [vmem:[%s5928_s30 + $0x180] sm:$0xff]  ;;  %v7229_v23 = vld [vmem:[%s5928_s30 + $0x188] sm:$0xff] }
 0xaee   : > { %v2737_v13 = vpop.f32.mrf.mxu3  ;;  %v2705_v18 = vpop.f32.mrf.mxu2  ;;  %8156 = vst [vmem:[#allocation14_spill] sm:$0xff] %v7220_v5 }
 0xaef   : > { %2770 = vmatpush.msrb.mxu0 %v2750_v11  ;;  %v2806_v43 = vrot.slane %v2737_v13, 7  ;;  %2790 = vmatpush.msrb.mxu1 %v2751_v29  ;;  %8157 = vst [vmem:[#allocation15_spill] sm:$0xff] %v7229_v23  ;;  %v2823_v11 = vmul.f32 %v7212_v56, %v6936_v61  ;;  %v2820_v29 = vmul.f32 %v7220_v5, %v6946_v28 }
 0xaf1   : > { %2771 = vmatpush.msrb.mxu0 %v2748_v63  ;;  %v2807_v32 = vsel %vm494_vm1, %v2705_v18, %v2806_v43  ;;  %2791 = vmatpush.msrb.mxu1 %v2749_v42  ;;  %v2821_v63 = vmul.f32 %v7229_v23, %v6956_v14 }
 0xaf2   : > { %5311 = vmatmul.msk.f32.vlgmr.msrb.gmra.mxu0 %vm352_vm0, %v7133_v24  ;;  %2810 = vst.msk [vmem:[#allocation3 + $0x17] ss:$8 sm:$0x3] %vm6103_vm2, %v2807_v32  ;;  %5312 = vmatmul.msk.f32.vlgmr.msrb.gmra.mxu1 %vm352_vm0, %v7133_v24 }
 0xaf3   : > { %2840 = vmatpush.msra.mxu0 %v2826_v8  ;;  %2872 = vmatpush.msra.mxu1 %v2827_v20 }
 0xaf5   : > { %2841 = vmatpush.msra.mxu0 %v2824_v19  ;;  %2873 = vmatpush.msra.mxu1 %v2825_v46 }
 0xaf7   : > { %2842 = vmatpush.msra.mxu0 %v2822_v6  ;;  %2874 = vmatpush.msra.mxu1 %v2823_v11 }
 0xaf9   : > { %2843 = vmatpush.msra.mxu0 %v2820_v29  ;;  %2875 = vmatpush.msra.mxu1 %v2821_v63 }
 0xafa   : > { %5321 = vmatmul.msk.f32.vlgmr.msra.gmra.mxu0 %vm352_vm0, %v7051_v54  ;;  %5326 = vmatmul.msk.f32.vlgmr.msra.gmra.mxu1 %vm352_vm0, %v7051_v54 }
 0xb02   : > { %5322 = vmatmul.msk.f32.gmra.mxu0 %vm352_vm0, %v7060_v7  ;;  %5327 = vmatmul.msk.f32.gmra.mxu1 %vm352_vm0, %v7060_v7 }
 0xb0a   : > { %5323 = vmatmul.msk.f32.gmra.mxu0 %vm352_vm0, %v7069_v36  ;;  %5328 = vmatmul.msk.f32.gmra.mxu1 %vm352_vm0, %v7069_v36 }
 0xb12   : > { %5324 = vmatmul.msk.f32.gmra.mxu0 %vm352_vm0, %v7078_v16  ;;  %5329 = vmatmul.msk.f32.gmra.mxu1 %vm352_vm0, %v7078_v16 }
 0xb1a   : > { %5325 = vmatmul.msk.f32.gmra.mxu0 %vm352_vm0, %v7170_v57  ;;  %5330 = vmatmul.msk.f32.gmra.mxu1 %vm352_vm0, %v7170_v57 }
 0xb6f   : > { %v2773_v13 = vpop.f32.mrf.mxu0  ;;  %v2793_v18 = vpop.f32.mrf.mxu1 }
 0xb70   : > { %v2798_v8 = vrot.slane %v2793_v18, 7 }
 0xb72   : > { %v2799_v42 = vsel %vm494_vm1, %v2773_v13, %v2798_v8 }
 0xb73   : > { %2802 = vst.msk [vmem:[#allocation2 + $0x17] ss:$8 sm:$0x3] %vm6103_vm2, %v2799_v42 }
 0xb77   : > { %v2845_v43 = vpop.f32.mrf.mxu0  ;;  %v2877_v20 = vpop.f32.mrf.mxu1 }
 0xb78   : > { %v2892_v25 = vadd.f32 %v2845_v43, %v6032_v48 }
 0xb7a   : > { %v2900_v43 = vmax.f32 %v2892_v25, 0.0  ;;  %v7297_v25 = vld [vmem:[%s5928_s30 + $0x1c0] sm:$0xff] }
 0xb7b   : > { %8158 = vst [vmem:[#allocation16_spill] sm:$0xff] %v7297_v25 }
 0xb7f   : > { %v2848_v19 = vpop.f32.mrf.mxu0  ;;  %v2880_v32 = vpop.f32.mrf.mxu1 }
 0xb80   : > { %v2894_v8 = vadd.f32 %v2848_v19, %v6024_v39  ;;  %v2895_v5 = vadd.f32 %v2880_v32, %v6024_v39  ;;  %v7272_v19 = vld [vmem:[%s5928_s30 + $0x1f8] sm:$0xff]  ;;  %v7275_v32 = vld [vmem:[%s5928_s30 + $0x1e0] sm:$0xff] }
 0xb87   : > { %v2851_v46 = vpop.f32.mrf.mxu0  ;;  %v2883_v6 = vpop.f32.mrf.mxu1 }
 0xb88   : > { %v2896_v29 = vadd.f32 %v2851_v46, %v6026_v41  ;;  %v2897_v18 = vadd.f32 %v2883_v6, %v6026_v41  ;;  %v2893_v46 = vadd.f32 %v2877_v20, %v6032_v48  ;;  %v7269_v6 = vld [vmem:[%s5928_s30 + $0x1f0] sm:$0xff] }
 0xb89   : > { %v2978_v20 = vmul.f32 %v7269_v6, %v6900_v35 }
 0xb8a   : > { %v2904_v15 = vmax.f32 %v2896_v29, 0.0  ;;  %v7280_v29 = vld [vmem:[%s5928_s30 + $0x1e8] sm:$0xff] }
 0xb8b   : > { %v2977_v35 = vmul.f32 %v7280_v29, %v6920_v53 }
 0xb8f   : > { %v2854_v11 = vpop.f32.mrf.mxu0  ;;  %v2886_v23 = vpop.f32.mrf.mxu1 }
 0xb90   : > { %v2898_v63 = vadd.f32 %v2854_v11, %v6022_v37  ;;  %v2899_v13 = vadd.f32 %v2886_v23, %v6022_v37  ;;  %v2905_v11 = vmax.f32 %v2897_v18, 0.0  ;;  %v2902_v23 = vmax.f32 %v2894_v8, 0.0  ;;  %v7285_v18 = vld [vmem:[%s5928_s30 + $0x1d0] sm:$0xff]  ;;  %v7304_v8 = vld [vmem:[%s5928_s30 + $0x1c8] sm:$0xff] }
 0xb91   : > { %8159 = vst [vmem:[#allocation17_spill] sm:$0xff] %v7304_v8  ;;  %v2973_v53 = vmul.f32 %v7304_v8, %v6956_v14 }
 0xb92   : > { %v2906_v42 = vmax.f32 %v2898_v63, 0.0  ;;  %v2907_v56 = vmax.f32 %v2899_v13, 0.0  ;;  %v2903_v63 = vmax.f32 %v2895_v5, 0.0  ;;  %v2976_v5 = vmul.f32 %v7275_v32, %v6912_v40  ;;  %v7290_v13 = vld [vmem:[%s5928_s30 + $0x1d8] sm:$0xff] }
 0xb93   : > { %v2975_v40 = vmul.f32 %v7290_v13, %v6936_v61 }
 0xb94   : > { %2920 = vmatpush.msra.mxu2 %v2906_v42  ;;  %2940 = vmatpush.msra.mxu3 %v2907_v56  ;;  %v2901_v56 = vmax.f32 %v2893_v46, 0.0  ;;  %v2972_v42 = vmul.f32 %v7297_v25, %v6946_v28 }
 0xb96   : > { %2921 = vmatpush.msra.mxu2 %v2904_v15  ;;  %2941 = vmatpush.msra.mxu3 %v2905_v11  ;;  %v2979_v15 = vmul.f32 %v7272_v19, %v6906_v33  ;;  %v2974_v33 = vmul.f32 %v7285_v18, %v6928_v1 }
 0xb98   : > { %2922 = vmatpush.msra.mxu2 %v2902_v23  ;;  %2942 = vmatpush.msra.mxu3 %v2903_v63 }
 0xb9a   : > { %2923 = vmatpush.msra.mxu2 %v2900_v43  ;;  %2943 = vmatpush.msra.mxu3 %v2901_v56 }
 0xb9b   : > { %5331 = vmatmul.msk.f32.vlgmr.msra.gmra.mxu2 %vm352_vm0, %v7133_v24  ;;  %5332 = vmatmul.msk.f32.vlgmr.msra.gmra.mxu3 %vm352_vm0, %v7133_v24 }
 0xb9c   : > { %2992 = vmatpush.msrb.mxu2 %v2978_v20  ;;  %3024 = vmatpush.msrb.mxu3 %v2979_v15 }
 0xb9e   : > { %2993 = vmatpush.msrb.mxu2 %v2976_v5  ;;  %3025 = vmatpush.msrb.mxu3 %v2977_v35 }
 0xba0   : > { %2994 = vmatpush.msrb.mxu2 %v2974_v33  ;;  %3026 = vmatpush.msrb.mxu3 %v2975_v40 }
 0xba2   : > { %2995 = vmatpush.msrb.mxu2 %v2972_v42  ;;  %3027 = vmatpush.msrb.mxu3 %v2973_v53 }
 0xba3   : > { %5341 = vmatmul.msk.f32.vlgmr.msrb.gmra.mxu2 %vm352_vm0, %v7051_v54  ;;  %5346 = vmatmul.msk.f32.vlgmr.msrb.gmra.mxu3 %vm352_vm0, %v7051_v54 }
 0xbab   : > { %5342 = vmatmul.msk.f32.gmra.mxu2 %vm352_vm0, %v7060_v7  ;;  %5347 = vmatmul.msk.f32.gmra.mxu3 %vm352_vm0, %v7060_v7 }
 0xbb3   : > { %5343 = vmatmul.msk.f32.gmra.mxu2 %vm352_vm0, %v7069_v36  ;;  %5348 = vmatmul.msk.f32.gmra.mxu3 %vm352_vm0, %v7069_v36 }
 0xbbb   : > { %5344 = vmatmul.msk.f32.gmra.mxu2 %vm352_vm0, %v7078_v16  ;;  %5349 = vmatmul.msk.f32.gmra.mxu3 %vm352_vm0, %v7078_v16 }
 0xbc3   : > { %5345 = vmatmul.msk.f32.gmra.mxu2 %vm352_vm0, %v7170_v57  ;;  %5350 = vmatmul.msk.f32.gmra.mxu3 %vm352_vm0, %v7170_v57 }
 0xc1e   : > { %v2925_v1 = vpop.f32.mrf.mxu2  ;;  %v2945_v61 = vpop.f32.mrf.mxu3 }
 0xc1f   : > { %v2950_v28 = vrot.slane %v2945_v61, 7 }
 0xc21   : > { %v2951_v14 = vsel %vm494_vm1, %v2925_v1, %v2950_v28 }
 0xc22   : > { %2954 = vst.msk [vmem:[#allocation2 + $0x20] ss:$8 sm:$0x3] %vm6103_vm2, %v2951_v14 }
 0xc26   : > { %v2997_v46 = vpop.f32.mrf.mxu2  ;;  %v3029_v11 = vpop.f32.mrf.mxu3 }
 0xc27   : > { %v3044_v28 = vadd.f32 %v2997_v46, %v6032_v48  ;;  %v3045_v8 = vadd.f32 %v3029_v11, %v6032_v48  ;;  %v3139_v46 = vmul.f32 %v7005_v45, %v6909_v26  ;;  %v3136_v11 = vmul.f32 %v7008_v51, %v6915_v49 }
 0xc28   : > { %v3135_v45 = vmul.f32 %v7023_v44, %v6939_v9 }
 0xc2e   : > { %v3000_v23 = vpop.f32.mrf.mxu2  ;;  %v3032_v63 = vpop.f32.mrf.mxu3 }
 0xc2f   : > { %v3046_v42 = vadd.f32 %v3000_v23, %v6024_v39  ;;  %v3047_v1 = vadd.f32 %v3032_v63, %v6024_v39  ;;  %v3138_v23 = vmul.f32 %v7002_v21, %v6903_v38  ;;  %v3137_v63 = vmul.f32 %v7013_v0, %v6923_v55 }
 0xc30   : > { %v3134_v21 = vmul.f32 %v7018_v31, %v6931_v59  ;;  %v3133_v0 = vmul.f32 %v7037_v17, %v6959_v34 }
 0xc31   : > { %v3055_v25 = vmax.f32 %v3047_v1, 0.0 }
 0xc36   : > { %v3003_v43 = vpop.f32.mrf.mxu2  ;;  %v3035_v20 = vpop.f32.mrf.mxu3 }
 0xc37   : > { %v3048_v15 = vadd.f32 %v3003_v43, %v6026_v41  ;;  %v3049_v33 = vadd.f32 %v3035_v20, %v6026_v41  ;;  %v3052_v20 = vmax.f32 %v3044_v28, 0.0 }
 0xc39   : > { %v3056_v14 = vmax.f32 %v3048_v15, 0.0  ;;  %v3057_v43 = vmax.f32 %v3049_v33, 0.0  ;;  %v2857_v15 = vpop.f32.mrf.mxu0 }
 0xc3e   : > { %v3006_v56 = vpop.f32.mrf.mxu2  ;;  %v3038_v35 = vpop.f32.mrf.mxu3 }
 0xc3f   : > { %v3050_v5 = vadd.f32 %v3006_v56, %v6022_v37  ;;  %v3051_v40 = vadd.f32 %v3038_v35, %v6022_v37  ;;  %v3054_v56 = vmax.f32 %v3046_v42, 0.0 }
 0xc41   : > { %v3058_v53 = vmax.f32 %v3050_v5, 0.0  ;;  %v3059_v61 = vmax.f32 %v3051_v40, 0.0  ;;  %v3053_v5 = vmax.f32 %v3045_v8, 0.0  ;;  %v3132_v8 = vmul.f32 %v7030_v47, %v6949_v60 }
 0xc43   : > { %3072 = vmatpush.msrb.mxu0 %v3058_v53  ;;  %3092 = vmatpush.msrb.mxu1 %v3059_v61 }
 0xc45   : > { %3073 = vmatpush.msrb.mxu0 %v3056_v14  ;;  %3093 = vmatpush.msrb.mxu1 %v3057_v43 }
 0xc47   : > { %3074 = vmatpush.msrb.mxu0 %v3054_v56  ;;  %3094 = vmatpush.msrb.mxu1 %v3055_v25  ;;  %v2889_v25 = vpop.f32.mrf.mxu1 }
 0xc48   : > { %v2958_v51 = vrot.slane %v2889_v25, 7 }
 0xc49   : > { %3075 = vmatpush.msrb.mxu0 %v3052_v20  ;;  %3095 = vmatpush.msrb.mxu1 %v3053_v5 }
 0xc4a   : > { %5351 = vmatmul.msk.f32.vlgmr.msrb.gmra.mxu0 %vm352_vm0, %v7133_v24  ;;  %5352 = vmatmul.msk.f32.vlgmr.msrb.gmra.mxu1 %vm352_vm0, %v7133_v24  ;;  %v2959_v35 = vsel %vm494_vm1, %v2857_v15, %v2958_v51 }
 0xc4b   : > { %3152 = vmatpush.msra.mxu0 %v3138_v23  ;;  %3184 = vmatpush.msra.mxu1 %v3139_v46  ;;  %2962 = vst.msk [vmem:[#allocation3 + $0x20] ss:$8 sm:$0x3] %vm6103_vm2, %v2959_v35  ;;  %v3290_v35 = vmul.f32 %v7100_v10, %v6903_v38  ;;  %v3286_v38 = vmul.f32 %v7116_v62, %v6931_v59  ;;  %v3041_v10 = vpop.f32.mrf.mxu3 }
 0xc4d   : > { %3153 = vmatpush.msra.mxu0 %v3136_v11  ;;  %3185 = vmatpush.msra.mxu1 %v3137_v63 }
 0xc4f   : > { %3154 = vmatpush.msra.mxu0 %v3134_v21  ;;  %3186 = vmatpush.msra.mxu1 %v3135_v45 }
 0xc51   : > { %3155 = vmatpush.msra.mxu0 %v3132_v8  ;;  %3187 = vmatpush.msra.mxu1 %v3133_v0 }
 0xc52   : > { %5369 = vmatmul.msk.f32.vlgmr.msra.gmra.mxu0 %vm352_vm0, %v7051_v54  ;;  %5374 = vmatmul.msk.f32.vlgmr.msra.gmra.mxu1 %vm352_vm0, %v7051_v54 }
 0xc5a   : > { %5370 = vmatmul.msk.f32.gmra.mxu0 %vm352_vm0, %v7060_v7  ;;  %5375 = vmatmul.msk.f32.gmra.mxu1 %vm352_vm0, %v7060_v7 }
 0xc62   : > { %5371 = vmatmul.msk.f32.gmra.mxu0 %vm352_vm0, %v7069_v36  ;;  %5376 = vmatmul.msk.f32.gmra.mxu1 %vm352_vm0, %v7069_v36 }
 0xc6a   : > { %5372 = vmatmul.msk.f32.gmra.mxu0 %vm352_vm0, %v7078_v16  ;;  %5377 = vmatmul.msk.f32.gmra.mxu1 %vm352_vm0, %v7078_v16 }
 0xc72   : > { %5373 = vmatmul.msk.f32.gmra.mxu0 %vm352_vm0, %v7170_v57  ;;  %5378 = vmatmul.msk.f32.gmra.mxu1 %vm352_vm0, %v7170_v57 }
 0xcc7   : > { %v3077_v31 = vpop.f32.mrf.mxu0  ;;  %v3097_v44 = vpop.f32.mrf.mxu1 }
 0xcc8   : > { %v3102_v47 = vrot.slane %v3097_v44, 7  ;;  %v3291_v44 = vmul.f32 %v7103_v50, %v6909_v26  ;;  %v3287_v26 = vmul.f32 %v7121_v52, %v6939_v9  ;;  %v3284_v50 = vmul.f32 %v7128_v22, %v6949_v60 }
 0xcca   : > { %v3103_v17 = vsel %vm494_vm1, %v3077_v31, %v3102_v47  ;;  %v3288_v47 = vmul.f32 %v7106_v3, %v6915_v49  ;;  %v3110_v49 = vrot.slane %v3041_v10, 7  ;;  %v3009_v3 = vpop.f32.mrf.mxu2 }
 0xccb   : > { %3106 = vst.msk [vmem:[#allocation2 + $0x21] ss:$8 sm:$0x3] %vm6103_vm2, %v3103_v17  ;;  %v3289_v17 = vmul.f32 %v7111_v30, %v6923_v55  ;;  %v3285_v55 = vmul.f32 %v7140_v12, %v6959_v34 }
 0xccc   : > { %v3111_v30 = vsel %vm494_vm1, %v3009_v3, %v3110_v49  ;;  %v8162_v49 = vld [vmem:[#allocation13_spill] sm:$0xff] }
 0xccd   : > { %3114 = vst.msk [vmem:[#allocation3 + $0x21] ss:$8 sm:$0x3] %vm6103_vm2, %v3111_v30  ;;  %v8163_v30 = vld [vmem:[#allocation14_spill] sm:$0xff] }
 0xccf   : > { %v3157_v33 = vpop.f32.mrf.mxu0  ;;  %v3189_v40 = vpop.f32.mrf.mxu1 }
 0xcd0   : > { %v3204_v21 = vadd.f32 %v3157_v33, %v6032_v48  ;;  %v3205_v45 = vadd.f32 %v3189_v40, %v6032_v48 }
 0xcd2   : > { %v3212_v0 = vmax.f32 %v3204_v21, 0.0  ;;  %v3213_v31 = vmax.f32 %v3205_v45, 0.0 }
 0xcd7   : > { %v3160_v42 = vpop.f32.mrf.mxu0  ;;  %v3192_v53 = vpop.f32.mrf.mxu1 }
 0xcd8   : > { %v3206_v5 = vadd.f32 %v3160_v42, %v6024_v39  ;;  %v3207_v11 = vadd.f32 %v3192_v53, %v6024_v39 }
 0xcda   : > { %v3214_v8 = vmax.f32 %v3206_v5, 0.0  ;;  %v3215_v15 = vmax.f32 %v3207_v11, 0.0 }
 0xcdf   : > { %v3163_v1 = vpop.f32.mrf.mxu0  ;;  %v3195_v61 = vpop.f32.mrf.mxu1 }
 0xce0   : > { %v3208_v14 = vadd.f32 %v3163_v1, %v6026_v41  ;;  %v3209_v20 = vadd.f32 %v3195_v61, %v6026_v41 }
 0xce2   : > { %v3216_v25 = vmax.f32 %v3208_v14, 0.0  ;;  %v3217_v51 = vmax.f32 %v3209_v20, 0.0 }
 0xce7   : > { %v3166_v28 = vpop.f32.mrf.mxu0  ;;  %v3198_v56 = vpop.f32.mrf.mxu1 }
 0xce8   : > { %v3210_v43 = vadd.f32 %v3166_v28, %v6022_v37  ;;  %v3211_v23 = vadd.f32 %v3198_v56, %v6022_v37 }
 0xcea   : > { %v3218_v46 = vmax.f32 %v3210_v43, 0.0  ;;  %v3219_v63 = vmax.f32 %v3211_v23, 0.0 }
 0xcec   : > { %3232 = vmatpush.msra.mxu2 %v3218_v46  ;;  %3252 = vmatpush.msra.mxu3 %v3219_v63 }
 0xcee   : > { %3233 = vmatpush.msra.mxu2 %v3216_v25  ;;  %3253 = vmatpush.msra.mxu3 %v3217_v51  ;;  %v7452_v51 = vld [vmem:[%s5928_s30 + $0xf0] sm:$0xff] }
 0xcf0   : > { %3234 = vmatpush.msra.mxu2 %v3214_v8  ;;  %3254 = vmatpush.msra.mxu3 %v3215_v15  ;;  %v3442_v8 = vmul.f32 %v7452_v51, %v7191_v2  ;;  %v7469_v2 = vld [vmem:[%s5928_s30 + $0xe8] sm:$0xff] }
 0xcf2   : > { %3235 = vmatpush.msra.mxu2 %v3212_v0  ;;  %3255 = vmatpush.msra.mxu3 %v3213_v31  ;;  %v7457_v0 = vld [vmem:[%s5928_s30 + $0xf8] sm:$0xff]  ;;  %v7462_v31 = vld [vmem:[%s5928_s30 + $0xe0] sm:$0xff] }
 0xcf3   : > { %5379 = vmatmul.msk.f32.vlgmr.msra.gmra.mxu2 %vm352_vm0, %v7133_v24  ;;  %5380 = vmatmul.msk.f32.vlgmr.msra.gmra.mxu3 %vm352_vm0, %v7133_v24 }
 0xcf4   : > { %3304 = vmatpush.msrb.mxu2 %v3290_v35  ;;  %3336 = vmatpush.msrb.mxu3 %v3291_v44  ;;  %v3443_v35 = vmul.f32 %v7457_v0, %v7194_v58  ;;  %v3440_v44 = vmul.f32 %v7462_v31, %v7197_v4  ;;  %v7476_v58 = vld [vmem:[%s5928_s30 + $0xd0] sm:$0xff]  ;;  %v3201_v4 = vpop.f32.mrf.mxu1 }
 0xcf5   : > { %v3270_v3 = vrot.slane %v3201_v4, 7  ;;  %v7582_v4 = vld [vmem:[%s8095_s2 + $0x18] sm:$0xff] }
 0xcf6   : > { %3305 = vmatpush.msrb.mxu2 %v3288_v47  ;;  %3337 = vmatpush.msrb.mxu3 %v3289_v17  ;;  %v8160_v47 = vld [vmem:[#allocation11_spill] sm:$0xff] }
 0xcf7   : > { %v3441_v17 = vmul.f32 %v7469_v2, %v8160_v47  ;;  %v3595_v47 = vmul.f32 %v7457_v0, %v7272_v19  ;;  %v8165_v0 = vld [vmem:[#allocation16_spill] sm:$0xff] }
 0xcf8   : > { %3306 = vmatpush.msrb.mxu2 %v3286_v38  ;;  %3338 = vmatpush.msrb.mxu3 %v3287_v26  ;;  %v8161_v38 = vld [vmem:[#allocation12_spill] sm:$0xff]  ;;  %v7481_v26 = vld [vmem:[%s5928_s30 + $0xd8] sm:$0xff] }
 0xcf9   : > { %v3438_v10 = vmul.f32 %v7476_v58, %v8161_v38  ;;  %v3593_v38 = vmul.f32 %v7469_v2, %v7280_v29  ;;  %v3591_v19 = vmul.f32 %v7481_v26, %v7290_v13  ;;  %v8166_v29 = vld [vmem:[#allocation17_spill] sm:$0xff]  ;;  %v7564_v13 = vld [vmem:[%s8095_s2 + $0x8] sm:$0xff] }
 0xcfa   : > { %3307 = vmatpush.msrb.mxu2 %v3284_v50  ;;  %3339 = vmatpush.msrb.mxu3 %v3285_v55  ;;  %v3439_v50 = vmul.f32 %v7481_v26, %v8162_v49  ;;  %v7486_v55 = vld [vmem:[%s5928_s30 + $0xc0] sm:$0xff] }
 0xcfb   : > { %5389 = vmatmul.msk.f32.vlgmr.msrb.gmra.mxu2 %vm352_vm0, %v7051_v54  ;;  %5394 = vmatmul.msk.f32.vlgmr.msrb.gmra.mxu3 %vm352_vm0, %v7051_v54 }
 0xd03   : > { %5390 = vmatmul.msk.f32.gmra.mxu2 %vm352_vm0, %v7060_v7  ;;  %5395 = vmatmul.msk.f32.gmra.mxu3 %vm352_vm0, %v7060_v7 }
 0xd0b   : > { %5391 = vmatmul.msk.f32.gmra.mxu2 %vm352_vm0, %v7069_v36  ;;  %5396 = vmatmul.msk.f32.gmra.mxu3 %vm352_vm0, %v7069_v36 }
 0xd13   : > { %5392 = vmatmul.msk.f32.gmra.mxu2 %vm352_vm0, %v7078_v16  ;;  %5397 = vmatmul.msk.f32.gmra.mxu3 %vm352_vm0, %v7078_v16 }
 0xd1b   : > { %5393 = vmatmul.msk.f32.gmra.mxu2 %vm352_vm0, %v7170_v57  ;;  %5398 = vmatmul.msk.f32.gmra.mxu3 %vm352_vm0, %v7170_v57 }
 0xd76   : > { %v3237_v59 = vpop.f32.mrf.mxu2  ;;  %v3257_v9 = vpop.f32.mrf.mxu3 }
 0xd77   : > { %v3262_v60 = vrot.slane %v3257_v9, 7  ;;  %v3169_v9 = vpop.f32.mrf.mxu0 }
 0xd79   : > { %v3263_v34 = vsel %vm494_vm1, %v3237_v59, %v3262_v60  ;;  %v3436_v59 = vmul.f32 %v7486_v55, %v8163_v30  ;;  %v7491_v60 = vld [vmem:[%s5928_s30 + $0xc8] sm:$0xff] }
 0xd7a   : > { %3266 = vst.msk [vmem:[#allocation2 + $0x22] ss:$8 sm:$0x3] %vm6103_vm2, %v3263_v34  ;;  %v8164_v34 = vld [vmem:[#allocation15_spill] sm:$0xff]  ;;  %v3589_v2 = vmul.f32 %v7491_v60, %v8166_v29 }
 0xd7e   : > { %v3309_v62 = vpop.f32.mrf.mxu2  ;;  %v3341_v52 = vpop.f32.mrf.mxu3 }
 0xd7f   : > { %v3356_v5 = vadd.f32 %v3309_v62, %v6032_v48  ;;  %v3357_v11 = vadd.f32 %v3341_v52, %v6032_v48  ;;  %v3437_v62 = vmul.f32 %v7491_v60, %v8164_v34  ;;  %v3271_v52 = vsel %vm494_vm1, %v3169_v9, %v3270_v3 }
 0xd80   : > { %3274 = vst.msk [vmem:[#allocation3 + $0x22] ss:$8 sm:$0x3] %vm6103_vm2, %v3271_v52 }
 0xd81   : > { %v3364_v45 = vmax.f32 %v3356_v5, 0.0  ;;  %v3365_v15 = vmax.f32 %v3357_v11, 0.0 }
 0xd86   : > { %v3312_v22 = vpop.f32.mrf.mxu2  ;;  %v3344_v12 = vpop.f32.mrf.mxu3 }
 0xd87   : > { %v3358_v43 = vadd.f32 %v3312_v22, %v6024_v39  ;;  %v3359_v20 = vadd.f32 %v3344_v12, %v6024_v39 }
 0xd89   : > { %v3366_v21 = vmax.f32 %v3358_v43, 0.0  ;;  %v3367_v25 = vmax.f32 %v3359_v20, 0.0 }
 0xd8e   : > { %v3315_v33 = vpop.f32.mrf.mxu2  ;;  %v3347_v40 = vpop.f32.mrf.mxu3 }
 0xd8f   : > { %v3360_v53 = vadd.f32 %v3315_v33, %v6026_v41  ;;  %v3361_v28 = vadd.f32 %v3347_v40, %v6026_v41 }
 0xd91   : > { %v3368_v46 = vmax.f32 %v3360_v53, 0.0  ;;  %v3369_v63 = vmax.f32 %v3361_v28, 0.0 }
 0xd96   : > { %v3318_v42 = vpop.f32.mrf.mxu2  ;;  %v3350_v61 = vpop.f32.mrf.mxu3 }
 0xd97   : > { %v3362_v1 = vadd.f32 %v3318_v42, %v6022_v37  ;;  %v3363_v14 = vadd.f32 %v3350_v61, %v6022_v37 }
 0xd99   : > { %v3370_v56 = vmax.f32 %v3362_v1, 0.0  ;;  %v3371_v23 = vmax.f32 %v3363_v14, 0.0 }
 0xd9b   : > { %3384 = vmatpush.msrb.mxu0 %v3370_v56  ;;  %3404 = vmatpush.msrb.mxu1 %v3371_v23 }
 0xd9d   : > { %3385 = vmatpush.msrb.mxu0 %v3368_v46  ;;  %3405 = vmatpush.msrb.mxu1 %v3369_v63 }
 0xd9f   : > { %3386 = vmatpush.msrb.mxu0 %v3366_v21  ;;  %3406 = vmatpush.msrb.mxu1 %v3367_v25 }
 0xda1   : > { %3387 = vmatpush.msrb.mxu0 %v3364_v45  ;;  %3407 = vmatpush.msrb.mxu1 %v3365_v15 }
 0xda2   : > { %5399 = vmatmul.msk.f32.vlgmr.msrb.gmra.mxu0 %vm352_vm0, %v7133_v24  ;;  %5400 = vmatmul.msk.f32.vlgmr.msrb.gmra.mxu1 %vm352_vm0, %v7133_v24 }
 0xda3   : > { %3456 = vmatpush.msra.mxu0 %v3442_v8  ;;  %3488 = vmatpush.msra.mxu1 %v3443_v35  ;;  %v3594_v35 = vmul.f32 %v7452_v51, %v7269_v6  ;;  %v3590_v6 = vmul.f32 %v7476_v58, %v7285_v18  ;;  %v3353_v51 = vpop.f32.mrf.mxu3  ;;  %v7555_v18 = vld [vmem:[%s8095_s2] sm:$0xff]  ;;  %v7573_v58 = vld [vmem:[%s8095_s2 + $0x10] sm:$0xff] }
 0xda5   : > { %3457 = vmatpush.msra.mxu0 %v3440_v44  ;;  %3489 = vmatpush.msra.mxu1 %v3441_v17  ;;  %v3592_v17 = vmul.f32 %v7462_v31, %v7275_v32  ;;  %v3422_v32 = vrot.slane %v3353_v51, 7  ;;  %v3588_v31 = vmul.f32 %v7486_v55, %v8165_v0  ;;  %v7658_v51 = vld [vmem:[%s5928_s30 + $0x140] sm:$0xff]  ;;  %v7668_v0 = vld [vmem:[%s5928_s30 + $0x148] sm:$0xff] }
 0xda7   : > { %3458 = vmatpush.msra.mxu0 %v3438_v10  ;;  %3490 = vmatpush.msra.mxu1 %v3439_v50  ;;  %v3321_v10 = vpop.f32.mrf.mxu2 }
 0xda9   : > { %3459 = vmatpush.msra.mxu0 %v3436_v59  ;;  %3491 = vmatpush.msra.mxu1 %v3437_v62 }
 0xdaa   : > { %5409 = vmatmul.msk.f32.vlgmr.msra.gmra.mxu0 %vm352_vm0, %v7051_v54  ;;  %5414 = vmatmul.msk.f32.vlgmr.msra.gmra.mxu1 %vm352_vm0, %v7051_v54 }
 0xdb2   : > { %5410 = vmatmul.msk.f32.gmra.mxu0 %vm352_vm0, %v7060_v7  ;;  %5415 = vmatmul.msk.f32.gmra.mxu1 %vm352_vm0, %v7060_v7 }
 0xdba   : > { %5411 = vmatmul.msk.f32.gmra.mxu0 %vm352_vm0, %v7069_v36  ;;  %5416 = vmatmul.msk.f32.gmra.mxu1 %vm352_vm0, %v7069_v36 }
 0xdc2   : > { %5412 = vmatmul.msk.f32.gmra.mxu0 %vm352_vm0, %v7078_v16  ;;  %5417 = vmatmul.msk.f32.gmra.mxu1 %vm352_vm0, %v7078_v16 }
 0xdca   : > { %5413 = vmatmul.msk.f32.gmra.mxu0 %vm352_vm0, %v7170_v57  ;;  %5418 = vmatmul.msk.f32.gmra.mxu1 %vm352_vm0, %v7170_v57 }
 0xe1f   : > { %v3389_v54 = vpop.f32.mrf.mxu0  ;;  %v3409_v7 = vpop.f32.mrf.mxu1 }
 0xe20   : > { %v3414_v22 = vrot.slane %v3409_v7, 7 }
 0xe22   : > { %v3415_v12 = vsel %vm494_vm1, %v3389_v54, %v3414_v22 }
 0xe23   : > { %3418 = vst.msk [vmem:[#allocation2 + $0x23] ss:$8 sm:$0x3] %vm6103_vm2, %v3415_v12 }
 0xe27   : > { %v3461_v36 = vpop.f32.mrf.mxu0  ;;  %v3493_v33 = vpop.f32.mrf.mxu1 }
 0xe28   : > { %v3508_v11 = vadd.f32 %v3461_v36, %v6032_v48  ;;  %v3509_v21 = vadd.f32 %v3493_v33, %v6032_v48 }
 0xe2a   : > { %v3516_v15 = vmax.f32 %v3508_v11, 0.0  ;;  %v3517_v44 = vmax.f32 %v3509_v21, 0.0  ;;  %v7627_v21 = vld [vmem:[%s5928_s30 + $0x168] sm:$0xff] }
 0xe2f   : > { %v3464_v40 = vpop.f32.mrf.mxu0  ;;  %v3496_v42 = vpop.f32.mrf.mxu1 }
 0xe30   : > { %v3510_v20 = vadd.f32 %v3464_v40, %v6024_v39  ;;  %v3511_v5 = vadd.f32 %v3496_v42, %v6024_v39 }
 0xe32   : > { %v3518_v45 = vmax.f32 %v3510_v20, 0.0  ;;  %v3519_v8 = vmax.f32 %v3511_v5, 0.0  ;;  %v7619_v5 = vld [vmem:[%s5928_s30 + $0x160] sm:$0xff] }
 0xe37   : > { %v3467_v53 = vpop.f32.mrf.mxu0  ;;  %v3499_v16 = vpop.f32.mrf.mxu1 }
 0xe38   : > { %v3512_v61 = vadd.f32 %v3467_v53, %v6026_v41  ;;  %v3513_v43 = vadd.f32 %v3499_v16, %v6026_v41 }
 0xe3a   : > { %v3520_v63 = vmax.f32 %v3512_v61, 0.0  ;;  %v3521_v25 = vmax.f32 %v3513_v43, 0.0  ;;  %v7604_v61 = vld [vmem:[%s5928_s30 + $0x130] sm:$0xff]  ;;  %v7610_v43 = vld [vmem:[%s5928_s30 + $0x138] sm:$0xff] }
 0xe3f   : > { %v3470_v1 = vpop.f32.mrf.mxu0  ;;  %v3502_v14 = vpop.f32.mrf.mxu1 }
 0xe40   : > { %v3514_v28 = vadd.f32 %v3470_v1, %v6022_v37  ;;  %v3515_v56 = vadd.f32 %v3502_v14, %v6022_v37 }
 0xe42   : > { %v3522_v23 = vmax.f32 %v3514_v28, 0.0  ;;  %v3523_v46 = vmax.f32 %v3515_v56, 0.0  ;;  %v7607_v28 = vld [vmem:[%s5928_s30 + $0x170] sm:$0xff]  ;;  %v7613_v56 = vld [vmem:[%s5928_s30 + $0x178] sm:$0xff] }
 0xe43   : > { %v3754_v11 = vmul.f32 %v7607_v28, %v7604_v61 }
 0xe44   : > { %3536 = vmatpush.msra.mxu2 %v3522_v23  ;;  %3556 = vmatpush.msra.mxu3 %v3523_v46  ;;  %v7616_v23 = vld [vmem:[%s5928_s30 + $0x120] sm:$0xff] }
 0xe46   : > { %3537 = vmatpush.msra.mxu2 %v3520_v63  ;;  %3557 = vmatpush.msra.mxu3 %v3521_v25  ;;  %v7624_v63 = vld [vmem:[%s5928_s30 + $0x128] sm:$0xff] }
 0xe48   : > { %3538 = vmatpush.msra.mxu2 %v3518_v45  ;;  %3558 = vmatpush.msra.mxu3 %v3519_v8  ;;  %v3755_v45 = vmul.f32 %v7613_v56, %v7610_v43  ;;  %v7632_v8 = vld [vmem:[%s5928_s30 + $0x110] sm:$0xff] }
 0xe4a   : > { %3539 = vmatpush.msra.mxu2 %v3516_v15  ;;  %3559 = vmatpush.msra.mxu3 %v3517_v44  ;;  %v7635_v15 = vld [vmem:[%s5928_s30 + $0x150] sm:$0xff]  ;;  %v7640_v44 = vld [vmem:[%s5928_s30 + $0x118] sm:$0xff] }
 0xe4b   : > { %5419 = vmatmul.msk.f32.vlgmr.msra.gmra.mxu2 %vm352_vm0, %v7133_v24  ;;  %5420 = vmatmul.msk.f32.vlgmr.msra.gmra.mxu3 %vm352_vm0, %v7133_v24  ;;  %v3423_v24 = vsel %vm494_vm1, %v3321_v10, %v3422_v32  ;;  %v7665_v32 = vld [vmem:[%s5928_s30 + $0x108] sm:$0xff] }
 0xe4c   : > { %3608 = vmatpush.msrb.mxu2 %v3594_v35  ;;  %3640 = vmatpush.msrb.mxu3 %v3595_v47  ;;  %3426 = vst.msk [vmem:[#allocation3 + $0x23] ss:$8 sm:$0x3] %vm6103_vm2, %v3423_v24  ;;  %v3752_v35 = vmul.f32 %v7619_v5, %v7616_v23  ;;  %v7643_v47 = vld [vmem:[%s5928_s30 + $0x158] sm:$0xff]  ;;  %v3473_v24 = vpop.f32.mrf.mxu0 }
 0xe4d   : > { %v3751_v10 = vmul.f32 %v7643_v47, %v7640_v44 }
 0xe4e   : > { %3609 = vmatpush.msrb.mxu2 %v3592_v17  ;;  %3641 = vmatpush.msrb.mxu3 %v3593_v38  ;;  %v7648_v17 = vld [vmem:[%s8097_s4] sm:$0xff]  ;;  %v3753_v38 = vmul.f32 %v7627_v21, %v7624_v63 }
 0xe50   : > { %3610 = vmatpush.msrb.mxu2 %v3590_v6  ;;  %3642 = vmatpush.msrb.mxu3 %v3591_v19  ;;  %v7655_v6 = vld [vmem:[%s5928_s30 + $0x100] sm:$0xff]  ;;  %v3750_v19 = vmul.f32 %v7635_v15, %v7632_v8 }
 0xe52   : > { %3611 = vmatpush.msrb.mxu2 %v3588_v31  ;;  %3643 = vmatpush.msrb.mxu3 %v3589_v2  ;;  %v3505_v31 = vpop.f32.mrf.mxu1  ;;  %v3748_v2 = vmul.f32 %v7658_v51, %v7655_v6 }
 0xe53   : > { %5429 = vmatmul.msk.f32.vlgmr.msrb.gmra.mxu2 %vm352_vm0, %v7555_v18  ;;  %5434 = vmatmul.msk.f32.vlgmr.msrb.gmra.mxu3 %vm352_vm0, %v7555_v18  ;;  %v3574_v29 = vrot.slane %v3505_v31, 7 }
 0xe5b   : > { %5430 = vmatmul.msk.f32.gmra.mxu2 %vm352_vm0, %v7564_v13  ;;  %5435 = vmatmul.msk.f32.gmra.mxu3 %vm352_vm0, %v7564_v13 }
 0xe63   : > { %5431 = vmatmul.msk.f32.gmra.mxu2 %vm352_vm0, %v7573_v58  ;;  %5436 = vmatmul.msk.f32.gmra.mxu3 %vm352_vm0, %v7573_v58 }
 0xe6b   : > { %5432 = vmatmul.msk.f32.gmra.mxu2 %vm352_vm0, %v7582_v4  ;;  %5437 = vmatmul.msk.f32.gmra.mxu3 %vm352_vm0, %v7582_v4 }
 0xe73   : > { %5433 = vmatmul.msk.f32.gmra.mxu2 %vm352_vm0, %v7170_v57  ;;  %5438 = vmatmul.msk.f32.gmra.mxu3 %vm352_vm0, %v7170_v57 }
 0xece   : > { %v3541_v26 = vpop.f32.mrf.mxu2  ;;  %v3561_v49 = vpop.f32.mrf.mxu3 }
 0xecf   : > { %v3566_v50 = vrot.slane %v3561_v49, 7  ;;  %v3575_v49 = vsel %vm494_vm1, %v3473_v24, %v3574_v29  ;;  %v7732_v24 = vld [vmem:[%s5928_s30 + $0x190] sm:$0xff] }
 0xed0   : > { %3578 = vst.msk [vmem:[#allocation3 + $0x24] ss:$8 sm:$0x3] %vm6103_vm2, %v3575_v49  ;;  %v7737_v49 = vld [vmem:[%s5928_s30 + $0x198] sm:$0xff] }
 0xed1   : > { %v3567_v3 = vsel %vm494_vm1, %v3541_v26, %v3566_v50  ;;  %v3749_v26 = vmul.f32 %v7668_v0, %v7665_v32  ;;  %v7698_v50 = vld [vmem:[%s8095_s2 + $0x20] sm:$0xff] }
 0xed2   : > { %3570 = vst.msk [vmem:[#allocation2 + $0x24] ss:$8 sm:$0x3] %vm6103_vm2, %v3567_v3 }
 0xed6   : > { %v3613_v55 = vpop.f32.mrf.mxu2  ;;  %v3645_v30 = vpop.f32.mrf.mxu3 }
 0xed7   : > { %v3660_v42 = vadd.f32 %v3613_v55, %v6032_v48  ;;  %v3661_v16 = vadd.f32 %v3645_v30, %v6032_v48 }
 0xed9   : > { %v3668_v46 = vmax.f32 %v3660_v42, 0.0  ;;  %v3669_v25 = vmax.f32 %v3661_v16, 0.0 }
 0xede   : > { %v3616_v59 = vpop.f32.mrf.mxu2  ;;  %v3648_v9 = vpop.f32.mrf.mxu3 }
 0xedf   : > { %v3662_v12 = vadd.f32 %v3616_v59, %v6024_v39  ;;  %v3663_v33 = vadd.f32 %v3648_v9, %v6024_v39 }
 0xee1   : > { %v3670_v14 = vmax.f32 %v3662_v12, 0.0  ;;  %v3671_v20 = vmax.f32 %v3663_v33, 0.0 }
 0xee6   : > { %v3619_v60 = vpop.f32.mrf.mxu2  ;;  %v3651_v34 = vpop.f32.mrf.mxu3 }
 0xee7   : > { %v3664_v52 = vadd.f32 %v3619_v60, %v6026_v41  ;;  %v3665_v7 = vadd.f32 %v3651_v34, %v6026_v41 }
 0xee9   : > { %v3672_v53 = vmax.f32 %v3664_v52, 0.0  ;;  %v3673_v1 = vmax.f32 %v3665_v7, 0.0 }
 0xeee   : > { %v3622_v62 = vpop.f32.mrf.mxu2  ;;  %v3654_v54 = vpop.f32.mrf.mxu3 }
 0xeef   : > { %v3666_v57 = vadd.f32 %v3622_v62, %v6022_v37  ;;  %v3667_v22 = vadd.f32 %v3654_v54, %v6022_v37 }
 0xef1   : > { %v3674_v36 = vmax.f32 %v3666_v57, 0.0  ;;  %v3675_v40 = vmax.f32 %v3667_v22, 0.0 }
 0xef3   : > { %3688 = vmatpush.msrb.mxu0 %v3674_v36  ;;  %3708 = vmatpush.msrb.mxu1 %v3675_v40 }
 0xef5   : > { %3689 = vmatpush.msrb.mxu0 %v3672_v53  ;;  %3709 = vmatpush.msrb.mxu1 %v3673_v1 }
 0xef7   : > { %3690 = vmatpush.msrb.mxu0 %v3670_v14  ;;  %3710 = vmatpush.msrb.mxu1 %v3671_v20 }
 0xef9   : > { %3691 = vmatpush.msrb.mxu0 %v3668_v46  ;;  %3711 = vmatpush.msrb.mxu1 %v3669_v25 }
 0xefa   : > { %5439 = vmatmul.msk.f32.vlgmr.msrb.gmra.mxu0 %vm352_vm0, %v7648_v17  ;;  %5440 = vmatmul.msk.f32.vlgmr.msrb.gmra.mxu1 %vm352_vm0, %v7648_v17 }
 0xefb   : > { %3768 = vmatpush.msra.mxu0 %v3754_v11  ;;  %3800 = vmatpush.msra.mxu1 %v3755_v45  ;;  %v7716_v11 = vld [vmem:[%s5928_s30 + $0x1b0] sm:$0xff]  ;;  %v7719_v45 = vld [vmem:[%s5928_s30 + $0x1b8] sm:$0xff] }
 0xefc   : > { %v3906_v31 = vmul.f32 %v7716_v11, %v7604_v61 }
 0xefd   : > { %3769 = vmatpush.msra.mxu0 %v3752_v35  ;;  %3801 = vmatpush.msra.mxu1 %v3753_v38  ;;  %v7722_v38 = vld [vmem:[%s5928_s30 + $0x1a0] sm:$0xff] }
 0xeff   : > { %3770 = vmatpush.msra.mxu0 %v3750_v19  ;;  %3802 = vmatpush.msra.mxu1 %v3751_v10  ;;  %v7727_v10 = vld [vmem:[%s5928_s30 + $0x1a8] sm:$0xff] }
 0xf01   : > { %3771 = vmatpush.msra.mxu0 %v3748_v2  ;;  %3803 = vmatpush.msra.mxu1 %v3749_v26  ;;  %v3907_v2 = vmul.f32 %v7719_v45, %v7610_v43  ;;  %v3904_v26 = vmul.f32 %v7722_v38, %v7616_v23 }
 0xf02   : > { %5457 = vmatmul.msk.f32.vlgmr.msra.gmra.mxu0 %vm352_vm0, %v7555_v18  ;;  %5462 = vmatmul.msk.f32.vlgmr.msra.gmra.mxu1 %vm352_vm0, %v7555_v18 }
 0xf0a   : > { %5458 = vmatmul.msk.f32.gmra.mxu0 %vm352_vm0, %v7564_v13  ;;  %5463 = vmatmul.msk.f32.gmra.mxu1 %vm352_vm0, %v7564_v13 }
 0xf12   : > { %5459 = vmatmul.msk.f32.gmra.mxu0 %vm352_vm0, %v7573_v58  ;;  %5464 = vmatmul.msk.f32.gmra.mxu1 %vm352_vm0, %v7573_v58 }
 0xf1a   : > { %5460 = vmatmul.msk.f32.gmra.mxu0 %vm352_vm0, %v7582_v4  ;;  %5465 = vmatmul.msk.f32.gmra.mxu1 %vm352_vm0, %v7582_v4 }
 0xf22   : > { %5461 = vmatmul.msk.f32.gmra.mxu0 %vm352_vm0, %v7698_v50  ;;  %5466 = vmatmul.msk.f32.gmra.mxu1 %vm352_vm0, %v7698_v50 }
 0xf77   : > { %v3693_v3 = vpop.f32.mrf.mxu0  ;;  %v3713_v55 = vpop.f32.mrf.mxu1 }
 0xf78   : > { %v3718_v30 = vrot.slane %v3713_v55, 7  ;;  %v7744_v55 = vld [vmem:[%s5928_s30 + $0x180] sm:$0xff] }
 0xf7a   : > { %v3719_v59 = vsel %vm494_vm1, %v3693_v3, %v3718_v30  ;;  %v3905_v3 = vmul.f32 %v7727_v10, %v7624_v63  ;;  %v3902_v30 = vmul.f32 %v7732_v24, %v7632_v8 }
 0xf7b   : > { %3722 = vst.msk [vmem:[#allocation2 + $0x25] ss:$8 sm:$0x3] %vm6103_vm2, %v3719_v59  ;;  %v7751_v59 = vld [vmem:[%s5928_s30 + $0x188] sm:$0xff] }
 0xf7f   : > { %v3773_v9 = vpop.f32.mrf.mxu0  ;;  %v3805_v60 = vpop.f32.mrf.mxu1 }
 0xf80   : > { %v3820_v1 = vadd.f32 %v3773_v9, %v6032_v48  ;;  %v3821_v20 = vadd.f32 %v3805_v60, %v6032_v48  ;;  %v3903_v9 = vmul.f32 %v7737_v49, %v7640_v44  ;;  %v3900_v60 = vmul.f32 %v7744_v55, %v7655_v6 }
 0xf82   : > { %v3828_v19 = vmax.f32 %v3820_v1, 0.0  ;;  %v3829_v29 = vmax.f32 %v3821_v20, 0.0 }
 0xf87   : > { %v3776_v34 = vpop.f32.mrf.mxu0  ;;  %v3808_v62 = vpop.f32.mrf.mxu1 }
 0xf88   : > { %v3822_v40 = vadd.f32 %v3776_v34, %v6024_v39  ;;  %v3823_v53 = vadd.f32 %v3808_v62, %v6024_v39  ;;  %v3901_v34 = vmul.f32 %v7751_v59, %v7665_v32  ;;  %v3657_v62 = vpop.f32.mrf.mxu3 }
 0xf8a   : > { %v3830_v25 = vmax.f32 %v3822_v40, 0.0  ;;  %v3831_v35 = vmax.f32 %v3823_v53, 0.0 }
 0xf8f   : > { %v3779_v52 = vpop.f32.mrf.mxu0  ;;  %v3811_v57 = vpop.f32.mrf.mxu1 }
 0xf90   : > { %v3824_v7 = vadd.f32 %v3779_v52, %v6026_v41  ;;  %v3825_v36 = vadd.f32 %v3811_v57, %v6026_v41  ;;  %v3726_v52 = vrot.slane %v3657_v62, 7  ;;  %v3625_v57 = vpop.f32.mrf.mxu2 }
 0xf92   : > { %v3832_v14 = vmax.f32 %v3824_v7, 0.0  ;;  %v3833_v46 = vmax.f32 %v3825_v36, 0.0 }
 0xf97   : > { %v3782_v54 = vpop.f32.mrf.mxu0  ;;  %v3814_v12 = vpop.f32.mrf.mxu1 }
 0xf98   : > { %v3826_v22 = vadd.f32 %v3782_v54, %v6022_v37  ;;  %v3827_v33 = vadd.f32 %v3814_v12, %v6022_v37  ;;  %v3727_v54 = vsel %vm494_vm1, %v3625_v57, %v3726_v52 }
 0xf99   : > { %3730 = vst.msk [vmem:[#allocation3 + $0x25] ss:$8 sm:$0x3] %vm6103_vm2, %v3727_v54  ;;  %v7797_v54 = vld [vmem:[%s5928_s30 + $0x1f0] sm:$0xff] }
 0xf9a   : > { %v3834_v42 = vmax.f32 %v3826_v22, 0.0  ;;  %v3835_v16 = vmax.f32 %v3827_v33, 0.0 }
 0xf9c   : > { %3848 = vmatpush.msra.mxu2 %v3834_v42  ;;  %3868 = vmatpush.msra.mxu3 %v3835_v16 }
 0xf9e   : > { %3849 = vmatpush.msra.mxu2 %v3832_v14  ;;  %3869 = vmatpush.msra.mxu3 %v3833_v46 }
 0xf9f   : > { %v3817_v40 = vpop.f32.mrf.mxu1  ;;  %v3785_v16 = vpop.f32.mrf.mxu0 }
 0xfa0   : > { %3850 = vmatpush.msra.mxu2 %v3830_v25  ;;  %3870 = vmatpush.msra.mxu3 %v3831_v35  ;;  %v3886_v53 = vrot.slane %v3817_v40, 7 }
 0xfa2   : > { %3851 = vmatpush.msra.mxu2 %v3828_v19  ;;  %3871 = vmatpush.msra.mxu3 %v3829_v29  ;;  %v3887_v1 = vsel %vm494_vm1, %v3785_v16, %v3886_v53  ;;  %v7808_v16 = vld [vmem:[%s5928_s30 + $0x1e8] sm:$0xff] }
 0xfa3   : > { %5467 = vmatmul.msk.f32.vlgmr.msra.gmra.mxu2 %vm352_vm0, %v7648_v17  ;;  %5468 = vmatmul.msk.f32.vlgmr.msra.gmra.mxu3 %vm352_vm0, %v7648_v17  ;;  %3890 = vst.msk [vmem:[#allocation3 + $0x26] ss:$8 sm:$0x3] %vm6103_vm2, %v3887_v1 }
 0xfa4   : > { %3920 = vmatpush.msrb.mxu2 %v3906_v31  ;;  %3952 = vmatpush.msrb.mxu3 %v3907_v2 }
 0xfa6   : > { %3921 = vmatpush.msrb.mxu2 %v3904_v26  ;;  %3953 = vmatpush.msrb.mxu3 %v3905_v3 }
 0xfa8   : > { %3922 = vmatpush.msrb.mxu2 %v3902_v30  ;;  %3954 = vmatpush.msrb.mxu3 %v3903_v9 }
 0xfaa   : > { %3923 = vmatpush.msrb.mxu2 %v3900_v60  ;;  %3955 = vmatpush.msrb.mxu3 %v3901_v34 }
 0xfab   : > { %5477 = vmatmul.msk.f32.vlgmr.msrb.gmra.mxu2 %vm352_vm0, %v7555_v18  ;;  %5482 = vmatmul.msk.f32.vlgmr.msrb.gmra.mxu3 %vm352_vm0, %v7555_v18 }
 0xfb3   : > { %5478 = vmatmul.msk.f32.gmra.mxu2 %vm352_vm0, %v7564_v13  ;;  %5483 = vmatmul.msk.f32.gmra.mxu3 %vm352_vm0, %v7564_v13 }
 0xfbb   : > { %5479 = vmatmul.msk.f32.gmra.mxu2 %vm352_vm0, %v7573_v58  ;;  %5484 = vmatmul.msk.f32.gmra.mxu3 %vm352_vm0, %v7573_v58 }
 0xfc3   : > { %5480 = vmatmul.msk.f32.gmra.mxu2 %vm352_vm0, %v7582_v4  ;;  %5485 = vmatmul.msk.f32.gmra.mxu3 %vm352_vm0, %v7582_v4 }
 0xfcb   : > { %5481 = vmatmul.msk.f32.gmra.mxu2 %vm352_vm0, %v7698_v50  ;;  %5486 = vmatmul.msk.f32.gmra.mxu3 %vm352_vm0, %v7698_v50 }
0x1026   : > { %v3853_v7 = vpop.f32.mrf.mxu2  ;;  %v3873_v22 = vpop.f32.mrf.mxu3 }
0x1027   : > { %v3878_v12 = vrot.slane %v3873_v22, 7  ;;  %v7800_v22 = vld [vmem:[%s5928_s30 + $0x1f8] sm:$0xff] }
0x1029   : > { %v3879_v36 = vsel %vm494_vm1, %v3853_v7, %v3878_v12 }
0x102a   : > { %3882 = vst.msk [vmem:[#allocation2 + $0x26] ss:$8 sm:$0x3] %vm6103_vm2, %v3879_v36  ;;  %v7803_v36 = vld [vmem:[%s5928_s30 + $0x1e0] sm:$0xff] }
0x102e   : > { %v3925_v33 = vpop.f32.mrf.mxu2  ;;  %v3957_v42 = vpop.f32.mrf.mxu3 }
0x102f   : > { %v3972_v34 = vadd.f32 %v3925_v33, %v6032_v48  ;;  %v3973_v52 = vadd.f32 %v3957_v42, %v6032_v48  ;;  %v4058_v42 = vmul.f32 %v7797_v54, %v7604_v61  ;;  %v4057_v61 = vmul.f32 %v7808_v16, %v7624_v63 }
0x1031   : > { %v3980_v33 = vmax.f32 %v3972_v34, 0.0  ;;  %v3981_v1 = vmax.f32 %v3973_v52, 0.0 }
0x1036   : > { %v3928_v14 = vpop.f32.mrf.mxu2  ;;  %v3960_v20 = vpop.f32.mrf.mxu3 }
0x1037   : > { %v3974_v3 = vadd.f32 %v3928_v14, %v6024_v39  ;;  %v3975_v9 = vadd.f32 %v3960_v20, %v6024_v39  ;;  %v4059_v20 = vmul.f32 %v7800_v22, %v7610_v43 }
0x1039   : > { %v3982_v7 = vmax.f32 %v3974_v3, 0.0  ;;  %v3983_v12 = vmax.f32 %v3975_v9, 0.0 }
0x103e   : > { %v3931_v46 = vpop.f32.mrf.mxu2  ;;  %v3963_v25 = vpop.f32.mrf.mxu3 }
0x103f   : > { %v3976_v19 = vadd.f32 %v3931_v46, %v6026_v41  ;;  %v3977_v2 = vadd.f32 %v3963_v25, %v6026_v41  ;;  %v7813_v46 = vld [vmem:[%s5928_s30 + $0x1d0] sm:$0xff]  ;;  %v4056_v25 = vmul.f32 %v7803_v36, %v7616_v23  ;;  %v7835_v23 = vld [vmem:[%s5928_s30 + $0x1c8] sm:$0xff] }
0x1040   : > { %v4054_v43 = vmul.f32 %v7813_v46, %v7632_v8 }
0x1041   : > { %v3984_v62 = vmax.f32 %v3976_v19, 0.0  ;;  %v3985_v57 = vmax.f32 %v3977_v2, 0.0  ;;  %v4053_v2 = vmul.f32 %v7835_v23, %v7665_v32 }
0x1046   : > { %v3934_v35 = vpop.f32.mrf.mxu2  ;;  %v3966_v29 = vpop.f32.mrf.mxu3 }
0x1047   : > { %v3978_v31 = vadd.f32 %v3934_v35, %v6022_v37  ;;  %v3979_v26 = vadd.f32 %v3966_v29, %v6022_v37  ;;  %v7818_v35 = vld [vmem:[%s5928_s30 + $0x1d8] sm:$0xff] }
0x1048   : > { %v4055_v29 = vmul.f32 %v7818_v35, %v7640_v44 }
0x1049   : > { %v3986_v30 = vmax.f32 %v3978_v31, 0.0  ;;  %v3987_v60 = vmax.f32 %v3979_v26, 0.0  ;;  %v7826_v31 = vld [vmem:[%s5928_s30 + $0x1c0] sm:$0xff]  ;;  %s4975_s30 = sshll.u32 %s5861_s5, 1  ;;  %s4883_s5 = sshll.u32 %s4879_s12, 4  ;;  %s4884_s5 = int_to_ptr.hbm [resolvable:$true] %s4883_s5 }
0x104a   : > { %v4052_v63 = vmul.f32 %v7826_v31, %v7655_v6  ;;  %p291_p6 = scmp.lt.s32.totalorder %s4975_s30, 3  ;;  %s5744_s29 = sshra.s32 %s4884_s5, 4  ;;  %s5745_s29 = int_to_ptr.hbm [resolvable:$true] %s5744_s29 }
0x104b   : > { %4000 = vmatpush.msrb.mxu0 %v3986_v30  ;;  %4020 = vmatpush.msrb.mxu1 %v3987_v60  ;;  %p5751_p4 = scmp.lt.s32.totalorder %s5745_s29, %s8099_s6 }
0x104c   : > { %s8172_s30 = smov (!%p291_p6, %s4975_s30), 3 }
0x104d   : > { %4001 = vmatpush.msrb.mxu0 %v3984_v62  ;;  %4021 = vmatpush.msrb.mxu1 %v3985_v57  ;;  %s4976_s9 = sshll.u32 %s8172_s30, 3  ;;  %s5746_s30 = scalar_lea.hbm %s5745_s29, 16 }
0x104e   : > { %v3969_v40 = vpop.f32.mrf.mxu3  ;;  %v3937_v53 = vpop.f32.mrf.mxu2  ;;  %s294_s21 = scalar_lea.vmem %s8094_s1, %s4976_s9  ;;  %p5747_p13 = scmp.ne.s32.totalorder %s5745_s29, %s5746_s30 }
0x104f   : > { %4002 = vmatpush.msrb.mxu0 %v3982_v7  ;;  %v4038_v14 = vrot.slane %v3969_v40, 7  ;;  %4022 = vmatpush.msrb.mxu1 %v3983_v12  ;;  %p5752_p5 = scmp.lt.s32.totalorder %s5750_s20, %s5746_s30 }
0x1050   : > { %p5748_p0 = pnand %p5747_p13, %p5890_p11 }
0x1051   : > { %4003 = vmatpush.msrb.mxu0 %v3980_v33  ;;  %v4039_v19 = vsel %vm494_vm1, %v3937_v53, %v4038_v14  ;;  %4023 = vmatpush.msrb.mxu1 %v3981_v1  ;;  %p5753_p7 = por %p5752_p5, %p5751_p4 }
0x1052   : > { %5487 = vmatmul.msk.f32.vlgmr.msrb.gmra.mxu0 %vm352_vm0, %v7648_v17  ;;  %4042 = vst.msk [vmem:[#allocation3 + $0x27] ss:$8 sm:$0x3] %vm6103_vm2, %v4039_v19  ;;  %5488 = vmatmul.msk.f32.vlgmr.msrb.gmra.mxu1 %vm352_vm0, %v7648_v17  ;;  %p5749_p3 = pneg %p5748_p0 }
0x1053   : > { %4072 = vmatpush.msra.mxu0 %v4058_v42  ;;  %4104 = vmatpush.msra.mxu1 %v4059_v20 }
0x1054   : > { %p5754_p8 = pnand %p5753_p7, %p5749_p3 }
0x1055   : > { %4073 = vmatpush.msra.mxu0 %v4056_v25  ;;  %4105 = vmatpush.msra.mxu1 %v4057_v61 }
0x1057   : > { %4074 = vmatpush.msra.mxu0 %v4054_v43  ;;  %4106 = vmatpush.msra.mxu1 %v4055_v29 }
0x1059   : > { %4075 = vmatpush.msra.mxu0 %v4052_v63  ;;  %4107 = vmatpush.msra.mxu1 %v4053_v2  ;;  %v4218_v63 = vmul.f32 %v7716_v11, %v7607_v28 }
0x105a   : > { %5497 = vmatmul.msk.f32.vlgmr.msra.gmra.mxu0 %vm352_vm0, %v7555_v18  ;;  %5502 = vmatmul.msk.f32.vlgmr.msra.gmra.mxu1 %vm352_vm0, %v7555_v18 }
0x1062   : > { %5498 = vmatmul.msk.f32.gmra.mxu0 %vm352_vm0, %v7564_v13  ;;  %5503 = vmatmul.msk.f32.gmra.mxu1 %vm352_vm0, %v7564_v13 }
0x106a   : > { %5499 = vmatmul.msk.f32.gmra.mxu0 %vm352_vm0, %v7573_v58  ;;  %5504 = vmatmul.msk.f32.gmra.mxu1 %vm352_vm0, %v7573_v58 }
0x1072   : > { %5500 = vmatmul.msk.f32.gmra.mxu0 %vm352_vm0, %v7582_v4  ;;  %5505 = vmatmul.msk.f32.gmra.mxu1 %vm352_vm0, %v7582_v4 }
0x107a   : > { %5501 = vmatmul.msk.f32.gmra.mxu0 %vm352_vm0, %v7698_v50  ;;  %5506 = vmatmul.msk.f32.gmra.mxu1 %vm352_vm0, %v7698_v50 }
0x10cf   : > { %v4005_v8 = vpop.f32.mrf.mxu0  ;;  %v4025_v44 = vpop.f32.mrf.mxu1 }
0x10d0   : > { %v4030_v6 = vrot.slane %v4025_v44, 7  ;;  %v4216_v44 = vmul.f32 %v7722_v38, %v7619_v5 }
0x10d2   : > { %v4031_v32 = vsel %vm494_vm1, %v4005_v8, %v4030_v6  ;;  %v4219_v8 = vmul.f32 %v7719_v45, %v7613_v56  ;;  %v4217_v6 = vmul.f32 %v7727_v10, %v7627_v21 }
0x10d3   : > { %4034 = vst.msk [vmem:[#allocation2 + $0x27] ss:$8 sm:$0x3] %vm6103_vm2, %v4031_v32  ;;  %v4214_v32 = vmul.f32 %v7732_v24, %v7635_v15 }
0x10d7   : > { %v4077_v26 = vpop.f32.mrf.mxu0  ;;  %v4109_v3 = vpop.f32.mrf.mxu1 }
0x10d8   : > { %v4124_v14 = vadd.f32 %v4077_v26, %v6032_v48  ;;  %v4125_v25 = vadd.f32 %v4109_v3, %v6032_v48  ;;  %v4215_v26 = vmul.f32 %v7737_v49, %v7643_v47  ;;  %v4212_v3 = vmul.f32 %v7744_v55, %v7658_v51 }
0x10da   : > { %v4132_v29 = vmax.f32 %v4124_v14, 0.0  ;;  %v4133_v2 = vmax.f32 %v4125_v25, 0.0 }
0x10df   : > { %v4080_v30 = vpop.f32.mrf.mxu0  ;;  %v4112_v9 = vpop.f32.mrf.mxu1 }
0x10e0   : > { %v4126_v40 = vadd.f32 %v4080_v30, %v6024_v39  ;;  %v4127_v42 = vadd.f32 %v4112_v9, %v6024_v39  ;;  %v4213_v30 = vmul.f32 %v7751_v59, %v7668_v0 }
0x10e2   : > { %v4134_v61 = vmax.f32 %v4126_v40, 0.0  ;;  %v4135_v43 = vmax.f32 %v4127_v42, 0.0 }
0x10e7   : > { %v4083_v60 = vpop.f32.mrf.mxu0  ;;  %v4115_v34 = vpop.f32.mrf.mxu1 }
0x10e8   : > { %v4128_v52 = vadd.f32 %v4083_v60, %v6026_v41  ;;  %v4129_v12 = vadd.f32 %v4115_v34, %v6026_v41 }
0x10ea   : > { %v4136_v20 = vmax.f32 %v4128_v52, 0.0  ;;  %v4137_v19 = vmax.f32 %v4129_v12, 0.0 }
0x10ef   : > { %v4086_v62 = vpop.f32.mrf.mxu0  ;;  %v4118_v7 = vpop.f32.mrf.mxu1 }
0x10f0   : > { %v4130_v57 = vadd.f32 %v4086_v62, %v6022_v37  ;;  %v4131_v33 = vadd.f32 %v4118_v7, %v6022_v37 }
0x10f2   : > { %v4138_v53 = vmax.f32 %v4130_v57, 0.0  ;;  %v4139_v1 = vmax.f32 %v4131_v33, 0.0 }
0x10f4   : > { %4152 = vmatpush.msra.mxu2 %v4138_v53  ;;  %4172 = vmatpush.msra.mxu3 %v4139_v1 }
0x10f6   : > { %4153 = vmatpush.msra.mxu2 %v4136_v20  ;;  %4173 = vmatpush.msra.mxu3 %v4137_v19 }
0x10f8   : > { %4154 = vmatpush.msra.mxu2 %v4134_v61  ;;  %4174 = vmatpush.msra.mxu3 %v4135_v43 }
0x10fa   : > { %4155 = vmatpush.msra.mxu2 %v4132_v29  ;;  %4175 = vmatpush.msra.mxu3 %v4133_v2 }
0x10fb   : > { %5507 = vmatmul.msk.f32.vlgmr.msra.gmra.mxu2 %vm352_vm0, %v7648_v17  ;;  %5508 = vmatmul.msk.f32.vlgmr.msra.gmra.mxu3 %vm352_vm0, %v7648_v17 }
0x10fc   : > { %4232 = vmatpush.msrb.mxu2 %v4218_v63  ;;  %4264 = vmatpush.msrb.mxu3 %v4219_v8 }
0x10fe   : > { %4233 = vmatpush.msrb.mxu2 %v4216_v44  ;;  %4265 = vmatpush.msrb.mxu3 %v4217_v6 }
0x1100   : > { %4234 = vmatpush.msrb.mxu2 %v4214_v32  ;;  %4266 = vmatpush.msrb.mxu3 %v4215_v26 }
0x1102   : > { %4235 = vmatpush.msrb.mxu2 %v4212_v3  ;;  %4267 = vmatpush.msrb.mxu3 %v4213_v30  ;;  %v4370_v3 = vmul.f32 %v7797_v54, %v7607_v28  ;;  %v4366_v28 = vmul.f32 %v7813_v46, %v7635_v15 }
0x1103   : > { %5525 = vmatmul.msk.f32.vlgmr.msrb.gmra.mxu2 %vm352_vm0, %v7555_v18  ;;  %5530 = vmatmul.msk.f32.vlgmr.msrb.gmra.mxu3 %vm352_vm0, %v7555_v18 }
0x110b   : > { %5526 = vmatmul.msk.f32.gmra.mxu2 %vm352_vm0, %v7564_v13  ;;  %5531 = vmatmul.msk.f32.gmra.mxu3 %vm352_vm0, %v7564_v13 }
0x1113   : > { %5527 = vmatmul.msk.f32.gmra.mxu2 %vm352_vm0, %v7573_v58  ;;  %5532 = vmatmul.msk.f32.gmra.mxu3 %vm352_vm0, %v7573_v58 }
0x111b   : > { %5528 = vmatmul.msk.f32.gmra.mxu2 %vm352_vm0, %v7582_v4  ;;  %5533 = vmatmul.msk.f32.gmra.mxu3 %vm352_vm0, %v7582_v4 }
0x1123   : > { %5529 = vmatmul.msk.f32.gmra.mxu2 %vm352_vm0, %v7698_v50  ;;  %5534 = vmatmul.msk.f32.gmra.mxu3 %vm352_vm0, %v7698_v50 }
0x117e   : > { %v4157_v9 = vpop.f32.mrf.mxu2  ;;  %v4177_v60 = vpop.f32.mrf.mxu3 }
0x117f   : > { %v4182_v34 = vrot.slane %v4177_v60, 7  ;;  %v4368_v60 = vmul.f32 %v7803_v36, %v7619_v5 }
0x1181   : > { %v4183_v62 = vsel %vm494_vm1, %v4157_v9, %v4182_v34  ;;  %v4371_v9 = vmul.f32 %v7800_v22, %v7613_v56  ;;  %v4369_v34 = vmul.f32 %v7808_v16, %v7627_v21  ;;  %v4367_v56 = vmul.f32 %v7818_v35, %v7643_v47 }
0x1182   : > { %4186 = vst.msk [vmem:[#allocation2 + $0x30] ss:$8 sm:$0x3] %vm6103_vm2, %v4183_v62  ;;  %v4121_v62 = vpop.f32.mrf.mxu1  ;;  %v4365_v21 = vmul.f32 %v7835_v23, %v7668_v0 }
0x1183   : > { %v4190_v5 = vrot.slane %v4121_v62, 7  ;;  %v4528_v62 = vmul.f32 %v7803_v36, %v7722_v38  ;;  %v4524_v38 = vmul.f32 %v7826_v31, %v7744_v55 }
0x1186   : > { %v4237_v52 = vpop.f32.mrf.mxu2  ;;  %v4269_v57 = vpop.f32.mrf.mxu3 }
0x1187   : > { %v4284_v63 = vadd.f32 %v4237_v52, %v6032_v48  ;;  %v4285_v8 = vadd.f32 %v4269_v57, %v6032_v48  ;;  %v4364_v52 = vmul.f32 %v7826_v31, %v7658_v51  ;;  %v4089_v57 = vpop.f32.mrf.mxu0 }
0x1189   : > { %v4292_v26 = vmax.f32 %v4284_v63, 0.0  ;;  %v4293_v30 = vmax.f32 %v4285_v8, 0.0 }
0x118e   : > { %v4240_v7 = vpop.f32.mrf.mxu2  ;;  %v4272_v12 = vpop.f32.mrf.mxu3 }
0x118f   : > { %v4286_v19 = vadd.f32 %v4240_v7, %v6024_v39  ;;  %v4287_v43 = vadd.f32 %v4272_v12, %v6024_v39  ;;  %v4191_v7 = vsel %vm494_vm1, %v4089_v57, %v4190_v5 }
0x1190   : > { %4194 = vst.msk [vmem:[#allocation3 + $0x30] ss:$8 sm:$0x3] %vm6103_vm2, %v4191_v7 }
0x1191   : > { %v4294_v6 = vmax.f32 %v4286_v19, 0.0  ;;  %v4295_v32 = vmax.f32 %v4287_v43, 0.0 }
0x1196   : > { %v4243_v33 = vpop.f32.mrf.mxu2  ;;  %v4275_v40 = vpop.f32.mrf.mxu3 }
0x1197   : > { %v4288_v42 = vadd.f32 %v4243_v33, %v6026_v41  ;;  %v4289_v20 = vadd.f32 %v4275_v40, %v6026_v41 }
0x1199   : > { %v4296_v2 = vmax.f32 %v4288_v42, 0.0  ;;  %v4297_v44 = vmax.f32 %v4289_v20, 0.0 }
0x119e   : > { %v4246_v53 = vpop.f32.mrf.mxu2  ;;  %v4278_v14 = vpop.f32.mrf.mxu3 }
0x119f   : > { %v4290_v1 = vadd.f32 %v4246_v53, %v6022_v37  ;;  %v4291_v25 = vadd.f32 %v4278_v14, %v6022_v37 }
0x11a1   : > { %v4298_v61 = vmax.f32 %v4290_v1, 0.0  ;;  %v4299_v29 = vmax.f32 %v4291_v25, 0.0 }
0x11a3   : > { %4312 = vmatpush.msrb.mxu0 %v4298_v61  ;;  %4332 = vmatpush.msrb.mxu1 %v4299_v29 }
0x11a5   : > { %4313 = vmatpush.msrb.mxu0 %v4296_v2  ;;  %4333 = vmatpush.msrb.mxu1 %v4297_v44 }
0x11a7   : > { %4314 = vmatpush.msrb.mxu0 %v4294_v6  ;;  %4334 = vmatpush.msrb.mxu1 %v4295_v32 }
0x11a9   : > { %4315 = vmatpush.msrb.mxu0 %v4292_v26  ;;  %4335 = vmatpush.msrb.mxu1 %v4293_v30 }
0x11aa   : > { %5535 = vmatmul.msk.f32.vlgmr.msrb.gmra.mxu0 %vm352_vm0, %v7648_v17  ;;  %5536 = vmatmul.msk.f32.vlgmr.msrb.gmra.mxu1 %vm352_vm0, %v7648_v17 }
0x11ab   : > { %4384 = vmatpush.msra.mxu0 %v4370_v3  ;;  %4416 = vmatpush.msra.mxu1 %v4371_v9 }
0x11ad   : > { %4385 = vmatpush.msra.mxu0 %v4368_v60  ;;  %4417 = vmatpush.msra.mxu1 %v4369_v34  ;;  %v4530_v60 = vmul.f32 %v7797_v54, %v7716_v11  ;;  %v4526_v11 = vmul.f32 %v7813_v46, %v7732_v24  ;;  %v4525_v54 = vmul.f32 %v7835_v23, %v7751_v59 }
0x11af   : > { %4386 = vmatpush.msra.mxu0 %v4366_v28  ;;  %4418 = vmatpush.msra.mxu1 %v4367_v56  ;;  %v4531_v28 = vmul.f32 %v7800_v22, %v7719_v45  ;;  %v4529_v56 = vmul.f32 %v7808_v16, %v7727_v10  ;;  %v4527_v45 = vmul.f32 %v7818_v35, %v7737_v49  ;;  %v4281_v10 = vpop.f32.mrf.mxu3  ;;  %v4249_v49 = vpop.f32.mrf.mxu2 }
0x11b0   : > { %v4350_v24 = vrot.slane %v4281_v10, 7 }
0x11b1   : > { %4387 = vmatpush.msra.mxu0 %v4364_v52  ;;  %4419 = vmatpush.msra.mxu1 %v4365_v21 }
0x11b2   : > { %5545 = vmatmul.msk.f32.vlgmr.msra.gmra.mxu0 %vm352_vm0, %v7555_v18  ;;  %5550 = vmatmul.msk.f32.vlgmr.msra.gmra.mxu1 %vm352_vm0, %v7555_v18  ;;  %v4351_v22 = vsel %vm494_vm1, %v4249_v49, %v4350_v24 }
0x11b3   : > { %4354 = vst.msk [vmem:[#allocation3 + $0x31] ss:$8 sm:$0x3] %vm6103_vm2, %v4351_v22 }
0x11ba   : > { %5546 = vmatmul.msk.f32.gmra.mxu0 %vm352_vm0, %v7564_v13  ;;  %5551 = vmatmul.msk.f32.gmra.mxu1 %vm352_vm0, %v7564_v13 }
0x11c2   : > { %5547 = vmatmul.msk.f32.gmra.mxu0 %vm352_vm0, %v7573_v58  ;;  %5552 = vmatmul.msk.f32.gmra.mxu1 %vm352_vm0, %v7573_v58 }
0x11ca   : > { %5548 = vmatmul.msk.f32.gmra.mxu0 %vm352_vm0, %v7582_v4  ;;  %5553 = vmatmul.msk.f32.gmra.mxu1 %vm352_vm0, %v7582_v4 }
0x11d2   : > { %5549 = vmatmul.msk.f32.gmra.mxu0 %vm352_vm0, %v7698_v50  ;;  %5554 = vmatmul.msk.f32.gmra.mxu1 %vm352_vm0, %v7698_v50 }
0x1227   : > { %v4317_v15 = vpop.f32.mrf.mxu0  ;;  %v4337_v47 = vpop.f32.mrf.mxu1 }
0x1228   : > { %v4342_v51 = vrot.slane %v4337_v47, 7 }
0x122a   : > { %v4343_v0 = vsel %vm494_vm1, %v4317_v15, %v4342_v51 }
0x122b   : > { %4346 = vst.msk [vmem:[#allocation2 + $0x31] ss:$8 sm:$0x3] %vm6103_vm2, %v4343_v0 }
0x122f   : > { %v4389_v12 = vpop.f32.mrf.mxu0  ;;  %v4421_v33 = vpop.f32.mrf.mxu1 }
0x1230   : > { %v4436_v44 = vadd.f32 %v4389_v12, %v6032_v48  ;;  %v4437_v32 = vadd.f32 %v4421_v33, %v6032_v48 }
0x1232   : > { %v4444_v9 = vmax.f32 %v4436_v44, 0.0  ;;  %v4445_v34 = vmax.f32 %v4437_v32, 0.0  ;;  %v4668_v44 = vld [vmem:[#allocation2] sm:$0xff] }
0x1237   : > { %v4392_v40 = vpop.f32.mrf.mxu0  ;;  %v4424_v53 = vpop.f32.mrf.mxu1 }
0x1238   : > { %v4438_v29 = vadd.f32 %v4392_v40, %v6024_v39  ;;  %v4439_v2 = vadd.f32 %v4424_v53, %v6024_v39 }
0x123a   : > { %v4446_v3 = vmax.f32 %v4438_v29, 0.0  ;;  %v4447_v30 = vmax.f32 %v4439_v2, 0.0  ;;  %v4672_v2 = vld [vmem:[#allocation2 + $0x20] sm:$0xff] }
0x123f   : > { %v4395_v42 = vpop.f32.mrf.mxu0  ;;  %v4427_v1 = vpop.f32.mrf.mxu1 }
0x1240   : > { %v4440_v20 = vadd.f32 %v4395_v42, %v6026_v41  ;;  %v4441_v61 = vadd.f32 %v4427_v1, %v6026_v41 }
0x1242   : > { %v4448_v6 = vmax.f32 %v4440_v20, 0.0  ;;  %v4449_v26 = vmax.f32 %v4441_v61, 0.0 }
0x1247   : > { %v4398_v14 = vpop.f32.mrf.mxu0  ;;  %v4430_v19 = vpop.f32.mrf.mxu1 }
0x1248   : > { %v4442_v25 = vadd.f32 %v4398_v14, %v6022_v37  ;;  %v4443_v43 = vadd.f32 %v4430_v19, %v6022_v37 }
0x124a   : > { %v4450_v63 = vmax.f32 %v4442_v25, 0.0  ;;  %v4451_v8 = vmax.f32 %v4443_v43, 0.0 }
0x124c   : > { %4464 = vmatpush.msra.mxu2 %v4450_v63  ;;  %4484 = vmatpush.msra.mxu3 %v4451_v8  ;;  %v4673_v8 = vld [vmem:[#allocation2 + $0x28] sm:$0xff] }
0x124e   : > { %4465 = vmatpush.msra.mxu2 %v4448_v6  ;;  %4485 = vmatpush.msra.mxu3 %v4449_v26  ;;  %v4669_v26 = vld [vmem:[#allocation2 + $0x8] sm:$0xff] }
0x124f   : > { %v4433_v36 = vpop.f32.mrf.mxu1  ;;  %v4401_v35 = vpop.f32.mrf.mxu0 }
0x1250   : > { %4466 = vmatpush.msra.mxu2 %v4446_v3  ;;  %4486 = vmatpush.msra.mxu3 %v4447_v30  ;;  %v4502_v46 = vrot.slane %v4433_v36, 7  ;;  %v4670_v3 = vld [vmem:[#allocation2 + $0x10] sm:$0xff]  ;;  %v4671_v30 = vld [vmem:[#allocation2 + $0x18] sm:$0xff] }
0x1252   : > { %4467 = vmatpush.msra.mxu2 %v4444_v9  ;;  %4487 = vmatpush.msra.mxu3 %v4445_v34  ;;  %v4695_v34 = vmax.f32 %v4669_v26, %v4673_v8 }
0x1253   : > { %5555 = vmatmul.msk.f32.vlgmr.msra.gmra.mxu2 %vm352_vm0, %v7648_v17  ;;  %5556 = vmatmul.msk.f32.vlgmr.msra.gmra.mxu3 %vm352_vm0, %v7648_v17 }
0x1254   : > { %4544 = vmatpush.msrb.mxu2 %v4530_v60  ;;  %4576 = vmatpush.msrb.mxu3 %v4531_v28  ;;  %v4684_v60 = vmax.f32 %v4668_v44, %v4672_v2 }
0x1256   : > { %4545 = vmatpush.msrb.mxu2 %v4528_v62  ;;  %4577 = vmatpush.msrb.mxu3 %v4529_v56 }
0x1258   : > { %4546 = vmatpush.msrb.mxu2 %v4526_v11  ;;  %4578 = vmatpush.msrb.mxu3 %v4527_v45 }
0x125a   : > { %4547 = vmatpush.msrb.mxu2 %v4524_v38  ;;  %4579 = vmatpush.msrb.mxu3 %v4525_v54 }
0x125b   : > { %5573 = vmatmul.msk.f32.vlgmr.msrb.gmra.mxu2 %vm352_vm0, %v7555_v18  ;;  %5578 = vmatmul.msk.f32.vlgmr.msrb.gmra.mxu3 %vm352_vm0, %v7555_v18 }
0x1263   : > { %5574 = vmatmul.msk.f32.gmra.mxu2 %vm352_vm0, %v7564_v13  ;;  %5579 = vmatmul.msk.f32.gmra.mxu3 %vm352_vm0, %v7564_v13 }
0x126b   : > { %5575 = vmatmul.msk.f32.gmra.mxu2 %vm352_vm0, %v7573_v58  ;;  %5580 = vmatmul.msk.f32.gmra.mxu3 %vm352_vm0, %v7573_v58 }
0x1273   : > { %5576 = vmatmul.msk.f32.gmra.mxu2 %vm352_vm0, %v7582_v4  ;;  %5581 = vmatmul.msk.f32.gmra.mxu3 %vm352_vm0, %v7582_v4  ;;  %v4503_v4 = vsel %vm494_vm1, %v4401_v35, %v4502_v46 }
0x1274   : > { %4506 = vst.msk [vmem:[#allocation3 + $0x32] ss:$8 sm:$0x3] %vm6103_vm2, %v4503_v4 }
0x127b   : > { %5577 = vmatmul.msk.f32.gmra.mxu2 %vm352_vm0, %v7698_v50  ;;  %5582 = vmatmul.msk.f32.gmra.mxu3 %vm352_vm0, %v7698_v50 }
0x12d6   : > { %v4469_v18 = vpop.f32.mrf.mxu2  ;;  %v4489_v13 = vpop.f32.mrf.mxu3 }
0x12d7   : > { %v4494_v55 = vrot.slane %v4489_v13, 7 }
0x12d9   : > { %v4495_v59 = vsel %vm494_vm1, %v4469_v18, %v4494_v55 }
0x12da   : > { %4498 = vst.msk [vmem:[#allocation2 + $0x32] ss:$8 sm:$0x3] %vm6103_vm2, %v4495_v59 }
0x12de   : > { %v4549_v58 = vpop.f32.mrf.mxu2  ;;  %v4581_v16 = vpop.f32.mrf.mxu3 }
0x12df   : > { %v4596_v40 = vadd.f32 %v4549_v58, %v6032_v48  ;;  %v4597_v42 = vadd.f32 %v4581_v16, %v6032_v48 }
0x12e1   : > { %v4605_v19 = vmax.f32 %v4597_v42, 0.0  ;;  %v4678_v42 = vld [vmem:[#allocation3 + $0x10] sm:$0xff] }
0x12e6   : > { %v4552_v31 = vpop.f32.mrf.mxu2  ;;  %v4584_v50 = vpop.f32.mrf.mxu3 }
0x12e7   : > { %v4598_v51 = vadd.f32 %v4552_v31, %v6024_v39  ;;  %v4599_v12 = vadd.f32 %v4584_v50, %v6024_v39 }
0x12e9   : > { %v4606_v14 = vmax.f32 %v4598_v51, 0.0  ;;  %v4607_v20 = vmax.f32 %v4599_v12, 0.0 }
0x12ee   : > { %v4555_v23 = vpop.f32.mrf.mxu2  ;;  %v4587_v5 = vpop.f32.mrf.mxu3 }
0x12ef   : > { %v4600_v57 = vadd.f32 %v4555_v23, %v6026_v41  ;;  %v4601_v15 = vadd.f32 %v4587_v5, %v6026_v41  ;;  %v4604_v41 = vmax.f32 %v4596_v40, 0.0 }
0x12f1   : > { %v4608_v53 = vmax.f32 %v4600_v57, 0.0  ;;  %v4609_v1 = vmax.f32 %v4601_v15, 0.0 }
0x12f6   : > { %v4558_v52 = vpop.f32.mrf.mxu2  ;;  %v4590_v7 = vpop.f32.mrf.mxu3 }
0x12f7   : > { %v4602_v21 = vadd.f32 %v4558_v52, %v6022_v37  ;;  %v4603_v47 = vadd.f32 %v4590_v7, %v6022_v37 }
0x12f9   : > { %v4610_v0 = vmax.f32 %v4602_v21, 0.0  ;;  %v4611_v33 = vmax.f32 %v4603_v47, 0.0 }
0x12fb   : > { %4624 = vmatpush.msrb.mxu0 %v4610_v0  ;;  %4644 = vmatpush.msrb.mxu1 %v4611_v33  ;;  %v4676_v0 = vld [vmem:[#allocation3] sm:$0xff]  ;;  %v4677_v33 = vld [vmem:[#allocation3 + $0x8] sm:$0xff] }
0x12fd   : > { %4625 = vmatpush.msrb.mxu0 %v4608_v53  ;;  %4645 = vmatpush.msrb.mxu1 %v4609_v1 }
0x12fe   : > { %v4593_v37 = vpop.f32.mrf.mxu3  ;;  %v4561_v25 = vpop.f32.mrf.mxu2 }
0x12ff   : > { %4626 = vmatpush.msrb.mxu0 %v4606_v14  ;;  %v4662_v61 = vrot.slane %v4593_v37, 7  ;;  %4646 = vmatpush.msrb.mxu1 %v4607_v20  ;;  %v4679_v20 = vld [vmem:[#allocation3 + $0x18] sm:$0xff] }
0x1301   : > { %4627 = vmatpush.msrb.mxu0 %v4604_v41  ;;  %v4663_v39 = vsel %vm494_vm1, %v4561_v25, %v4662_v61  ;;  %4647 = vmatpush.msrb.mxu1 %v4605_v19 }
0x1302   : > { %5583 = vmatmul.msk.f32.vlgmr.msrb.gmra.mxu0 %vm352_vm0, %v7648_v17  ;;  %4666 = vst.msk [vmem:[#allocation3 + $0x33] ss:$8 sm:$0x3] %vm6103_vm2, %v4663_v39  ;;  %5584 = vmatmul.msk.f32.vlgmr.msrb.gmra.mxu1 %vm352_vm0, %v7648_v17 }
0x137f   : > { %v4649_v48 = vpop.f32.mrf.mxu1  ;;  %v4629_v43 = vpop.f32.mrf.mxu0 }
0x1380   : > { %v4654_v29 = vrot.slane %v4649_v48, 7  ;;  %v4680_v48 = vld [vmem:[#allocation3 + $0x20] sm:$0xff] }
0x1382   : > { %v4655_v63 = vsel %vm494_vm1, %v4629_v43, %v4654_v29 }
0x1383   : > { %4658 = vst.msk [vmem:[#allocation2 + $0x33] ss:$8 sm:$0x3] %vm6103_vm2, %v4655_v63 }
0x138a   : > { %v4674_v6 = vld [vmem:[#allocation2 + $0x30] sm:$0xf]  ;;  %v4675_v32 = vld [vmem:[#allocation2 + $0x38] sm:$0xf] }
0x138b   : > { %v4686_v9 = vsel %vm4685_vm3, %v4674_v6, -inf  ;;  %v4696_v17 = vsel %vm4685_vm3, %v4675_v32, -inf }
0x138c   : > { %v4687_v28 = vmax.f32 %v4670_v3, %v4686_v9  ;;  %v4697_v62 = vmax.f32 %v4671_v30, %v4696_v17  ;;  %v4683_v9 = vld [vmem:[#allocation3 + $0x38] sm:$0xf] }
0x138e   : > { %v4688_v56 = vmax.f32 %v4684_v60, %v4687_v28  ;;  %v4698_v27 = vmax.f32 %v4695_v34, %v4697_v62  ;;  %v4807_v62 = vld [vmem:[%s294_s21] sm:$0xff] }
0x1390   : > { %v4689_v11 = vrot.slane %v4688_v56, 4  ;;  %v4699_v45 = vrot.slane %v4698_v27, 4 }
0x1392   : > { %v4690_v38 = vmax.f32 %v4688_v56, %v4689_v11  ;;  %v4700_v54 = vmax.f32 %v4698_v27, %v4699_v45  ;;  %v4808_v11 = vld [vmem:[%s294_s21 + $0x8] sm:$0xff] }
0x1394   : > { %v4691_v10 = vrot.slane %v4690_v38, 2  ;;  %v4701_v24 = vrot.slane %v4700_v54, 2 }
0x1396   : > { %v4692_v49 = vmax.f32 %v4690_v38, %v4691_v10  ;;  %v4702_v22 = vmax.f32 %v4700_v54, %v4701_v24  ;;  %v4809_v24 = vrot.slane %v4807_v62, 4 }
0x1398   : > { %v4693_v18 = vrot.slane %v4692_v49, 1  ;;  %v4703_v13 = vrot.slane %v4702_v22, 1 }
0x139a   : > { %v4694_v55 = vmax.f32 %v4692_v49, %v4693_v18  ;;  %v4704_v59 = vmax.f32 %v4702_v22, %v4703_v13  ;;  %v4815_v18 = vrot.slane %v4808_v11, 4 }
0x139c   : > { %v4705_v58 = vsub.f32 %v4668_v44, %v4694_v55  ;;  %v4706_v36 = vsub.f32 %v4669_v26, %v4704_v59  ;;  %v4707_v16 = vsub.f32 %v4670_v3, %v4694_v55  ;;  %v4708_v46 = vsub.f32 %v4671_v30, %v4704_v59  ;;  %v4681_v26 = vld [vmem:[#allocation3 + $0x28] sm:$0xff] }
0x139d   : > { %v4709_v35 = vsub.f32 %v4672_v2, %v4694_v55  ;;  %v4710_v4 = vsub.f32 %v4673_v8, %v4704_v59  ;;  %v4711_v31 = vsub.f32 %v4674_v6, %v4694_v55  ;;  %v4712_v52 = vsub.f32 %v4675_v32, %v4704_v59  ;;  %v4682_v2 = vld [vmem:[#allocation3 + $0x30] sm:$0xf] }
0x139e   : > { %v4713_v50 = vmul.f32 1.442695, %v4705_v58  ;;  %v4715_v23 = vmul.f32 1.442695, %v4706_v36  ;;  %v4717_v5 = vmul.f32 1.442695, %v4707_v16  ;;  %v4810_v16 = vadd.f32 %v4809_v24, %v4807_v62 }
0x139f   : > { %v4719_v57 = vmul.f32 1.442695, %v4708_v46  ;;  %v4721_v21 = vmul.f32 1.442695, %v4709_v35  ;;  %v4723_v7 = vmul.f32 1.442695, %v4710_v4  ;;  %v4816_v4 = vadd.f32 %v4815_v18, %v4808_v11 }
0x13a0   : > { %5646 = vpow2.f32 %v4713_v50  ;;  %v4725_v15 = vmul.f32 1.442695, %v4711_v31  ;;  %v4727_v47 = vmul.f32 1.442695, %v4712_v52  ;;  %v4811_v52 = vrot.slane %v4810_v16, 2 }
0x13a1   : > { %5648 = vpow2.f32 %v4715_v23 }
0x13a2   : > { %5650 = vpow2.f32 %v4717_v5 }
0x13a3   : > { %5652 = vpow2.f32 %v4719_v57 }
0x13a4   : > { %5654 = vpow2.f32 %v4721_v21 }
0x13a5   : > { %5656 = vpow2.f32 %v4723_v7  ;;  %v4817_v7 = vrot.slane %v4816_v4, 2 }
0x13a6   : > { %v5647_v51 = vpop.eup %5646  ;;  %5658 = vpow2.f32 %v4725_v15 }
0x13a7   : > { %v5649_v12 = vpop.eup %5648  ;;  %5660 = vpow2.f32 %v4727_v47  ;;  %v4749_v40 = vmul.f32 %v5647_v51, %v4676_v0 }
0x13a8   : > { %v5651_v53 = vpop.eup %5650  ;;  %v4750_v1 = vmul.f32 %v5649_v12, %v4677_v33 }
0x13a9   : > { %v5653_v14 = vpop.eup %5652  ;;  %v4729_v41 = vadd.f32 %v5651_v53, %v5647_v51  ;;  %v4751_v37 = vmul.f32 %v5651_v53, %v4678_v42  ;;  %v4812_v51 = vadd.f32 %v4811_v52, %v4810_v16 }
0x13aa   : > { %v5655_v25 = vpop.eup %5654  ;;  %v4739_v19 = vadd.f32 %v5653_v14, %v5649_v12  ;;  %v4752_v61 = vmul.f32 %v5653_v14, %v4679_v20  ;;  %v4818_v12 = vadd.f32 %v4817_v7, %v4816_v4 }
0x13ab   : > { %v5657_v39 = vpop.eup %5656  ;;  %v4730_v43 = vadd.f32 %v5655_v25, %v4729_v41  ;;  %v4757_v29 = vadd.f32 %v4751_v37, %v4749_v40  ;;  %v4753_v44 = vmul.f32 %v5655_v25, %v4680_v48  ;;  %v4813_v40 = vrot.slane %v4812_v51, 1 }
0x13ac   : > { %v5659_v63 = vpop.eup %5658  ;;  %v4740_v8 = vadd.f32 %v5657_v39, %v4739_v19  ;;  %v4767_v6 = vadd.f32 %v4752_v61, %v4750_v1  ;;  %v4754_v34 = vmul.f32 %v5657_v39, %v4681_v26  ;;  %v4819_v1 = vrot.slane %v4818_v12, 1 }
0x13ad   : > { %v5661_v32 = vpop.eup %5660  ;;  %v4731_v3 = vsel %vm4685_vm3, %v5659_v63, 0.0  ;;  %v4755_v30 = vmul.f32 %v5659_v63, %v4682_v2  ;;  %v4758_v28 = vadd.f32 %v4757_v29, %v4753_v44  ;;  %v4814_v19 = vadd.f32 %v4813_v40, %v4812_v51 }
0x13ae   : > { %v4732_v17 = vadd.f32 %v4731_v3, %v4730_v43  ;;  %v4741_v60 = vsel %vm4685_vm3, %v5661_v32, 0.0  ;;  %v4756_v27 = vmul.f32 %v5661_v32, %v4683_v9  ;;  %v4768_v38 = vadd.f32 %v4767_v6, %v4754_v34 }
0x13af   : > { %v4742_v56 = vadd.f32 %v4741_v60, %v4740_v8  ;;  %v4759_v10 = vsel %vm4685_vm3, %v4755_v30, 0.0  ;;  %v4822_v61 = vstv %s8056_s22  ;;  %v4820_v29 = vadd.f32 %v4819_v1, %v4818_v12 }
0x13b0   : > { %v4733_v45 = vrot.slane %v4732_v17, 4  ;;  %v4760_v22 = vadd.f32 %v4759_v10, %v4758_v28  ;;  %v4769_v55 = vsel %vm4685_vm3, %v4756_v27, 0.0  ;;  %v4823_v3 = vadd.f32 %v4822_v61, %v4814_v19 }
0x13b1   : > { %v4743_v54 = vrot.slane %v4742_v56, 4  ;;  %v4770_v58 = vadd.f32 %v4769_v55, %v4768_v38 }
0x13b2   : > { %v4734_v49 = vadd.f32 %v4733_v45, %v4732_v17  ;;  %v4761_v35 = vrot.slane %v4760_v22, 4  ;;  %v4824_v17 = vadd.f32 %v4822_v61, %v4820_v29 }
0x13b3   : > { %v4744_v13 = vadd.f32 %v4743_v54, %v4742_v56  ;;  %v4771_v23 = vrot.slane %v4770_v58, 4 }
0x13b4   : > { %v4735_v59 = vrot.slane %v4734_v49, 2  ;;  %v4762_v21 = vadd.f32 %v4761_v35, %v4760_v22 }
0x13b5   : > { %v4745_v36 = vrot.slane %v4744_v13, 2  ;;  %v4772_v47 = vadd.f32 %v4771_v23, %v4770_v58 }
0x13b6   : > { %v4736_v46 = vadd.f32 %v4735_v59, %v4734_v49  ;;  %v4763_v0 = vrot.slane %v4762_v21, 2 }
0x13b7   : > { %v4746_v31 = vadd.f32 %v4745_v36, %v4744_v13  ;;  %v4773_v33 = vrot.slane %v4772_v47, 2 }
0x13b8   : > { %v4737_v50 = vrot.slane %v4736_v46, 1  ;;  %v4764_v42 = vadd.f32 %v4763_v0, %v4762_v21 }
0x13b9   : > { %v4747_v5 = vrot.slane %v4746_v31, 1  ;;  %v4774_v41 = vadd.f32 %v4773_v33, %v4772_v47 }
0x13ba   : > { %v4738_v57 = vadd.f32 %v4737_v50, %v4736_v46  ;;  %v4765_v39 = vrot.slane %v4764_v42, 1 }
0x13bb   : > { %v4748_v15 = vadd.f32 %v4747_v5, %v4746_v31  ;;  %v4775_v44 = vrot.slane %v4774_v41, 1 }
0x13bc   : > { %5662 = vrcp.f32 %v4738_v57  ;;  %v4788_v48 = vand.u32 2147483648, %v4738_v57  ;;  %v4786_v2 = vand.u32 2147483647, %v4738_v57  ;;  %vm4782_vm6 = vweird.f32 %v4738_v57 }
0x13bd   : > { %5664 = vrcp.f32 %v4748_v15  ;;  %v4803_v8 = vand.u32 2147483648, %v4748_v15  ;;  %v4801_v32 = vand.u32 2147483647, %v4748_v15  ;;  %vm4797_vm8 = vweird.f32 %v4748_v15 }
0x13be   : > { %v4789_v30 = vor.u32 1.1754944e-38, %v4788_v48  ;;  %v4766_v60 = vadd.f32 %v4765_v39, %v4764_v42  ;;  %vm4787_vm9 = vcmp.eq.f32.partialorder %v4786_v2, 8.507059e+37  ;;  %v4776_v62 = vadd.f32 %v4775_v44, %v4774_v41 }
0x13bf   : > { %v4804_v28 = vor.u32 1.1754944e-38, %v4803_v8  ;;  %vm4802_vm11 = vcmp.eq.f32.partialorder %v4801_v32, 8.507059e+37 }
0x13c2   : > { %v5663_v53 = vpop.eup %5662 }
0x13c3   : > { %v5665_v14 = vpop.eup %5664  ;;  %v4778_v20 = vmul.f32 %v5663_v53, %v4738_v57  ;;  %vm4783_vm4 = vweird.f32 %v5663_v53 }
0x13c4   : > { %v4793_v37 = vmul.f32 %v5665_v14, %v4748_v15  ;;  %vm4798_vm5 = vweird.f32 %v5665_v14  ;;  %vm4784_vm7 = vmor %vm4782_vm6, %vm4783_vm4 }
0x13c5   : > { %v4779_v25 = vsub.f32 1.0, %v4778_v20  ;;  %vm4799_vm10 = vmor %vm4797_vm8, %vm4798_vm5 }
0x13c6   : > { %v4794_v43 = vsub.f32 1.0, %v4793_v37 }
0x13c7   : > { %v4780_v63 = vmul.f32 %v5663_v53, %v4779_v25 }
0x13c8   : > { %v4795_v6 = vmul.f32 %v5665_v14, %v4794_v43 }
0x13c9   : > { %v4781_v26 = vadd.f32 %v5663_v53, %v4780_v63 }
0x13ca   : > { %v4796_v9 = vadd.f32 %v5665_v14, %v4795_v6 }
0x13cb   : > { %v4785_v34 = vsel %vm4784_vm7, %v5663_v53, %v4781_v26 }
0x13cc   : > { %v4790_v56 = vsel %vm4787_vm9, %v4789_v30, %v4785_v34  ;;  %v4800_v27 = vsel %vm4799_vm10, %v5665_v14, %v4796_v9 }
0x13cd   : > { %v4791_v11 = vmul.f32 %v4790_v56, %v4766_v60  ;;  %v4805_v45 = vsel %vm4802_vm11, %v4804_v28, %v4800_v27 }
0x13ce   : > { %v4806_v38 = vmul.f32 %v4805_v45, %v4776_v62 }
0x13cf   : > { %v4825_v54 = vadd.f32 %v4823_v3, %v4791_v11 }
0x13d0   : > { %v4826_v10 = vadd.f32 %v4824_v17, %v4806_v38 }
0x13d1   : > { %v5585_v24 = vmul.f32 -1.442695, %v4825_v54 }
0x13d2   : > { %v5586_v49 = vmul.f32 -1.442695, %v4826_v10 }
0x13d3   : > { %5666 = vpow2.f32 %v5585_v24 }
0x13d4   : > { %5668 = vpow2.f32 %v5586_v49 }
0x13d9   : > { %v5667_v22 = vpop.eup %5666 }
0x13da   : > { %v5669_v18 = vpop.eup %5668  ;;  %v4833_v13 = vadd.f32 1.0, %v5667_v22 }
0x13db   : > { %v4834_v55 = vadd.f32 1.0, %v5669_v18 }
0x13dc   : > { %5670 = vrcp.f32 %v4833_v13  ;;  %v4846_v35 = vand.u32 2147483648, %v4833_v13  ;;  %v4844_v50 = vand.u32 2147483647, %v4833_v13  ;;  %vm4840_vm14 = vweird.f32 %v4833_v13 }
0x13dd   : > { %5672 = vrcp.f32 %v4834_v55  ;;  %v4861_v23 = vand.u32 2147483648, %v4834_v55  ;;  %v4859_v52 = vand.u32 2147483647, %v4834_v55  ;;  %vm4855_vm0 = vweird.f32 %v4834_v55 }
0x13de   : > { %v4847_v21 = vor.u32 1.1754944e-38, %v4846_v35  ;;  %vm4845_vm1 = vcmp.eq.f32.partialorder %v4844_v50, 8.507059e+37 }
0x13df   : > { %v4862_v47 = vor.u32 1.1754944e-38, %v4861_v23  ;;  %vm4860_vm3 = vcmp.eq.f32.partialorder %v4859_v52, 8.507059e+37 }
0x13e2   : > { %v5671_v59 = vpop.eup %5670 }
0x13e3   : > { %v5673_v58 = vpop.eup %5672  ;;  %v4836_v36 = vmul.f32 %v5671_v59, %v4833_v13  ;;  %vm4841_vm12 = vweird.f32 %v5671_v59 }
0x13e4   : > { %v4851_v16 = vmul.f32 %v5673_v58, %v4834_v55  ;;  %vm4856_vm13 = vweird.f32 %v5673_v58  ;;  %vm4842_vm15 = vmor %vm4840_vm14, %vm4841_vm12 }
0x13e5   : > { %v4837_v46 = vsub.f32 1.0, %v4836_v36  ;;  %vm4857_vm2 = vmor %vm4855_vm0, %vm4856_vm13 }
0x13e6   : > { %v4852_v4 = vsub.f32 1.0, %v4851_v16 }
0x13e7   : > { %v4838_v31 = vmul.f32 %v5671_v59, %v4837_v46 }
0x13e8   : > { %v4853_v5 = vmul.f32 %v5673_v58, %v4852_v4 }
0x13e9   : > { %v4839_v57 = vadd.f32 %v5671_v59, %v4838_v31 }
0x13ea   : > { %v4854_v7 = vadd.f32 %v5673_v58, %v4853_v5 }
0x13eb   : > { %v4843_v15 = vsel %vm4842_vm15, %v5671_v59, %v4839_v57 }
0x13ec   : > { %v4848_v51 = vsel %vm4845_vm1, %v4847_v21, %v4843_v15  ;;  %v4858_v0 = vsel %vm4857_vm2, %v5673_v58, %v4854_v7 }
0x13ed   : > { %v4863_v12 = vsel %vm4860_vm3, %v4862_v47, %v4858_v0  ;;  %4865 = vst [vmem:[%s288_s16] sm:$0xff] %v4848_v51 }
0x13ee   : > { %4866 = vst [vmem:[%s288_s16 + $0x8] sm:$0xff] %v4863_v12 }
0x13ef   : > { %5757 = shalt.err (!%p5754_p8)
}
0x13f0   : > { %5596 = dma.vmem_to_hbm [thread:$0]  (%p5890_p11), %s4882_s17, 256, %s4884_s5, %s4868_s27  }
0x13f1 PF: > { %s4895_s19 = sand.u32 1, %s5784_s23   ;;  %p5603_p10 = pnand %p4968_p9, %p5894_p12 }
0x13f2   : > { %s4896_s13 = scalar_lea.sflag [#allocation7], %s4895_s19 }
0x13f3   : > { %p5604_p1 = pneg %p5603_p10 }
0x13f5   : > { %5779 = dma.done.wait (%p5604_p1), %s4896_s13, 256  }
0x13f6   : > { %5781 = vsyncadd (%p5604_p1), %s4896_s13, 4294967040  ;;  %p20_p2 = scmp.ge.s32.totalorder %s5865_s28, 4   ;;  %s8167_s23 = smov %s5788_s24 }
0x13f7   : > { %s8168_s24 = smov %s5792_s25  ;;  %s8169_s25 = smov %s5877_s7 }
0x13f8   : > { %s8170_s26 = smov %s5865_s28  ;;  %22 = sbr.rel (!%p20_p2) target bundleno = 7 (0x7), region = 153 }
0x13fd   :  { %4902 = vsyncpa [#allocation6], 1 }
0x13fe   :  { %4904 = vsyncpa [#allocation6 + $0x1], 1 }
0x13ff   :  { %4905 = vsyncpa [#allocation7], 1 }
0x1400   :  { %4907 = vsyncpa [#allocation7 + $0x1], 1 }

</bundles_post_ra>
